<compile_context>
chip_gen: v7x
topology: tpu7x:2x2x1
jax: 0.10.0
libtpu: 0.0.40
codegen_flags: <defaults>
</compile_context>

<pallas_src>
import numpy as np
import jax
import jax.numpy as jnp
from jax.experimental import pallas as pl
from jax.experimental.pallas import tpu as pltpu


# Lane-aligned (multiple-of-128) column offsets inside the packed bias buffer.
_B1_OFF, _B2_OFF, _B3_OFF, _B4_OFF, _B5_OFF, _B6_OFF = 0, 128, 256, 1280, 1792, 2048


def _round_up(x, m):
    return (x + m - 1) // m * m


def _make_stn_kernel(Bt, Nt, k, n_valid, n_padded):
    kk = k * k
    needs_mask = n_padded != n_valid

    def kernel(x_ref, w1_ref, w2_ref, w3_ref, w4_ref, w5_ref, w6_ref,
               bias_ref, out_ref, feat_acc):
        n = pl.program_id(1)

        @pl.when(n == 0)
        def _init():
            feat_acc[...] = jnp.full(feat_acc.shape, -jnp.inf, dtype=feat_acc.dtype)

        # (Bt, k, Nt) NCW bf16 tile -> (Bt*Nt, k) channels-last rows with a single
        # batched minor-dim transpose (XLU) + layout-free leading-dim merge.
        x2 = jnp.swapaxes(x_ref[...], 1, 2).reshape(Bt * Nt, k)

        b1 = bias_ref[:, _B1_OFF:_B1_OFF + 64]
        b2 = bias_ref[:, _B2_OFF:_B2_OFF + 128]
        b3 = bias_ref[:, _B3_OFF:_B3_OFF + 1024]

        # Pointwise conv stack: Conv1d(ks=1) + folded BN + ReLU == matmul + bias + relu.
        # bf16 MXU feeds, f32 accumulation, f32 bias-add / ReLU.
        h = jnp.maximum(
            jnp.dot(x2, w1_ref[...], preferred_element_type=jnp.float32) + b1, 0.0)
        h = jnp.maximum(
            jnp.dot(h.astype(jnp.bfloat16), w2_ref[...],
                    preferred_element_type=jnp.float32) + b2, 0.0)
        h = jnp.maximum(
            jnp.dot(h.astype(jnp.bfloat16), w3_ref[...],
                    preferred_element_type=jnp.float32) + b3, 0.0)

        # Running per-batch global max-pool over the point axis: one fused
        # sublane reduce (layout-free reshape since Nt is a multiple of 8).
        h = h.reshape(Bt, Nt, 1024)
        if needs_mask:
            pt = jax.lax.broadcasted_iota(jnp.int32, (1, Nt, 1), 1)
            valid = (n * Nt + pt) < n_valid
            # Post-ReLU features are >= 0, so zeroing padded point rows is max-safe.
            h = jnp.where(valid, h, 0.0)
        feat_acc[...] = jnp.maximum(feat_acc[...], jnp.max(h, axis=1))

        @pl.when(n == pl.num_programs(1) - 1)
        def _finalize():
            b4 = bias_ref[:, _B4_OFF:_B4_OFF + 512]
            b5 = bias_ref[:, _B5_OFF:_B5_OFF + 256]
            b6i = bias_ref[:, _B6_OFF:_B6_OFF + kk]   # fc3 bias + flattened identity

            f = feat_acc[...]                                            # (Bt, 1024) f32
            f = jnp.maximum(
                jnp.dot(f.astype(jnp.bfloat16), w4_ref[...],
                        preferred_element_type=jnp.float32) + b4, 0.0)
            f = jnp.maximum(
                jnp.dot(f.astype(jnp.bfloat16), w5_ref[...],
                        preferred_element_type=jnp.float32) + b5, 0.0)
            out_ref[...] = (
                jnp.dot(f.astype(jnp.bfloat16), w6_ref[...],
                        preferred_element_type=jnp.float32) + b6i)

    return kernel


def _pack_biases(b1, b2, b3, b4, b5, b6_plus_iden):
    """Pack biases (+ identity folded into fc3 bias) at 128-aligned column offsets."""
    def pad_cols(a, width):
        return jnp.pad(a, ((0, 0), (0, width - a.shape[1])))
    return jnp.concatenate(
        [pad_cols(b1, 128), pad_cols(b2, 128), b3, b4, b5, b6_plus_iden], axis=1)


def _vmem_capacity_bytes():
    try:
        return int(pltpu.get_tpu_info().vmem_capacity_bytes)
    except Exception:
        return 64 * 1024 * 1024   # conservative fallback (v7x per-TensorCore VMEM)


def _choose_tiles(B, N, vmem_cap_bytes):
    """Pick (Bt, B_pad, Nt, N_pad) with a generation-aware rows-per-step cap."""
    if B == 1:
        Bt = 1
    else:
        Bt = next(bt for bt in (8, 4, 2) if (B % bt == 0) or bt == 2)
    B_pad = _round_up(B, Bt)                 # odd B padded by one row (masked out later)

    rows_cap = 4096 if vmem_cap_bytes >= 96 * 1024 * 1024 else 2048
    nt_cap = max(128, rows_cap // Bt)
    if N <= nt_cap:
        Nt = _round_up(N, 8)
        N_pad = Nt
    else:
        Nt = max(128, (nt_cap // 128) * 128)
        N_pad = _round_up(N, Nt)
    return Bt, B_pad, Nt, N_pad


def _vmem_limit_bytes(Bt, Nt, k, kk, vmem_cap_bytes):
    """Derive the scoped-VMEM limit from the actual working set (+ margin)."""
    M = Bt * Nt
    w_elems = (k * 64 + 64 * 128 + 128 * 1024 + 1024 * 512 + 512 * 256 + 256 * kk)
    bias_cols = 2048 + _round_up(kk, 128)
    est = (
        2 * Bt * max(k, 16) * max(Nt, 128) * 2      # x tile (bf16, double-buffered)
        + 2 * w_elems * 2                           # bf16 weights (double-buffered)
        + 2 * 8 * bias_cols * 4                     # f32 bias pack (double-buffered)
        + M * (64 + 128 + 1024) * (4 + 2)           # f32 activations + bf16 matmul feeds
        + Bt * 1024 * 4                             # running-max accumulator
        + 2 * 8 * max(kk, 128) * 4                  # output tile
        + (1 << 20)                                 # slack (relayout / FC temporaries)
    )
    return int(min(max(2 * est, 24 << 20), max(24 << 20, vmem_cap_bytes - (16 << 20))))


def stnkd_forward(x_bkn, params, k):
    """x_bkn: (B, k, N) float32, PyTorch Conv1d layout. Returns (B, k, k)."""
    w1, b1, w2, b2, w3, b3, w4, b4, w5, b5, w6, b6, iden = params
    B, k_in, N = x_bkn.shape
    assert k_in == k
    kk = k * k

    vmem_cap = _vmem_capacity_bytes()
    Bt, B_pad, Nt, N_pad = _choose_tiles(B, N, vmem_cap)

    if B_pad != B or N_pad != N:
        x_bkn = jnp.pad(x_bkn, ((0, B_pad - B), (0, 0), (0, N_pad - N)))
    x_in = x_bkn.astype(jnp.bfloat16)                       # bf16 MXU feed, halves DMA

    w1b, w2b, w3b, w4b, w5b, w6b = (
        w.astype(jnp.bfloat16) for w in (w1, w2, w3, w4, w5, w6))
    bias_pack = _pack_biases(b1, b2, b3, b4, b5, b6 + iden)  # f32, lane-aligned offsets

    kernel = _make_stn_kernel(Bt, Nt, k, N, N_pad)

    def const2d(shape):
        return pl.BlockSpec(shape, lambda b, n: (0, 0))

    out = pl.pallas_call(
        kernel,
        out_shape=jax.ShapeDtypeStruct((B_pad, kk), jnp.float32),
        grid_spec=pltpu.PrefetchScalarGridSpec(
            num_scalar_prefetch=0,
            grid=(B_pad // Bt, N_pad // Nt),
            in_specs=[pl.BlockSpec((Bt, k, Nt), lambda b, n: (b, 0, n))]
                     + [const2d(w.shape) for w in (w1b, w2b, w3b, w4b, w5b, w6b)]
                     + [const2d(bias_pack.shape)],
            out_specs=pl.BlockSpec((Bt, kk), lambda b, n: (b, 0)),
            scratch_shapes=[pltpu.VMEM((Bt, 1024), jnp.float32)],
        ),
        compiler_params=pltpu.CompilerParams(
            dimension_semantics=("parallel", "arbitrary"),
            vmem_limit_bytes=_vmem_limit_bytes(Bt, Nt, k, kk, vmem_cap),
        ),
    )(x_in, w1b, w2b, w3b, w4b, w5b, w6b, bias_pack)
    return out[:B].reshape(B, k, k)


def init_params(key, k):
    """Deterministic synthetic parameters; BN (eval-mode) folded into weights."""
    eps = 1e-5
    keys = jax.random.split(key, 22)
    ki = iter(range(22))

    def linear(fan_in, fan_out):
        bound = 1.0 / np.sqrt(fan_in)
        W = jax.random.uniform(keys[next(ki)], (fan_in, fan_out), jnp.float32, -bound, bound)
        b = jax.random.uniform(keys[next(ki)], (1, fan_out), jnp.float32, -bound, bound)
        return W, b

    def bn_fold(W, b, c):
        gamma = jax.random.uniform(keys[next(ki)], (1, c), jnp.float32, 0.5, 1.5)
        beta = jax.random.uniform(keys[next(ki)], (1, c), jnp.float32, -0.5, 0.5)
        running_mean = jnp.zeros((1, c), jnp.float32)
        running_var = jnp.ones((1, c), jnp.float32)
        scale = gamma / jnp.sqrt(running_var + eps)
        shift = beta - running_mean * scale
        return W * scale, b * scale + shift

    w1, b1 = linear(k, 64);      w1, b1 = bn_fold(w1, b1, 64)      # conv1 + bn1
    w2, b2 = linear(64, 128);    w2, b2 = bn_fold(w2, b2, 128)     # conv2 + bn2
    w3, b3 = linear(128, 1024);  w3, b3 = bn_fold(w3, b3, 1024)    # conv3 + bn3
    w4, b4 = linear(1024, 512);  w4, b4 = bn_fold(w4, b4, 512)     # fc1 + bn4
    w5, b5 = linear(512, 256);   w5, b5 = bn_fold(w5, b5, 256)     # fc2 + bn5
    w6, b6 = linear(256, k * k)                                    # fc3 (no bn)

    iden = jnp.eye(k, dtype=jnp.float32).reshape(1, k * k)
    return (w1, b1, w2, b2, w3, b3, w4, b4, w5, b5, w6, b6, iden)


def ref_forward(x_bkn, params, k):
    """Pure-JAX reference matching the PyTorch forward (folded BN), mirroring the
    kernel's numerics: bf16 matmul feeds, f32 accumulation / bias / ReLU / max."""
    w1, b1, w2, b2, w3, b3, w4, b4, w5, b5, w6, b6, iden = params
    bf = jnp.bfloat16

    def mm(a, w):
        return jnp.dot(a.astype(bf), w.astype(bf), preferred_element_type=jnp.float32)

    x = jnp.transpose(x_bkn, (0, 2, 1))        # (B, N, k)
    h = jax.nn.relu(mm(x, w1) + b1)
    h = jax.nn.relu(mm(h, w2) + b2)
    h = jax.nn.relu(mm(h, w3) + b3)
    feat = jnp.max(h, axis=1)                  # (B, 1024)
    f = jax.nn.relu(mm(feat, w4) + b4)
    f = jax.nn.relu(mm(f, w5) + b5)
    f = mm(f, w6) + b6 + iden
    return f.reshape(-1, k, k)


if __name__ == "__main__":
    B, K, N = 16, 16, 32   # batch, k (STNkd transform size), number of points
    key = jax.random.PRNGKey(0)
    k_x, k_p = jax.random.split(key)

    x = jax.random.normal(k_x, (B, K, N), dtype=jnp.float32)   # PyTorch (B, k, N) layout
    params = init_params(k_p, K)

    out = jax.block_until_ready(stnkd_forward(x, params, K))
    ref = ref_forward(x, params, K)

    assert out.shape == (B, K, K), out.shape
    np.testing.assert_allclose(np.asarray(out), np.asarray(ref), rtol=5e-3, atol=5e-3)

    print("KERNEL_OK")
</pallas_src>

<mosaic_0001>
module attributes {stable_mosaic.version = 11 : i64} {
  func.func @kernel(%arg0: i32, %arg1: i32, %arg2: memref<8x16x32xbf16, #tpu.memory_space<vmem>>, %arg3: memref<16x64xbf16, #tpu.memory_space<vmem>>, %arg4: memref<64x128xbf16, #tpu.memory_space<vmem>>, %arg5: memref<128x1024xbf16, #tpu.memory_space<vmem>>, %arg6: memref<1024x512xbf16, #tpu.memory_space<vmem>>, %arg7: memref<512x256xbf16, #tpu.memory_space<vmem>>, %arg8: memref<256x256xbf16, #tpu.memory_space<vmem>>, %arg9: memref<1x2304xf32, #tpu.memory_space<vmem>>, %arg10: memref<8x256xf32, #tpu.memory_space<vmem>>, %arg11: memref<8x1024xf32, #tpu.memory_space<vmem>>) attributes {dimension_semantics = [#tpu.dimension_semantics<parallel>, #tpu.dimension_semantics<arbitrary>], iteration_bounds = array<i64: 2, 1>, scalar_prefetch = 0 : i64, scratch_operands = 1 : i64, tpu.core_type = #tpu.core_type<tc>, window_params = [{transform_indices = @transform_0, window_bounds = array<i64: 8, 16, 32>}, {pipeline_mode = #tpu.pipeline_mode<synchronous>, transform_indices = @transform_1, window_bounds = array<i64: 16, 64>}, {pipeline_mode = #tpu.pipeline_mode<synchronous>, transform_indices = @transform_2, window_bounds = array<i64: 64, 128>}, {pipeline_mode = #tpu.pipeline_mode<synchronous>, transform_indices = @transform_3, window_bounds = array<i64: 128, 1024>}, {pipeline_mode = #tpu.pipeline_mode<synchronous>, transform_indices = @transform_4, window_bounds = array<i64: 1024, 512>}, {pipeline_mode = #tpu.pipeline_mode<synchronous>, transform_indices = @transform_5, window_bounds = array<i64: 512, 256>}, {pipeline_mode = #tpu.pipeline_mode<synchronous>, transform_indices = @transform_6, window_bounds = array<i64: 256, 256>}, {pipeline_mode = #tpu.pipeline_mode<synchronous>, transform_indices = @transform_7, window_bounds = array<i64: 1, 2304>}, {transform_indices = @transform_8, window_bounds = array<i64: 8, 256>}]} {
    %c0_i32 = arith.constant 0 : i32
    %0 = arith.cmpi eq, %arg1, %c0_i32 : i32
    %1 = arith.extui %0 : i1 to i32
    %c0_i32_0 = arith.constant 0 : i32
    %2 = arith.cmpi ne, %1, %c0_i32_0 : i32
    scf.if %2 {
      %cst_25 = arith.constant 0xFF800000 : f32
      %37 = vector.broadcast %cst_25 : f32 to vector<8x1024xf32>
      %c0_26 = arith.constant 0 : index
      %c0_27 = arith.constant 0 : index
      %38 = vector.load %arg11[%c0_26, %c0_27] : memref<8x1024xf32, #tpu.memory_space<vmem>>, vector<8x1024xf32>
      tpu.vector_store %arg11[%c0_26, %c0_27], %37 {strides = array<i32>} : memref<8x1024xf32, #tpu.memory_space<vmem>>, vector<8x1024xf32>,
    } else {
    }
    %c0 = arith.constant 0 : index
    %c0_1 = arith.constant 0 : index
    %c0_2 = arith.constant 0 : index
    %3 = vector.load %arg2[%c0, %c0_1, %c0_2] : memref<8x16x32xbf16, #tpu.memory_space<vmem>>, vector<8x16x32xbf16>
    %4 = tpu.transpose %3, [0, 2, 1] : vector<8x16x32xbf16> -> vector<8x32x16xbf16>
    %5 = vector.shape_cast %4 : vector<8x32x16xbf16> to vector<256x16xbf16>
    %c0_3 = arith.constant 0 : index
    %c0_4 = arith.constant 0 : index
    %6 = vector.load %arg9[%c0_3, %c0_4] : memref<1x2304xf32, #tpu.memory_space<vmem>>, vector<1x64xf32>
    %c0_5 = arith.constant 0 : index
    %c128 = arith.constant 128 : index
    %7 = vector.load %arg9[%c0_5, %c128] : memref<1x2304xf32, #tpu.memory_space<vmem>>, vector<1x128xf32>
    %c0_6 = arith.constant 0 : index
    %c256 = arith.constant 256 : index
    %8 = vector.load %arg9[%c0_6, %c256] : memref<1x2304xf32, #tpu.memory_space<vmem>>, vector<1x1024xf32>
    %c0_7 = arith.constant 0 : index
    %c0_8 = arith.constant 0 : index
    %9 = vector.load %arg3[%c0_7, %c0_8] : memref<16x64xbf16, #tpu.memory_space<vmem>>, vector<16x64xbf16>
    %cst = arith.constant dense<0.000000e+00> : vector<256x64xf32>
    %10 = tpu.matmul %5, %9, %cst {dimension_numbers = #tpu.dot_dimension_numbers<[1], [0], [0], [1], [0, 0, 1, 1], [], []>} : vector<256x16xbf16>, vector<16x64xbf16>, vector<256x64xf32> -> vector<256x64xf32>
    %11 = vector.broadcast %6 : vector<1x64xf32> to vector<256x64xf32>
    %12 = arith.addf %10, %11 : vector<256x64xf32>
    %cst_9 = arith.constant 0.000000e+00 : f32
    %13 = vector.broadcast %cst_9 : f32 to vector<256x64xf32>
    %14 = arith.maximumf %12, %13 : vector<256x64xf32>
    %15 = arith.truncf %14 : vector<256x64xf32> to vector<256x64xbf16>
    %c0_10 = arith.constant 0 : index
    %c0_11 = arith.constant 0 : index
    %16 = vector.load %arg4[%c0_10, %c0_11] : memref<64x128xbf16, #tpu.memory_space<vmem>>, vector<64x128xbf16>
    %cst_12 = arith.constant dense<0.000000e+00> : vector<256x128xf32>
    %17 = tpu.matmul %15, %16, %cst_12 {dimension_numbers = #tpu.dot_dimension_numbers<[1], [0], [0], [1], [0, 0, 1, 1], [], []>} : vector<256x64xbf16>, vector<64x128xbf16>, vector<256x128xf32> -> vector<256x128xf32>
    %18 = vector.broadcast %7 : vector<1x128xf32> to vector<256x128xf32>
    %19 = arith.addf %17, %18 : vector<256x128xf32>
    %cst_13 = arith.constant 0.000000e+00 : f32
    %20 = vector.broadcast %cst_13 : f32 to vector<256x128xf32>
    %21 = arith.maximumf %19, %20 : vector<256x128xf32>
    %22 = arith.truncf %21 : vector<256x128xf32> to vector<256x128xbf16>
    %c0_14 = arith.constant 0 : index
    %c0_15 = arith.constant 0 : index
    %23 = vector.load %arg5[%c0_14, %c0_15] : memref<128x1024xbf16, #tpu.memory_space<vmem>>, vector<128x1024xbf16>
    %cst_16 = arith.constant dense<0.000000e+00> : vector<256x1024xf32>
    %24 = tpu.matmul %22, %23, %cst_16 {dimension_numbers = #tpu.dot_dimension_numbers<[1], [0], [0], [1], [0, 0, 1, 1], [], []>} : vector<256x128xbf16>, vector<128x1024xbf16>, vector<256x1024xf32> -> vector<256x1024xf32>
    %25 = vector.broadcast %8 : vector<1x1024xf32> to vector<256x1024xf32>
    %26 = arith.addf %24, %25 : vector<256x1024xf32>
    %cst_17 = arith.constant 0.000000e+00 : f32
    %27 = vector.broadcast %cst_17 : f32 to vector<256x1024xf32>
    %28 = arith.maximumf %26, %27 : vector<256x1024xf32>
    %29 = vector.shape_cast %28 : vector<256x1024xf32> to vector<8x32x1024xf32>
    %c0_18 = arith.constant 0 : index
    %c0_19 = arith.constant 0 : index
    %30 = vector.load %arg11[%c0_18, %c0_19] : memref<8x1024xf32, #tpu.memory_space<vmem>>, vector<8x1024xf32>
    %cst_20 = arith.constant dense<0xFF800000> : vector<8x1024xf32>
    %31 = vector.multi_reduction <maximumf>, %29, %cst_20 [1] : vector<8x32x1024xf32> to vector<8x1024xf32>
    %32 = arith.maximumf %30, %31 : vector<8x1024xf32>
    %c0_21 = arith.constant 0 : index
    %c0_22 = arith.constant 0 : index
    %33 = vector.load %arg11[%c0_21, %c0_22] : memref<8x1024xf32, #tpu.memory_space<vmem>>, vector<8x1024xf32>
    tpu.vector_store %arg11[%c0_21, %c0_22], %32 {strides = array<i32>} : memref<8x1024xf32, #tpu.memory_space<vmem>>, vector<8x1024xf32>,
    %c0_i32_23 = arith.constant 0 : i32
    %34 = arith.cmpi eq, %arg1, %c0_i32_23 : i32
    %35 = arith.extui %34 : i1 to i32
    %c0_i32_24 = arith.constant 0 : i32
    %36 = arith.cmpi ne, %35, %c0_i32_24 : i32
    scf.if %36 {
      %c0_25 = arith.constant 0 : index
      %c1280 = arith.constant 1280 : index
      %37 = vector.load %arg9[%c0_25, %c1280] : memref<1x2304xf32, #tpu.memory_space<vmem>>, vector<1x512xf32>
      %c0_26 = arith.constant 0 : index
      %c1792 = arith.constant 1792 : index
      %38 = vector.load %arg9[%c0_26, %c1792] : memref<1x2304xf32, #tpu.memory_space<vmem>>, vector<1x256xf32>
      %c0_27 = arith.constant 0 : index
      %c2048 = arith.constant 2048 : index
      %39 = vector.load %arg9[%c0_27, %c2048] : memref<1x2304xf32, #tpu.memory_space<vmem>>, vector<1x256xf32>
      %c0_28 = arith.constant 0 : index
      %c0_29 = arith.constant 0 : index
      %40 = vector.load %arg11[%c0_28, %c0_29] : memref<8x1024xf32, #tpu.memory_space<vmem>>, vector<8x1024xf32>
      %41 = arith.truncf %40 : vector<8x1024xf32> to vector<8x1024xbf16>
      %c0_30 = arith.constant 0 : index
      %c0_31 = arith.constant 0 : index
      %42 = vector.load %arg6[%c0_30, %c0_31] : memref<1024x512xbf16, #tpu.memory_space<vmem>>, vector<1024x512xbf16>
      %cst_32 = arith.constant dense<0.000000e+00> : vector<8x512xf32>
      %43 = tpu.matmul %41, %42, %cst_32 {dimension_numbers = #tpu.dot_dimension_numbers<[1], [0], [0], [1], [0, 0, 1, 1], [], []>} : vector<8x1024xbf16>, vector<1024x512xbf16>, vector<8x512xf32> -> vector<8x512xf32>
      %44 = vector.broadcast %37 : vector<1x512xf32> to vector<8x512xf32>
      %45 = arith.addf %43, %44 : vector<8x512xf32>
      %cst_33 = arith.constant 0.000000e+00 : f32
      %46 = vector.broadcast %cst_33 : f32 to vector<8x512xf32>
      %47 = arith.maximumf %45, %46 : vector<8x512xf32>
      %48 = arith.truncf %47 : vector<8x512xf32> to vector<8x512xbf16>
      %c0_34 = arith.constant 0 : index
      %c0_35 = arith.constant 0 : index
      %49 = vector.load %arg7[%c0_34, %c0_35] : memref<512x256xbf16, #tpu.memory_space<vmem>>, vector<512x256xbf16>
      %cst_36 = arith.constant dense<0.000000e+00> : vector<8x256xf32>
      %50 = tpu.matmul %48, %49, %cst_36 {dimension_numbers = #tpu.dot_dimension_numbers<[1], [0], [0], [1], [0, 0, 1, 1], [], []>} : vector<8x512xbf16>, vector<512x256xbf16>, vector<8x256xf32> -> vector<8x256xf32>
      %51 = vector.broadcast %38 : vector<1x256xf32> to vector<8x256xf32>
      %52 = arith.addf %50, %51 : vector<8x256xf32>
      %cst_37 = arith.constant 0.000000e+00 : f32
      %53 = vector.broadcast %cst_37 : f32 to vector<8x256xf32>
      %54 = arith.maximumf %52, %53 : vector<8x256xf32>
      %55 = arith.truncf %54 : vector<8x256xf32> to vector<8x256xbf16>
      %c0_38 = arith.constant 0 : index
      %c0_39 = arith.constant 0 : index
      %56 = vector.load %arg8[%c0_38, %c0_39] : memref<256x256xbf16, #tpu.memory_space<vmem>>, vector<256x256xbf16>
      %cst_40 = arith.constant dense<0.000000e+00> : vector<8x256xf32>
      %57 = tpu.matmul %55, %56, %cst_40 {dimension_numbers = #tpu.dot_dimension_numbers<[1], [0], [0], [1], [0, 0, 1, 1], [], []>} : vector<8x256xbf16>, vector<256x256xbf16>, vector<8x256xf32> -> vector<8x256xf32>
      %58 = vector.broadcast %39 : vector<1x256xf32> to vector<8x256xf32>
      %59 = arith.addf %57, %58 : vector<8x256xf32>
      %c0_41 = arith.constant 0 : index
      %c0_42 = arith.constant 0 : index
      %60 = vector.load %arg10[%c0_41, %c0_42] : memref<8x256xf32, #tpu.memory_space<vmem>>, vector<8x256xf32>
      tpu.vector_store %arg10[%c0_41, %c0_42], %59 {strides = array<i32>} : memref<8x256xf32, #tpu.memory_space<vmem>>, vector<8x256xf32>,
    } else {
    }
    return
  }
  func.func @transform_0(%arg0: i32, %arg1: i32) -> (i32, i32, i32) {
    %c0_i32 = arith.constant 0 : i32
    %c0_i32_0 = arith.constant 0 : i32
    return %arg0, %c0_i32, %arg1 : i32, i32, i32
  }
  func.func @transform_1(%arg0: i32, %arg1: i32) -> (i32, i32) {
    %c0_i32 = arith.constant 0 : i32
    %c0_i32_0 = arith.constant 0 : i32
    %c0_i32_1 = arith.constant 0 : i32
    return %c0_i32, %c0_i32_0 : i32, i32
  }
  func.func @transform_2(%arg0: i32, %arg1: i32) -> (i32, i32) {
    %c0_i32 = arith.constant 0 : i32
    %c0_i32_0 = arith.constant 0 : i32
    %c0_i32_1 = arith.constant 0 : i32
    return %c0_i32, %c0_i32_0 : i32, i32
  }
  func.func @transform_3(%arg0: i32, %arg1: i32) -> (i32, i32) {
    %c0_i32 = arith.constant 0 : i32
    %c0_i32_0 = arith.constant 0 : i32
    %c0_i32_1 = arith.constant 0 : i32
    return %c0_i32, %c0_i32_0 : i32, i32
  }
  func.func @transform_4(%arg0: i32, %arg1: i32) -> (i32, i32) {
    %c0_i32 = arith.constant 0 : i32
    %c0_i32_0 = arith.constant 0 : i32
    %c0_i32_1 = arith.constant 0 : i32
    return %c0_i32, %c0_i32_0 : i32, i32
  }
  func.func @transform_5(%arg0: i32, %arg1: i32) -> (i32, i32) {
    %c0_i32 = arith.constant 0 : i32
    %c0_i32_0 = arith.constant 0 : i32
    %c0_i32_1 = arith.constant 0 : i32
    return %c0_i32, %c0_i32_0 : i32, i32
  }
  func.func @transform_6(%arg0: i32, %arg1: i32) -> (i32, i32) {
    %c0_i32 = arith.constant 0 : i32
    %c0_i32_0 = arith.constant 0 : i32
    %c0_i32_1 = arith.constant 0 : i32
    return %c0_i32, %c0_i32_0 : i32, i32
  }
  func.func @transform_7(%arg0: i32, %arg1: i32) -> (i32, i32) {
    %c0_i32 = arith.constant 0 : i32
    %c0_i32_0 = arith.constant 0 : i32
    %c0_i32_1 = arith.constant 0 : i32
    return %c0_i32, %c0_i32_0 : i32, i32
  }
  func.func @transform_8(%arg0: i32, %arg1: i32) -> (i32, i32) {
    %c0_i32 = arith.constant 0 : i32
    %c0_i32_0 = arith.constant 0 : i32
    return %arg0, %c0_i32 : i32, i32
  }
}

</mosaic_0001>

<bundles_post_ra>
// kernel: tpu_custom_call.1
= control target key start
LH: loop header
LB: loop body
LE: loop exit
PB: predicated region body
PF: predicated region fallthrough
CT: control target
= control target key end

     0   :  { %s9448_s0 = inlined_call_operand.hbm [shape: bf16[16,16,32], index: 0, kind: input, shape index: {}]   ;;  %s9449_s1 = inlined_call_operand.hbm [shape: bf16[16,64], index: 1, kind: input, shape index: {}]   ;;  %s9450_s2 = inlined_call_operand.hbm [shape: bf16[64,128], index: 2, kind: input, shape index: {}]   ;;  %s9451_s3 = inlined_call_operand.hbm [shape: bf16[128,1024], index: 3, kind: input, shape index: {}]   ;;  %s9452_s4 = inlined_call_operand.hbm [shape: bf16[1024,512], index: 4, kind: input, shape index: {}]   ;;  %s9453_s5 = inlined_call_operand.hbm [shape: bf16[512,256], index: 5, kind: input, shape index: {}]   ;;  %s9454_s6 = inlined_call_operand.hbm [shape: bf16[256,256], index: 6, kind: input, shape index: {}]   ;;  %s9455_s7 = inlined_call_operand.vmem [shape: f32[1,2304], index: 7, kind: input, shape index: {}]   ;;  %s9456_s8 = inlined_call_operand.hbm [shape: f32[16,256], index: 8, kind: output, shape index: {}]  }
   0x1   :  { %9477 = sst [smem:[#allocation36_spill]] %s9449_s1 }
   0x2   :  { %9478 = sst [smem:[#allocation37_spill]] %s9451_s3 }
   0x3   :  { %9479 = sst [smem:[#allocation38_spill]] %s9456_s8 }
   0x4   :  { %13 = vsyncpa [#allocation4], 0 }
   0x5   :  { %15 = vsyncpa [#allocation4 + $0x1], 0 }
   0x6   :  { %16 = vsyncpa [#allocation7], 0 }
   0x7   :  { %17 = vsyncpa [#allocation10], 0 }
   0x8   :  { %18 = vsyncpa [#allocation13], 0 }
   0x9   :  { %19 = vsyncpa [#allocation5], 0 }
   0xa   :  { %21 = vsyncpa [#allocation5 + $0x1], 0  ;;  %s7857_s27 = smov 0   ;;  %s7859_s28 = smov 0  }
   0xb   :  { %s7861_s29 = smov 0   ;;  %s7863_s30 = smov 0  }
   0xc   :  { %s7865_s9 = smov 0   ;;  %s7867_s10 = smov 0  }
   0xd LB: > { %9480 = sst [smem:[#allocation21_spill]] %s7785_s30  ;;  %s9457_s11 = sadd.s32 4294967295, %s7793_s10   ;;  %s7793_s10 = sphi %s7867_s10, %s27_s10   ;;  %s7789_s9 = sphi %s7865_s9, %s9553_s9   ;;  %s7785_s30 = sphi %s7863_s30, %s9552_s30   ;;  %s7781_s29 = sphi %s7861_s29, %s9551_s29   ;;  %s7777_s28 = sphi %s7859_s28, %s9550_s28   ;;  %s7773_s27 = sphi %s7857_s27, %s9549_s27  }
   0xe   : > { %p6188_p0 = scmp.ge.s32.totalorder %s7793_s10, 1  ;;  %p7891_p1 = scmp.eq.s32.totalorder %s9457_s11, 0 }
   0xf   : > { %p245_p2 = scmp.lt.s32.totalorder %s7793_s10, 3  ;;  %s7795_s14 = smov [#allocation6]  }
  0x10   : > { %s9481_s12 = scalar_select %p7891_p1, 1, 0 }
  0x11   : > { %p7896_p3 = pnand %p6188_p0, %p245_p2  ;;  %s257_s15 = sshll.u32 %s7795_s14, 4  ;;  %s7900_s15 = int_to_ptr.vmem [resolvable:$true] %s257_s15 }
  0x12   : > { %s7796_s17 = smov [#allocation9]   ;;  %s9484_s1 = sld [smem:[#allocation36_spill]] }
  0x13   : > { %s9482_s13 = scalar_select %p7896_p3, 1, 0 }
  0x14   : > { %p6855_p4 = pneg %p7896_p3  ;;  %s283_s18 = sshll.u32 %s7796_s17, 4  ;;  %s7911_s18 = int_to_ptr.vmem [resolvable:$true] %s283_s18 }
  0x16   : > { %p7907_p6 = pnand %p6855_p4, %p7891_p1 }
  0x18   : > { %s7501_s21 = scalar_lea.hbm %s9484_s1, 128  ;;  %p7921_p8 = pneg %p7907_p6 }
  0x19   : > { %p7502_p7 = scmp.ne.s32.totalorder %s9484_s1, %s7501_s21  ;;  %p7508_p11 = scmp.lt.u32.totalorder %s7501_s21, %s9484_s1 }
  0x1b   : > { %p7504_p9 = pnand %p7921_p8, %p7502_p7 }
  0x1d   : > { %p7505_p10 = pneg %p7504_p9 }
  0x1f   : > { %p7510_p12 = pnand %p7508_p11, %p7505_p10 }
  0x21   : > { %7513 = shalt.err (!%p7510_p12)
}
  0x22   : > { %s7514_s14 = scalar_lea.vmem %s7900_s15, 128  ;;  %p7522_p4 = scmp.lt.s32.totalorder %s7900_s15, %s7900_s15 }
  0x23   : > { %p7515_p13 = scmp.ne.s32.totalorder %s7900_s15, %s7514_s14  ;;  %p7523_p5 = scmp.lt.s32.totalorder %s7514_s14, %s7514_s14 }
  0x25   : > { %p7517_p0 = pnand %p7515_p13, %p7921_p8  ;;  %p7524_p7 = por %p7523_p5, %p7522_p4 }
  0x27   : > { %p7518_p2 = pneg %p7517_p0 }
  0x29   : > { %p7525_p9 = pnand %p7524_p7, %p7518_p2 }
  0x2b   : > { %7528 = shalt.err (!%p7525_p9)
}
  0x2c   : > { %s9459_s17 = smov 64   ;;  %s9461_s19 = smov 4  }
  0x2d   : > { %6858 = dma.hbm_to_vmem [thread:$0]  (!%p7907_p6), %s9484_s1, 128, %s7900_s15, [#allocation7], %s9459_s17, %s9459_s17, %s9461_s19  }
  0x2e   : > { %s9486_s3 = sld [smem:[#allocation37_spill]] }
  0x34   : > { %s7529_s25 = scalar_lea.hbm %s9486_s3, 8192 }
  0x35   : > { %p7530_p5 = scmp.ne.s32.totalorder %s9486_s3, %s7529_s25  ;;  %p7536_p12 = scmp.lt.u32.totalorder %s7529_s25, %s9486_s3 }
  0x37   : > { %p7532_p10 = pnand %p7530_p5, %p7921_p8 }
  0x39   : > { %p7533_p11 = pneg %p7532_p10 }
  0x3b   : > { %p7538_p13 = pnand %p7536_p12, %p7533_p11 }
  0x3d   : > { %7541 = shalt.err (!%p7538_p13)
}
  0x3e   : > { %s7542_s15 = scalar_lea.vmem %s7911_s18, 8192  ;;  %p7550_p7 = scmp.lt.s32.totalorder %s7911_s18, %s7911_s18 }
  0x3f   : > { %p7543_p0 = scmp.ne.s32.totalorder %s7911_s18, %s7542_s15  ;;  %p7551_p9 = scmp.lt.s32.totalorder %s7542_s15, %s7542_s15 }
  0x41   : > { %p7545_p2 = pnand %p7543_p0, %p7921_p8  ;;  %p7552_p5 = por %p7551_p9, %p7550_p7 }
  0x43   : > { %p7546_p4 = pneg %p7545_p2 }
  0x45   : > { %p7553_p10 = pnand %p7552_p5, %p7546_p4 }
  0x47   : > { %7556 = shalt.err (!%p7553_p10)
}
  0x48   : > { %s7799_s20 = smov 512   ;;  %s7800_s8 = smov 32  }
  0x49   : > { %6864 = dma.hbm_to_vmem [thread:$0]  (!%p7907_p6), %s9486_s3, 8192, %s7911_s18, [#allocation10], %s7799_s20, %s7799_s20, %s7800_s8  }
  0x4a   : > { %s7801_s22 = smov [#allocation12]   ;;  %s7557_s14 = scalar_lea.hbm %s9453_s5, 8192 }
  0x4b   : > { %s309_s23 = sshll.u32 %s7801_s22, 4  ;;  %p7558_p11 = scmp.ne.s32.totalorder %s9453_s5, %s7557_s14  ;;  %s310_s23 = int_to_ptr.vmem [resolvable:$true] %s309_s23 }
  0x4c   : > { %p7564_p0 = scmp.lt.u32.totalorder %s7557_s14, %s9453_s5 }
  0x4d   : > { %p7560_p12 = pnand %p7558_p11, %p7921_p8 }
  0x4f   : > { %p7561_p13 = pneg %p7560_p12 }
  0x51   : > { %p7566_p2 = pnand %p7564_p0, %p7561_p13 }
  0x53   : > { %7569 = shalt.err (!%p7566_p2)
}
  0x54   : > { %s7570_s18 = scalar_lea.vmem %s310_s23, 8192  ;;  %p7578_p5 = scmp.lt.s32.totalorder %s310_s23, %s310_s23 }
  0x55   : > { %p7571_p4 = scmp.ne.s32.totalorder %s310_s23, %s7570_s18  ;;  %p7579_p10 = scmp.lt.s32.totalorder %s7570_s18, %s7570_s18 }
  0x57   : > { %p7573_p7 = pnand %p7571_p4, %p7921_p8  ;;  %p7580_p3 = por %p7579_p10, %p7578_p5 }
  0x59   : > { %p7574_p9 = pneg %p7573_p7 }
  0x5b   : > { %p7581_p1 = pnand %p7580_p3, %p7574_p9 }
  0x5d   : > { %7584 = shalt.err (!%p7581_p1)
}
  0x5e   : > { %s9466_s17 = smov 128   ;;  %s9467_s20 = smov 8  }
  0x5f   : > { %6870 = dma.hbm_to_vmem [thread:$0]  (!%p7907_p6), %s9453_s5, 8192, %s310_s23, [#allocation13], %s9466_s17, %s9466_s17, %s9467_s20  }
  0x60   : > { %s7804_s8 = smov [#allocation8]   ;;  %s7805_s21 = smov [#allocation11]  }
  0x61   : > { %s270_s11 = sshll.u32 %s7804_s8, 4  ;;  %s296_s22 = sshll.u32 %s7805_s21, 4  ;;  %s271_s11 = int_to_ptr.vmem [resolvable:$true] %s270_s11  ;;  %s297_s22 = int_to_ptr.vmem [resolvable:$true] %s296_s22 }
  0x62   : > { %s7585_s14 = scalar_lea.hbm %s9450_s2, 512 }
  0x63   : > { %p7586_p1 = scmp.ne.s32.totalorder %s9450_s2, %s7585_s14  ;;  %p7592_p12 = scmp.lt.u32.totalorder %s7585_s14, %s9450_s2 }
  0x65   : > { %p7588_p3 = pnand %p7586_p1, %p7921_p8 }
  0x67   : > { %p7589_p11 = pneg %p7588_p3 }
  0x69   : > { %p7594_p13 = pnand %p7592_p12, %p7589_p11 }
  0x6b   : > { %7597 = shalt.err (!%p7594_p13)
}
  0x6c   : > { %s7598_s23 = scalar_lea.vmem %s271_s11, 512  ;;  %p7606_p7 = scmp.lt.s32.totalorder %s271_s11, %s271_s11 }
  0x6d   : > { %p7599_p0 = scmp.ne.s32.totalorder %s271_s11, %s7598_s23  ;;  %p7607_p9 = scmp.lt.s32.totalorder %s7598_s23, %s7598_s23 }
  0x6f   : > { %p7601_p2 = pnand %p7599_p0, %p7921_p8  ;;  %p7608_p5 = por %p7607_p9, %p7606_p7 }
  0x71   : > { %p7602_p4 = pneg %p7601_p2 }
  0x73   : > { %p7609_p10 = pnand %p7608_p5, %p7602_p4 }
  0x75   : > { %7612 = shalt.err (!%p7609_p10)
}
  0x76   : > { %s9487_s1 = smov 4   ;;  %s9488_s19 = smov 64  }
  0x77   : > { %6861 = dma.hbm_to_vmem [thread:$0]  (!%p7907_p6), %s9450_s2, 512, %s271_s11, [#allocation7], %s9488_s19, %s9488_s19, %s9487_s1  }
  0x78   : > { %s7613_s25 = scalar_lea.hbm %s9452_s4, 32768 }
  0x79   : > { %p7614_p1 = scmp.ne.s32.totalorder %s9452_s4, %s7613_s25  ;;  %p7620_p12 = scmp.lt.u32.totalorder %s7613_s25, %s9452_s4 }
  0x7b   : > { %p7616_p3 = pnand %p7614_p1, %p7921_p8 }
  0x7d   : > { %p7617_p11 = pneg %p7616_p3 }
  0x7f   : > { %p7622_p13 = pnand %p7620_p12, %p7617_p11 }
  0x81   : > { %7625 = shalt.err (!%p7622_p13)
}
  0x82   : > { %s7626_s23 = scalar_lea.vmem %s297_s22, 32768  ;;  %p7634_p7 = scmp.lt.s32.totalorder %s297_s22, %s297_s22 }
  0x83   : > { %p7627_p0 = scmp.ne.s32.totalorder %s297_s22, %s7626_s23  ;;  %p7635_p9 = scmp.lt.s32.totalorder %s7626_s23, %s7626_s23 }
  0x85   : > { %p7629_p2 = pnand %p7627_p0, %p7921_p8  ;;  %p7636_p5 = por %p7635_p9, %p7634_p7 }
  0x87   : > { %p7630_p4 = pneg %p7629_p2 }
  0x89   : > { %p7637_p10 = pnand %p7636_p5, %p7630_p4 }
  0x8b   : > { %7640 = shalt.err (!%p7637_p10)
}
  0x8c   : > { %s7806_s11 = smov 256   ;;  %s7807_s3 = smov 16  }
  0x8d   : > { %6867 = dma.hbm_to_vmem [thread:$0]  (!%p7907_p6), %s9452_s4, 32768, %s297_s22, [#allocation10], %s7806_s11, %s7806_s11, %s7807_s3  }
  0x8e   : > { %s7808_s21 = smov [#allocation14]   ;;  %s7641_s15 = scalar_lea.hbm %s9454_s6, 4096 }
  0x8f   : > { %s322_s25 = sshll.u32 %s7808_s21, 4  ;;  %p7642_p1 = scmp.ne.s32.totalorder %s9454_s6, %s7641_s15  ;;  %s323_s25 = int_to_ptr.vmem [resolvable:$true] %s322_s25 }
  0x90   : > { %p7648_p12 = scmp.lt.u32.totalorder %s7641_s15, %s9454_s6 }
  0x91   : > { %p7644_p3 = pnand %p7642_p1, %p7921_p8 }
  0x93   : > { %p7645_p11 = pneg %p7644_p3 }
  0x95   : > { %p7650_p13 = pnand %p7648_p12, %p7645_p11 }
  0x97   : > { %7653 = shalt.err (!%p7650_p13)
}
  0x98   : > { %s7654_s22 = scalar_lea.vmem %s323_s25, 4096  ;;  %p7662_p7 = scmp.lt.s32.totalorder %s323_s25, %s323_s25 }
  0x99   : > { %p7655_p0 = scmp.ne.s32.totalorder %s323_s25, %s7654_s22  ;;  %p7663_p9 = scmp.lt.s32.totalorder %s7654_s22, %s7654_s22 }
  0x9b   : > { %p7657_p2 = pnand %p7655_p0, %p7921_p8  ;;  %p7664_p5 = por %p7663_p9, %p7662_p7 }
  0x9d   : > { %p7658_p4 = pneg %p7657_p2 }
  0x9f   : > { %p7665_p10 = pnand %p7664_p5, %p7658_p4 }
  0xa1   : > { %7668 = shalt.err (!%p7665_p10)
}
  0xa2   : > { %s9489_s11 = smov 8   ;;  %s9490_s3 = smov 128  }
  0xa3   : > { %6873 = dma.hbm_to_vmem [thread:$0]  (!%p7907_p6), %s9454_s6, 4096, %s323_s25, [#allocation13], %s9490_s3, %s9490_s3, %s9489_s11  }
  0xa4   : > { %s6187_s16 = sadd.s32 4294967294, %s7793_s10   ;;  %s39_s24 = sadd.s32 1, %s7789_s9 }
  0xa5   : > { %p41_p8 = scmp.ge.s32.totalorder %s39_s24, 2  ;;  %s48_s30 = sadd.s32 1, %s7781_s29 }
  0xa6   : > { %p55_p1 = scmp.ne.s32.totalorder %s7781_s29, %s7777_s28  ;;  %p56_p3 = scmp.eq.s32.totalorder %s7793_s10, 0 }
  0xa7   : > { %s9555_s24 = smov (%p41_p8, %s39_s24), 0  ;;  %p61_p12 = scmp.ne.s32.totalorder %s7777_s28, %s7773_s27 }
  0xa8   : > { %p8057_p11 = por %p56_p3, %p55_p1  ;;  %s43_s21 = ssub.s32 %s7789_s9, %s9555_s24 }
  0xa9   : > { %s9492_s25 = sadd.s32 4294967295, %s7793_s10   ;;  %p46_p13 = scmp.eq.s32.totalorder %s43_s21, 0 }
  0xaa   : > { %p232_p6 = scmp.eq.s32.totalorder %s9492_s25, 1  ;;  %p9493_p0 = scmp.ne.s32.totalorder %s9481_s12, 0 }
  0xab   : > { %p238_p7 = scmp.eq.s32.totalorder %s6187_s16, 1  ;;  %p6888_p5 = scmp.lt.s32.totalorder %s7793_s10, 2 }
  0xac   : > { %p8069_p2 = por %p9493_p0, %p61_p12  ;;  %p8073_p4 = por %p232_p6, %p55_p1 }
  0xad   : > { %s8078_s15 = scalar_select %p46_p13, %s7781_s29, %s48_s30  }
  0xae   : > { %s9495_s14 = scalar_select %p8073_p4, 1, 0 }
  0xaf   : > { %p8080_p9 = por %p238_p7, %p61_p12  ;;  %s339_s23 = sand.u32 1, %s7781_s29  }
  0xb0   : > { %s6678_s22 = sshll.u32 %s7789_s9, 10  ;;  %s6196_s11 = sshll.u32 %s339_s23, 6 }
  0xb1   : > { %s9496_s18 = scalar_select %p8080_p9, 1, 0 }
  0xb2   : > { %s8090_s20 = scalar_lea.hbm %s9448_s0, %s6678_s22  ;;  %s343_s16 = scalar_lea.vmem [#allocation3], %s6196_s11 }
  0xb3   : > { %s352_s30 = sshll.u32 %s343_s16, 4  ;;  %p8094_p10 = pnand %p6888_p5, %p8057_p11  ;;  %s8098_s30 = int_to_ptr.vmem [resolvable:$true] %s352_s30 }
  0xb4   : > { %s8100_s25 = scalar_lea.sflag [#allocation4], %s339_s23  ;;  %s7669_s3 = scalar_lea.hbm %s8090_s20, 1024 }
  0xb5   : > { %p7670_p8 = scmp.ne.s32.totalorder %s8090_s20, %s7669_s3  ;;  %p7671_p1 = pneg %p8094_p10 }
  0xb6   : > { %s7674_s11 = scalar_lea.hbm %s9448_s0, 2048  ;;  %p7675_p11 = scmp.lt.u32.totalorder %s8090_s20, %s9448_s0 }
  0xb7   : > { %p7672_p3 = pnand %p7671_p1, %p7670_p8  ;;  %p7676_p6 = scmp.lt.u32.totalorder %s7674_s11, %s7669_s3 }
  0xb8   : > { %p7678_p0 = scmp.lt.u32.totalorder %s7669_s3, %s8090_s20 }
  0xb9   : > { %p7673_p12 = pneg %p7672_p3  ;;  %p7677_p13 = por %p7676_p6, %p7675_p11 }
  0xbb   : > { %p7679_p7 = por %p7678_p0, %p7677_p13 }
  0xbd   : > { %p7680_p5 = pnand %p7679_p7, %p7673_p12 }
  0xbf   : > { %7683 = shalt.err (!%p7680_p5)
}
  0xc0   : > { %s7684_s23 = scalar_lea.vmem %s8098_s30, 1024  ;;  %s7809_s22 = smov [#allocation3]  }
  0xc1   : > { %p7685_p8 = scmp.ne.s32.totalorder %s8098_s30, %s7684_s23  ;;  %s7689_s8 = sshll.u32 %s7809_s22, 4  ;;  %s7690_s8 = int_to_ptr.vmem [resolvable:$false] %s7689_s8 }
  0xc2   : > { %s7691_s17 = scalar_lea.vmem %s7690_s8, 2048  ;;  %p7692_p4 = scmp.lt.s32.totalorder %s8098_s30, %s7690_s8 }
  0xc3   : > { %p7687_p3 = pnand %p7685_p8, %p7671_p1  ;;  %p7693_p11 = scmp.lt.s32.totalorder %s7691_s17, %s7684_s23 }
  0xc5   : > { %p7688_p9 = pneg %p7687_p3  ;;  %p7694_p6 = por %p7693_p11, %p7692_p4 }
  0xc7   : > { %p7695_p13 = pnand %p7694_p6, %p7688_p9 }
  0xc9   : > { %7698 = shalt.err (!%p7695_p13)
}
  0xca   : > { %6877 = dma.hbm_to_vmem [thread:$0]  (!%p8094_p10), %s8090_s20, 1024, %s8098_s30, %s8100_s25, %s9488_s19, %s9488_s19, %s9487_s1  }
  0xcb   : > { %p9498_p1 = scmp.ne.s32.totalorder %s9482_s13, 0 }
  0xcd   : > { %364 = sbr.rel (%p9498_p1) target bundleno = 2087 (0x827), region = 52 }
  0xd4   : > { %s8134_s3 = sand.u32 1, %s7777_s28  }
  0xd5   : > { %s6201_s11 = sshll.u32 %s8134_s3, 6  ;;  %s367_s16 = scalar_lea.sflag [#allocation4], %s8134_s3 }
  0xd6   : > { %s370_s23 = scalar_lea.vmem [#allocation3], %s6201_s11 }
  0xd7   : > { %7752 = dma.done.wait (%p8069_p2), %s367_s16, 1024  }
  0xd8   : > { %7754 = vsyncadd (%p8069_p2), %s367_s16, 4294966272  ;;  %p9499_p4 = scmp.ne.s32.totalorder %s9481_s12, 0 }
  0xda   : > { %7756 = dma.done.wait (%p9499_p4), [#allocation7], 640  }
  0xdb   : > { %7758 = vsyncadd (%p9499_p4), [#allocation7], 4294966656 }
  0xdc   : > { %7760 = dma.done.wait (%p9499_p4), [#allocation10], 40960  }
  0xdd   : > { %7762 = vsyncadd (%p9499_p4), [#allocation10], 4294926336 }
  0xde   : > { %7764 = dma.done.wait (%p9499_p4), [#allocation13], 12288  }
  0xdf   : > { %7766 = vsyncadd (%p9499_p4), [#allocation13], 4294955008  ;;  %v6959_v0 = vld [vmem:[%s370_s23] sm:$0xff]   ;;  %v6961_v1 = vld [vmem:[%s370_s23 + $0x10] sm:$0xff]   ;;  %vm650_vm0 = vcmask 130048   ;;  %vm946_vm1 = vcmask 523264  }
  0xe0   : > { %505 = vxpose.xlu0.c.b16.start.end [1/1] (short) (narrow) %v6959_v0, 32  ;;  %v6960_v2 = vld [vmem:[%s370_s23 + $0x8] sm:$0xff]   ;;  %537 = vxpose.xlu1.c.b16.start.end [1/1] (short) (narrow) %v6961_v1, 32  ;;  %v6962_v3 = vld [vmem:[%s370_s23 + $0x18] sm:$0xff]   ;;  %v6963_v4 = vld [vmem:[%s370_s23 + $0x20] sm:$0xff]   ;;  %vm3305_vm2 = vcmask 1041409  }
  0xe1   : > { %v6966_v5 = vld [vmem:[#allocation6] sm:$0xff]   ;;  %v6964_v6 = vld [vmem:[%s370_s23 + $0x28] sm:$0xff]   ;;  %v6965_v7 = vld [vmem:[%s370_s23 + $0x30] sm:$0xff]   ;;  %vm3307_vm3 = vcmask 1042434   ;;  %vm3309_vm4 = vcmask 1043459   ;;  %vm3311_vm5 = vcmask 1044484  }
  0xe2   : > { %6717 = vmatprep.subr.bf16.mxu0 %v6966_v5  ;;  %6791 = vmatprep.subr.bf16.mxu1 %v6966_v5  ;;  %v6967_v8 = vld [vmem:[%s370_s23 + $0x38] sm:$0xff]   ;;  %v6968_v9 = vld [vmem:[#allocation8] sm:$0xff]   ;;  %v6969_v19 = vld [vmem:[#allocation8 + $0x8] sm:$0xff]   ;;  %vm3313_vm6 = vcmask 1045509   ;;  %vm3315_vm7 = vcmask 1046534   ;;  %vm3317_vm8 = vcmask 1047559  }
  0xe3   : > { %6718 = vmatpush3.bf16.msra.mxu0 %v6966_v5  ;;  %6792 = vmatpush3.bf16.msra.mxu1 %v6966_v5  ;;  %v6970_v22 = vld [vmem:[#allocation8 + $0x10] sm:$0xff]   ;;  %v6971_v28 = vld [vmem:[#allocation8 + $0x18] sm:$0xff]   ;;  %v1204_v29 = vld [vmem:[#allocation9] sm:$0xff]  ;;  %s9543_s11 = sld [smem:[#allocation21_spill]]  ;;  %s6208_s16 = sshll.u32 %s8134_s3, 4 }
  0xe4   : > { %6751 = vmatprep.subr.bf16.mxu1 %v6968_v9  ;;  %v1208_v30 = vld [vmem:[#allocation9 + $0x20] sm:$0xff]  ;;  %v8170_v31 = vld [vmem:[#allocation9 + $0x8] sm:$0xff]  ;;  %v8181_v57 = vld [vmem:[%s9455_s7] ss:$0 sm:$0xff]  ;;  %s426_s1 = scalar_lea.vmem [#allocation15], %s6208_s16  ;;  %s9544_s30 = sld [smem:[#allocation38_spill]] }
  0xe5   : > { %521 = vxpose.xlu0.c.b16.start.end [1/1] (short) (narrow) %v6960_v2, 32  ;;  %553 = vxpose.xlu1.c.b16.start.end [1/1] (short) (narrow) %v6962_v3, 32  ;;  %v6256_v32 = vcombine.low %v1204_v29, %v1208_v30  ;;  %v6257_v33 = vcombine.high %v1204_v29, %v1208_v30  ;;  %v8172_v34 = vld [vmem:[#allocation9 + $0x28] sm:$0xff]  ;;  %v1212_v35 = vld [vmem:[#allocation9 + $0x40] sm:$0xff]  ;;  %s6049_s19 = sshll.u32 %s426_s1, 4  ;;  %s6035_s22 = scalar_lea.sflag [#allocation5], %s8134_s3  ;;  %s9401_s19 = int_to_ptr.vmem [resolvable:$true] %s6049_s19 }
  0xe6   : > { %v1216_v36 = vld [vmem:[#allocation9 + $0x60] sm:$0xff]  ;;  %v6258_v37 = vcombine.low %v8170_v31, %v8172_v34  ;;  %v6259_v38 = vcombine.high %v8170_v31, %v8172_v34  ;;  %s7699_s8 = scalar_lea.vmem %s9401_s19, 256  ;;  %p9546_p9 = scmp.ne.s32.totalorder %s9495_s14, 0 }
  0xe7   : > { %v6265_v39 = vcombine.high %v1212_v35, %v1216_v36  ;;  %v1220_v40 = vld [vmem:[#allocation9 + $0x80] sm:$0xff]  ;;  %1629 = vmatprep.subr.bf16.mxu0 %v6257_v33  ;;  %v6264_v42 = vcombine.low %v1212_v35, %v1216_v36  ;;  %p7700_p2 = scmp.ne.s32.totalorder %s9401_s19, %s7699_s8  ;;  %s7811_s17 = smov [#allocation15]  }
  0xe8   : > { %v1224_v41 = vld [vmem:[#allocation9 + $0xa0] sm:$0xff] }
  0xe9   : > { %v6273_v43 = vcombine.high %v1220_v40, %v1224_v41  ;;  %v1228_v44 = vld [vmem:[#allocation9 + $0xc0] sm:$0xff]  ;;  %v6272_v46 = vcombine.low %v1220_v40, %v1224_v41  ;;  %s6679_s13 = sshll.u32 %s9543_s11, 8  ;;  %p7701_p10 = pnand %p7700_p2, %p9546_p9 }
  0xea   : > { %569 = vxpose.xlu0.c.b16.start.end [1/1] (short) (narrow) %v6963_v4, 32  ;;  %585 = vxpose.xlu1.c.b16.start.end [1/1] (short) (narrow) %v6964_v6, 32  ;;  %v1232_v45 = vld [vmem:[#allocation9 + $0xe0] sm:$0xff]  ;;  %v1213_v6 = vld [vmem:[#allocation9 + $0x48] sm:$0xff]  ;;  %s9545_s21 = smov %s9544_s30  ;;  %s9399_s25 = scalar_lea.hbm %s9544_s30, %s6679_s13 }
  0xeb   : > { %v6281_v47 = vcombine.high %v1228_v44, %v1232_v45  ;;  %v1236_v48 = vld [vmem:[#allocation9 + $0x100] sm:$0xff]  ;;  %v6280_v50 = vcombine.low %v1228_v44, %v1232_v45  ;;  %v1237_v44 = vld [vmem:[#allocation9 + $0x108] sm:$0xff]  ;;  %p7702_p12 = pneg %p7701_p10  ;;  %s7703_s11 = sshll.u32 %s7811_s17, 4  ;;  %s7704_s11 = int_to_ptr.vmem [resolvable:$false] %s7703_s11 }
  0xec   : > { %v1240_v49 = vld [vmem:[#allocation9 + $0x120] sm:$0xff]  ;;  %v1241_v45 = vld [vmem:[#allocation9 + $0x128] sm:$0xff]  ;;  %s7705_s16 = scalar_lea.vmem %s7704_s11, 512  ;;  %p7706_p0 = scmp.lt.s32.totalorder %s9401_s19, %s7704_s11 }
  0xed   : > { %v6289_v51 = vcombine.high %v1236_v48, %v1240_v49  ;;  %v1244_v52 = vld [vmem:[#allocation9 + $0x140] sm:$0xff]  ;;  %v6288_v54 = vcombine.low %v1236_v48, %v1240_v49  ;;  %p7707_p7 = scmp.lt.s32.totalorder %s7705_s16, %s7699_s8 }
  0xee   : > { %v1248_v53 = vld [vmem:[#allocation9 + $0x160] sm:$0xff] }
  0xef   : > { %601 = vxpose.xlu0.c.b16.start.end [1/1] (short) (narrow) %v6965_v7, 32  ;;  %617 = vxpose.xlu1.c.b16.start.end [1/1] (short) (narrow) %v6967_v8, 32  ;;  %v6297_v55 = vcombine.high %v1244_v52, %v1248_v53  ;;  %v6296_v56 = vcombine.low %v1244_v52, %v1248_v53  ;;  %v1217_v7 = vld [vmem:[#allocation9 + $0x68] sm:$0xff]  ;;  %p7708_p5 = por %p7707_p7, %p7706_p0 }
  0xf1   : > { %p7709_p8 = pnand %p7708_p5, %p7702_p12 }
 0x146   : > { %v513_v10 = vpop.trf.xlu0  ;;  %v545_v11 = vpop.trf.xlu1 }
 0x147   : > { %6719 = vmatprep.mubr.msk.bf16.mxu0 %vm650_vm0, %v513_v10 }
 0x14a   : > { %v514_v12 = vpop.trf.xlu0  ;;  %v546_v13 = vpop.trf.xlu1 }
 0x14b   : > { %6720 = vmatmul.mubr.msk.bf16.vlgmr.msra.gmra.mrb[0].mxu0 %vm650_vm0, %v514_v12 }
 0x14c   : > { %1630 = vmatpush1.bf16.msra.mxu0 %v6256_v32 }
 0x14d   : > { %1631 = vmatprep.subr.bf16.mxu0 %v6265_v39 }
 0x14e   : > { %v529_v14 = vpop.trf.xlu0  ;;  %v561_v15 = vpop.trf.xlu1 }
 0x14f   : > { %6723 = vmatprep.mubr.msk.bf16.mxu0 %vm650_vm0, %v529_v14 }
 0x150   : > { %1632 = vmatpush1.bf16.msra.mxu0 %v6264_v42 }
 0x151   : > { %1633 = vmatprep.subr.bf16.mxu0 %v6273_v43 }
 0x152   : > { %v530_v16 = vpop.trf.xlu0  ;;  %v562_v17 = vpop.trf.xlu1 }
 0x153   : > { %6724 = vmatmul.mubr.msk.bf16.gmra.mrb[4].mxu0 %vm650_vm0, %v530_v16  ;;  %v1221_v16 = vld [vmem:[#allocation9 + $0x88] sm:$0xff] }
 0x154   : > { %6727 = vmatprep.mubr.msk.bf16.mxu0 %vm650_vm0, %v545_v11  ;;  %1634 = vmatpush1.bf16.msra.mxu0 %v6272_v46 }
 0x155   : > { %1635 = vmatprep.subr.bf16.mxu0 %v6281_v47 }
 0x156   : > { %v577_v18 = vpop.trf.xlu0  ;;  %v593_v21 = vpop.trf.xlu1 }
 0x157   : > { %6735 = vmatprep.mubr.msk.bf16.mxu1 %vm650_vm0, %v577_v18 }
 0x158   : > { %1636 = vmatpush1.bf16.msra.mxu0 %v6280_v50 }
 0x159   : > { %1637 = vmatprep.subr.bf16.mxu0 %v6289_v51 }
 0x15a   : > { %v578_v20 = vpop.trf.xlu0  ;;  %v594_v23 = vpop.trf.xlu1 }
 0x15b   : > { %6728 = vmatmul.mubr.msk.bf16.gmra.mrb[8].mxu0 %vm650_vm0, %v546_v13  ;;  %6736 = vmatmul.mubr.msk.bf16.vlgmr.msra.gmra.mrb[0].mxu1 %vm650_vm0, %v578_v20  ;;  %v6267_v13 = vcombine.high %v1213_v6, %v1217_v7 }
 0x15c   : > { %6731 = vmatprep.mubr.msk.bf16.mxu0 %vm650_vm0, %v561_v15  ;;  %6739 = vmatprep.mubr.msk.bf16.mxu1 %vm650_vm0, %v593_v21 }
 0x15d   : > { %6752 = vmatpush3.bf16.msra.mxu1 %v6968_v9  ;;  %1638 = vmatpush1.bf16.msra.mxu0 %v6288_v54 }
 0x15e   : > { %6753 = vmatprep.subr.bf16.mxu1 %v6969_v19  ;;  %v609_v24 = vpop.trf.xlu0  ;;  %v625_v26 = vpop.trf.xlu1  ;;  %1639 = vmatprep.subr.bf16.mxu0 %v6297_v55 }
 0x161   : > { %6754 = vmatpush3.bf16.msra.mxu1 %v6969_v19  ;;  %1640 = vmatpush1.bf16.msra.mxu0 %v6296_v56 }
 0x162   : > { %6755 = vmatprep.subr.bf16.mxu1 %v6970_v22  ;;  %v610_v25 = vpop.trf.xlu0  ;;  %v626_v27 = vpop.trf.xlu1 }
 0x163   : > { %6732 = vmatmul.mubr.msk.bf16.gmra.mrb[12].mxu0 %vm650_vm0, %v562_v17  ;;  %6740 = vmatmul.mubr.msk.bf16.gmra.mrb[4].mxu1 %vm650_vm0, %v594_v23  ;;  %v1225_v17 = vld [vmem:[#allocation9 + $0xa8] sm:$0xff]  ;;  %v6266_v23 = vcombine.low %v1213_v6, %v1217_v7  ;;  %v6290_v6 = vcombine.low %v1237_v44, %v1241_v45 }
 0x164   : > { %6743 = vmatprep.mubr.msk.bf16.mxu1 %vm650_vm0, %v609_v24  ;;  %v6274_v35 = vcombine.low %v1221_v16, %v1225_v17 }
 0x165   : > { %6756 = vmatpush3.bf16.msra.mxu1 %v6970_v22 }
 0x166   : > { %6757 = vmatprep.subr.bf16.mxu1 %v6971_v28 }
 0x169   : > { %6758 = vmatpush3.bf16.msra.mxu1 %v6971_v28  ;;  %v1233_v28 = vld [vmem:[#allocation9 + $0xe8] sm:$0xff] }
 0x16a   : > { %1822 = vmatprep.subr.bf16.mxu1 %v6259_v38 }
 0x16b   : > { %6744 = vmatmul.mubr.msk.bf16.gmra.mrb[8].mxu1 %vm650_vm0, %v610_v25  ;;  %v6275_v25 = vcombine.high %v1221_v16, %v1225_v17 }
 0x16c   : > { %6747 = vmatprep.mubr.msk.bf16.mxu1 %vm650_vm0, %v625_v26 }
 0x173   : > { %6748 = vmatmul.mubr.msk.bf16.gmra.mrb[12].mxu1 %vm650_vm0, %v626_v27  ;;  %v1229_v27 = vld [vmem:[#allocation9 + $0xc8] sm:$0xff] }
 0x174   : > { %v6283_v34 = vcombine.high %v1229_v27, %v1233_v28  ;;  %v6282_v43 = vcombine.low %v1229_v27, %v1233_v28 }
 0x21e   : > { %v6721_v58 = vpop.f32.mrb[0].mxu0 }
 0x21f   : > { %v742_v59 = vadd.f32 %v6721_v58, %v8181_v57  ;;  %v733_v60 = vpop.f32.mrb[1].mxu0 }
 0x220   : > { %v734_v61 = vadd.f32 %v8181_v57, %v733_v60  ;;  %v6722_v62 = vpop.f32.mrb[2].mxu0 }
 0x221   : > { %v745_v63 = vadd.f32 %v6722_v62, %v8181_v57  ;;  %v736_v0 = vpop.f32.mrb[3].mxu0  ;;  %v862_v2 = vmax.f32 %v742_v59, 0.0  ;;  %v6291_v59 = vcombine.high %v1237_v44, %v1241_v45  ;;  %v1245_v62 = vld [vmem:[#allocation9 + $0x148] sm:$0xff] }
 0x222   : > { %v737_v1 = vadd.f32 %v8181_v57, %v736_v0  ;;  %v860_v4 = vmax.f32 %v734_v61, 0.0 }
 0x223   : > { %v863_v3 = vmax.f32 %v745_v63, 0.0  ;;  %v1249_v63 = vld [vmem:[#allocation9 + $0x168] sm:$0xff] }
 0x224   : > { %v861_v5 = vmax.f32 %v737_v1, 0.0  ;;  %v6298_v16 = vcombine.low %v1245_v62, %v1249_v63 }
 0x225   : > { %v893_v8 = vpack.c.bf16 %v863_v3, %v862_v2 }
 0x226   : > { %v892_v9 = vpack.c.bf16 %v861_v5, %v860_v4  ;;  %v6725_v10 = vpop.f32.mrb[4].mxu0 }
 0x227   : > { %v758_v11 = vadd.f32 %v6725_v10, %v8181_v57  ;;  %v749_v12 = vpop.f32.mrb[5].mxu0 }
 0x228   : > { %v750_v14 = vadd.f32 %v8181_v57, %v749_v12  ;;  %6759 = vmatprep.mubr.msk.bf16.mxu1 %vm946_vm1, %v892_v9  ;;  %v6726_v15 = vpop.f32.mrb[6].mxu0 }
 0x229   : > { %v866_v18 = vmax.f32 %v758_v11, 0.0  ;;  %v761_v19 = vadd.f32 %v6726_v15, %v8181_v57  ;;  %6760 = vmatmul.mubr.msk.bf16.vlgmr.msra.gmra.mrb[16].mxu1 %vm946_vm1, %v893_v8  ;;  %v752_v20 = vpop.f32.mrb[7].mxu0  ;;  %v6299_v11 = vcombine.high %v1245_v62, %v1249_v63 }
 0x22a   : > { %v864_v21 = vmax.f32 %v750_v14, 0.0  ;;  %v753_v22 = vadd.f32 %v8181_v57, %v752_v20  ;;  %1823 = vmatpush1.bf16.msra.mxu1 %v6258_v37 }
 0x22b   : > { %v867_v24 = vmax.f32 %v761_v19, 0.0  ;;  %1824 = vmatprep.subr.bf16.mxu1 %v6267_v13 }
 0x22c   : > { %v865_v26 = vmax.f32 %v753_v22, 0.0 }
 0x22d   : > { %v895_v29 = vpack.c.bf16 %v867_v24, %v866_v18 }
 0x22e   : > { %v894_v30 = vpack.c.bf16 %v865_v26, %v864_v21  ;;  %v6729_v32 = vpop.f32.mrb[8].mxu0  ;;  %v6737_v33 = vpop.f32.mrb[0].mxu1  ;;  %1825 = vmatpush1.bf16.msra.mxu1 %v6266_v23 }
 0x22f   : > { %v774_v36 = vadd.f32 %v6729_v32, %v8181_v57  ;;  %v765_v38 = vpop.f32.mrb[9].mxu0  ;;  %v806_v39 = vadd.f32 %v6737_v33, %v8181_v57  ;;  %v797_v31 = vpop.f32.mrb[1].mxu1  ;;  %1826 = vmatprep.subr.bf16.mxu1 %v6275_v25 }
 0x230   : > { %6763 = vmatprep.mubr.msk.bf16.mxu1 %vm946_vm1, %v894_v30  ;;  %v766_v37 = vadd.f32 %v8181_v57, %v765_v38  ;;  %v6730_v40 = vpop.f32.mrb[10].mxu0  ;;  %v798_v41 = vadd.f32 %v8181_v57, %v797_v31  ;;  %v6738_v42 = vpop.f32.mrb[2].mxu1 }
 0x231   : > { %6764 = vmatmul.mubr.msk.bf16.gmra.mrb[20].mxu1 %vm946_vm1, %v895_v29  ;;  %v870_v46 = vmax.f32 %v774_v36, 0.0  ;;  %v777_v47 = vadd.f32 %v6730_v40, %v8181_v57  ;;  %v768_v48 = vpop.f32.mrb[11].mxu0  ;;  %v878_v49 = vmax.f32 %v806_v39, 0.0  ;;  %v809_v50 = vadd.f32 %v6738_v42, %v8181_v57  ;;  %v800_v51 = vpop.f32.mrb[3].mxu1 }
 0x232   : > { %v868_v52 = vmax.f32 %v766_v37, 0.0  ;;  %v769_v53 = vadd.f32 %v8181_v57, %v768_v48  ;;  %v876_v54 = vmax.f32 %v798_v41, 0.0  ;;  %v801_v55 = vadd.f32 %v8181_v57, %v800_v51  ;;  %1827 = vmatpush1.bf16.msra.mxu1 %v6274_v35 }
 0x233   : > { %v871_v56 = vmax.f32 %v777_v47, 0.0  ;;  %v879_v58 = vmax.f32 %v809_v50, 0.0  ;;  %1828 = vmatprep.subr.bf16.mxu1 %v6283_v34 }
 0x234   : > { %v869_v60 = vmax.f32 %v769_v53, 0.0  ;;  %v877_v61 = vmax.f32 %v801_v55, 0.0 }
 0x235   : > { %v897_v0 = vpack.c.bf16 %v871_v56, %v870_v46  ;;  %v8206_v1 = vpack.c.bf16 %v879_v58, %v878_v49 }
 0x236   : > { %v896_v2 = vpack.c.bf16 %v869_v60, %v868_v52  ;;  %v6733_v3 = vpop.f32.mrb[12].mxu0  ;;  %v900_v4 = vpack.c.bf16 %v877_v61, %v876_v54  ;;  %v6741_v5 = vpop.f32.mrb[4].mxu1  ;;  %1829 = vmatpush1.bf16.msra.mxu1 %v6282_v43 }
 0x237   : > { %v790_v7 = vadd.f32 %v6733_v3, %v8181_v57  ;;  %v781_v8 = vpop.f32.mrb[13].mxu0  ;;  %v822_v9 = vadd.f32 %v6741_v5, %v8181_v57  ;;  %v813_v10 = vpop.f32.mrb[5].mxu1  ;;  %1830 = vmatprep.subr.bf16.mxu1 %v6291_v59 }
 0x238   : > { %6767 = vmatprep.mubr.msk.bf16.mxu1 %vm946_vm1, %v896_v2  ;;  %v782_v12 = vadd.f32 %v8181_v57, %v781_v8  ;;  %v6734_v13 = vpop.f32.mrb[14].mxu0  ;;  %v814_v14 = vadd.f32 %v8181_v57, %v813_v10  ;;  %v6742_v15 = vpop.f32.mrb[6].mxu1  ;;  %v1253_v2 = vld [vmem:[#allocation9 + $0x188] sm:$0xff]  ;;  %v1264_v8 = vld [vmem:[#allocation9 + $0x1e0] sm:$0xff] }
 0x239   : > { %6768 = vmatmul.mubr.msk.bf16.gmra.mrb[24].mxu1 %vm946_vm1, %v897_v0  ;;  %v874_v17 = vmax.f32 %v790_v7, 0.0  ;;  %v793_v18 = vadd.f32 %v6734_v13, %v8181_v57  ;;  %v784_v19 = vpop.f32.mrb[15].mxu0  ;;  %v882_v20 = vmax.f32 %v822_v9, 0.0  ;;  %v825_v21 = vadd.f32 %v6742_v15, %v8181_v57  ;;  %v816_v22 = vpop.f32.mrb[7].mxu1  ;;  %v1252_v0 = vld [vmem:[#allocation9 + $0x180] sm:$0xff]  ;;  %v1261_v9 = vld [vmem:[#allocation9 + $0x1c8] sm:$0xff] }
 0x23a   : > { %v872_v23 = vmax.f32 %v782_v12, 0.0  ;;  %v785_v24 = vadd.f32 %v8181_v57, %v784_v19  ;;  %v880_v25 = vmax.f32 %v814_v14, 0.0  ;;  %v817_v26 = vadd.f32 %v8181_v57, %v816_v22  ;;  %1831 = vmatpush1.bf16.msra.mxu1 %v6290_v6  ;;  %v1260_v7 = vld [vmem:[#allocation9 + $0x1c0] sm:$0xff] }
 0x23b   : > { %v875_v27 = vmax.f32 %v793_v18, 0.0  ;;  %v883_v28 = vmax.f32 %v825_v21, 0.0  ;;  %1832 = vmatprep.subr.bf16.mxu1 %v6299_v11  ;;  %v6313_v10 = vcombine.high %v1260_v7, %v1264_v8  ;;  %v1265_v11 = vld [vmem:[#allocation9 + $0x1e8] sm:$0xff]  ;;  %v6312_v12 = vcombine.low %v1260_v7, %v1264_v8  ;;  %v1211_v21 = vld [vmem:[#allocation9 + $0x38] sm:$0xff] }
 0x23c   : > { %v873_v29 = vmax.f32 %v785_v24, 0.0  ;;  %v881_v30 = vmax.f32 %v817_v26, 0.0  ;;  %v6314_v13 = vcombine.low %v1261_v9, %v1265_v11  ;;  %v6315_v14 = vcombine.high %v1261_v9, %v1265_v11  ;;  %v8242_v24 = vld [vmem:[%s9455_s7 + $0x1] ss:$0 sm:$0xff] }
 0x23d   : > { %v899_v32 = vpack.c.bf16 %v875_v27, %v874_v17  ;;  %v903_v33 = vpack.c.bf16 %v883_v28, %v882_v20  ;;  %v7810_v15 = vmov 0   ;;  %v1210_v17 = vld [vmem:[#allocation9 + $0x30] sm:$0xff]  ;;  %v1207_v20 = vld [vmem:[#allocation9 + $0x18] sm:$0xff] }
 0x23e   : > { %v898_v35 = vpack.c.bf16 %v873_v29, %v872_v23  ;;  %v902_v36 = vpack.c.bf16 %v881_v30, %v880_v25  ;;  %v6745_v38 = vpop.f32.mrb[8].mxu1  ;;  %1833 = vmatpush1.bf16.msra.mxu1 %v6298_v16  ;;  %1661 = vmatprep.mubr.bf16.mxu0 %v7810_v15  ;;  %v1206_v16 = vld [vmem:[#allocation9 + $0x10] sm:$0xff]  ;;  %v6262_v22 = vcombine.low %v1207_v20, %v1211_v21 }
 0x23f   : > { %v838_v39 = vadd.f32 %v6745_v38, %v8181_v57  ;;  %v829_v31 = vpop.f32.mrb[9].mxu1  ;;  %v6260_v18 = vcombine.low %v1206_v16, %v1210_v17  ;;  %v6261_v19 = vcombine.high %v1206_v16, %v1210_v17  ;;  %v6263_v23 = vcombine.high %v1207_v20, %v1211_v21  ;;  %v1214_v38 = vld [vmem:[#allocation9 + $0x50] sm:$0xff] }
 0x240   : > { %6771 = vmatprep.mubr.msk.bf16.mxu1 %vm946_vm1, %v898_v35  ;;  %v830_v34 = vadd.f32 %v8181_v57, %v829_v31  ;;  %v6746_v37 = vpop.f32.mrb[10].mxu1  ;;  %v1238_v16 = vld [vmem:[#allocation9 + $0x110] sm:$0xff] }
 0x241   : > { %6772 = vmatmul.mubr.msk.bf16.gmra.mrb[28].mxu1 %vm946_vm1, %v899_v32  ;;  %v886_v40 = vmax.f32 %v838_v39, 0.0  ;;  %v841_v41 = vadd.f32 %v6746_v37, %v8181_v57  ;;  %v832_v42 = vpop.f32.mrb[11].mxu1  ;;  %v1218_v39 = vld [vmem:[#allocation9 + $0x70] sm:$0xff] }
 0x242   : > { %6775 = vmatprep.mubr.msk.bf16.mxu1 %vm946_vm1, %v900_v4  ;;  %v884_v43 = vmax.f32 %v830_v34, 0.0  ;;  %v833_v44 = vadd.f32 %v8181_v57, %v832_v42  ;;  %v1257_v4 = vld [vmem:[#allocation9 + $0x1a8] sm:$0xff]  ;;  %v1242_v17 = vld [vmem:[#allocation9 + $0x130] sm:$0xff] }
 0x243   : > { %v887_v45 = vmax.f32 %v841_v41, 0.0  ;;  %v6306_v5 = vcombine.low %v1253_v2, %v1257_v4  ;;  %v6307_v6 = vcombine.high %v1253_v2, %v1257_v4  ;;  %v1219_v41 = vld [vmem:[#allocation9 + $0x78] sm:$0xff]  ;;  %v1234_v2 = vld [vmem:[#allocation9 + $0xf0] sm:$0xff] }
 0x244   : > { %v885_v46 = vmax.f32 %v833_v44, 0.0  ;;  %v6269_v44 = vcombine.high %v1214_v38, %v1218_v39  ;;  %v1231_v4 = vld [vmem:[#allocation9 + $0xd8] sm:$0xff] }
 0x245   : > { %v905_v47 = vpack.c.bf16 %v887_v45, %v886_v40  ;;  %1834 = vmatprep.subr.bf16.mxu1 %v6307_v6  ;;  %v1215_v40 = vld [vmem:[#allocation9 + $0x58] sm:$0xff] }
 0x246   : > { %v904_v48 = vpack.c.bf16 %v885_v46, %v884_v43  ;;  %v6749_v49 = vpop.f32.mrb[12].mxu1  ;;  %1835 = vmatpush1.bf16.msra.mxu1 %v6306_v5 }
 0x247   : > { %v854_v50 = vadd.f32 %v6749_v49, %v8181_v57  ;;  %v845_v51 = vpop.f32.mrb[13].mxu1  ;;  %1836 = vmatprep.subr.bf16.mxu1 %v6315_v14 }
 0x248   : > { %v846_v52 = vadd.f32 %v8181_v57, %v845_v51  ;;  %v6750_v53 = vpop.f32.mrb[14].mxu1  ;;  %v6271_v51 = vcombine.high %v1215_v40, %v1219_v41 }
 0x249   : > { %6776 = vmatmul.mubr.msk.bf16.gmra.mrb[32].mxu1 %vm946_vm1, %v8206_v1  ;;  %v890_v54 = vmax.f32 %v854_v50, 0.0  ;;  %v857_v55 = vadd.f32 %v6750_v53, %v8181_v57  ;;  %v848_v56 = vpop.f32.mrb[15].mxu1  ;;  %v1256_v1 = vld [vmem:[#allocation9 + $0x1a0] sm:$0xff] }
 0x24a   : > { %6779 = vmatprep.mubr.msk.bf16.mxu1 %vm946_vm1, %v902_v36  ;;  %v888_v58 = vmax.f32 %v846_v52, 0.0  ;;  %v849_v59 = vadd.f32 %v8181_v57, %v848_v56  ;;  %v6305_v3 = vcombine.high %v1252_v0, %v1256_v1  ;;  %v6304_v57 = vcombine.low %v1252_v0, %v1256_v1  ;;  %1837 = vmatpush1.bf16.msra.mxu1 %v6314_v13  ;;  %v1230_v1 = vld [vmem:[#allocation9 + $0xd0] sm:$0xff] }
 0x24b   : > { %v891_v60 = vmax.f32 %v857_v55, 0.0  ;;  %2208 = vmatprep.subr.bf16.mxu1 %v6263_v23  ;;  %v6268_v55 = vcombine.low %v1214_v38, %v1218_v39  ;;  %v6285_v11 = vcombine.high %v1230_v1, %v1234_v2  ;;  %v1247_v38 = vld [vmem:[#allocation9 + $0x158] sm:$0xff] }
 0x24c   : > { %v889_v61 = vmax.f32 %v849_v59, 0.0  ;;  %1641 = vmatprep.subr.bf16.mxu0 %v6305_v3  ;;  %v1251_v39 = vld [vmem:[#allocation9 + $0x178] sm:$0xff] }
 0x24d   : > { %v907_v62 = vpack.c.bf16 %v891_v60, %v890_v54  ;;  %1642 = vmatpush1.bf16.msra.mxu0 %v6304_v57  ;;  %v1235_v57 = vld [vmem:[#allocation9 + $0xf8] sm:$0xff] }
 0x24e   : > { %v906_v63 = vpack.c.bf16 %v889_v61, %v888_v58  ;;  %1643 = vmatprep.subr.bf16.mxu0 %v6313_v10  ;;  %v6270_v61 = vcombine.low %v1215_v40, %v1219_v41  ;;  %v6292_v40 = vcombine.low %v1238_v16, %v1242_v17 }
 0x251   : > { %6780 = vmatmul.mubr.msk.bf16.gmra.mrb[36].mxu1 %vm946_vm1, %v903_v33  ;;  %1644 = vmatpush1.bf16.msra.mxu0 %v6312_v12 }
 0x252   : > { %6783 = vmatprep.mubr.msk.bf16.mxu1 %vm946_vm1, %v904_v48  ;;  %2015 = vmatprep.subr.bf16.mxu0 %v6261_v19  ;;  %v1226_v48 = vld [vmem:[#allocation9 + $0xb0] sm:$0xff] }
 0x259   : > { %6784 = vmatmul.mubr.msk.bf16.gmra.mrb[40].mxu1 %vm946_vm1, %v905_v47  ;;  %v1222_v47 = vld [vmem:[#allocation9 + $0x90] sm:$0xff] }
 0x25a   : > { %6787 = vmatprep.mubr.msk.bf16.mxu1 %vm946_vm1, %v906_v63  ;;  %v6277_v59 = vcombine.high %v1222_v47, %v1226_v48  ;;  %v1227_v63 = vld [vmem:[#allocation9 + $0xb8] sm:$0xff]  ;;  %v6276_v7 = vcombine.low %v1222_v47, %v1226_v48 }
 0x261   : > { %6788 = vmatmul.mubr.msk.bf16.gmra.mrb[44].mxu1 %vm946_vm1, %v907_v62  ;;  %v1223_v62 = vld [vmem:[#allocation9 + $0x98] sm:$0xff] }
 0x262   : > { %1854 = vmatprep.mubr.bf16.mxu1 %v7810_v15  ;;  %v6279_v8 = vcombine.high %v1223_v62, %v1227_v63  ;;  %v6278_v12 = vcombine.low %v1223_v62, %v1227_v63  ;;  %v1255_v62 = vld [vmem:[#allocation9 + $0x198] sm:$0xff] }
 0x263   : > { %v1259_v63 = vld [vmem:[#allocation9 + $0x1b8] sm:$0xff] }
 0x2fc   : > { %v6761_v25 = vpop.f32.mrb[16].mxu1 }
 0x2fd   : > { %v1038_v26 = vadd.f32 %v6761_v25, %v8242_v24  ;;  %v1029_v27 = vpop.f32.mrb[17].mxu1  ;;  %v6284_v25 = vcombine.low %v1230_v1, %v1234_v2  ;;  %v1262_v1 = vld [vmem:[#allocation9 + $0x1d0] sm:$0xff] }
 0x2fe   : > { %v1030_v28 = vadd.f32 %v8242_v24, %v1029_v27  ;;  %v6762_v29 = vpop.f32.mrb[18].mxu1  ;;  %v6293_v27 = vcombine.high %v1238_v16, %v1242_v17  ;;  %v1266_v2 = vld [vmem:[#allocation9 + $0x1f0] sm:$0xff] }
 0x2ff   : > { %v1041_v30 = vadd.f32 %v6762_v29, %v8242_v24  ;;  %v1032_v32 = vpop.f32.mrb[19].mxu1  ;;  %v1158_v35 = vmax.f32 %v1038_v26, 0.0  ;;  %v1239_v29 = vld [vmem:[#allocation9 + $0x118] sm:$0xff] }
 0x300   : > { %v1033_v33 = vadd.f32 %v8242_v24, %v1032_v32  ;;  %v1156_v31 = vmax.f32 %v1030_v28, 0.0  ;;  %v6286_v28 = vcombine.low %v1231_v4, %v1235_v57 }
 0x301   : > { %v1159_v36 = vmax.f32 %v1041_v30, 0.0  ;;  %v1243_v30 = vld [vmem:[#allocation9 + $0x138] sm:$0xff] }
 0x302   : > { %v1157_v34 = vmax.f32 %v1033_v33, 0.0  ;;  %v1246_v33 = vld [vmem:[#allocation9 + $0x150] sm:$0xff]  ;;  %v6295_v41 = vcombine.high %v1239_v29, %v1243_v30 }
 0x303   : > { %v8248_v37 = vpack.c.bf16 %v1159_v36, %v1158_v35  ;;  %v1250_v35 = vld [vmem:[#allocation9 + $0x170] sm:$0xff] }
 0x304   : > { %v8250_v42 = vpack.c.bf16 %v1157_v34, %v1156_v31  ;;  %v6765_v43 = vpop.f32.mrb[20].mxu1 }
 0x305   : > { %v1054_v45 = vadd.f32 %v6765_v43, %v8242_v24  ;;  %v1045_v46 = vpop.f32.mrb[21].mxu1 }
 0x306   : > { %v1046_v49 = vadd.f32 %v8242_v24, %v1045_v46  ;;  %1662 = vmatmul.mubr.bf16.vlgmr.msra.gmra.mrb[16].mxu0 %v8250_v42  ;;  %1855 = vmatmul.mubr.bf16.vlgmr.msra.gmra.mrb[48].mxu1 %v8250_v42  ;;  %v6766_v50 = vpop.f32.mrb[22].mxu1  ;;  %v6294_v46 = vcombine.low %v1239_v29, %v1243_v30 }
 0x307   : > { %v1162_v52 = vmax.f32 %v1054_v45, 0.0  ;;  %2016 = vmatpush1.bf16.msra.mxu0 %v6260_v18  ;;  %v1057_v53 = vadd.f32 %v6766_v50, %v8242_v24  ;;  %v1048_v54 = vpop.f32.mrb[23].mxu1  ;;  %1671 = vmatprep.mubr.bf16.mxu0 %v7810_v15  ;;  %v6287_v18 = vcombine.high %v1231_v4, %v1235_v57  ;;  %v6301_v45 = vcombine.high %v1246_v33, %v1250_v35  ;;  %v1258_v50 = vld [vmem:[#allocation9 + $0x1b0] sm:$0xff]  ;;  %v1263_v57 = vld [vmem:[#allocation9 + $0x1d8] sm:$0xff] }
 0x308   : > { %v1160_v56 = vmax.f32 %v1046_v49, 0.0  ;;  %v1049_v58 = vadd.f32 %v8242_v24, %v1048_v54  ;;  %1864 = vmatprep.mubr.bf16.mxu1 %v7810_v15  ;;  %2017 = vmatprep.subr.bf16.mxu0 %v6269_v44  ;;  %v1254_v49 = vld [vmem:[#allocation9 + $0x190] sm:$0xff] }
 0x309   : > { %v1163_v60 = vmax.f32 %v1057_v53, 0.0  ;;  %2209 = vmatpush1.bf16.msra.mxu1 %v6262_v22 }
 0x30a   : > { %v1161_v0 = vmax.f32 %v1049_v58, 0.0  ;;  %2210 = vmatprep.subr.bf16.mxu1 %v6271_v51  ;;  %v6303_v51 = vcombine.high %v1247_v38, %v1251_v39  ;;  %v6300_v58 = vcombine.low %v1246_v33, %v1250_v35 }
 0x30b   : > { %v8260_v3 = vpack.c.bf16 %v1163_v60, %v1162_v52  ;;  %2018 = vmatpush1.bf16.msra.mxu0 %v6268_v55  ;;  %v6309_v60 = vcombine.high %v1254_v49, %v1258_v50 }
 0x30c   : > { %v8262_v5 = vpack.c.bf16 %v1161_v0, %v1160_v56  ;;  %v6769_v6 = vpop.f32.mrb[24].mxu1  ;;  %2019 = vmatprep.subr.bf16.mxu0 %v6277_v59 }
 0x30d   : > { %v1070_v9 = vadd.f32 %v6769_v6, %v8242_v24  ;;  %v1061_v10 = vpop.f32.mrb[25].mxu1  ;;  %2211 = vmatpush1.bf16.msra.mxu1 %v6270_v61  ;;  %v6302_v61 = vcombine.low %v1247_v38, %v1251_v39  ;;  %v1267_v6 = vld [vmem:[#allocation9 + $0x1f8] sm:$0xff] }
 0x30e   : > { %1672 = vmatmul.mubr.bf16.gmra.mrb[20].mxu0 %v8248_v37  ;;  %1865 = vmatmul.mubr.bf16.gmra.mrb[52].mxu1 %v8248_v37  ;;  %v1062_v13 = vadd.f32 %v8242_v24, %v1061_v10  ;;  %v6770_v14 = vpop.f32.mrb[26].mxu1  ;;  %v6311_v10 = vcombine.high %v1255_v62, %v1259_v63 }
 0x30f   : > { %v1166_v19 = vmax.f32 %v1070_v9, 0.0  ;;  %1681 = vmatprep.mubr.bf16.mxu0 %v7810_v15  ;;  %1874 = vmatprep.mubr.bf16.mxu1 %v7810_v15  ;;  %v1073_v20 = vadd.f32 %v6770_v14, %v8242_v24  ;;  %v1064_v21 = vpop.f32.mrb[27].mxu1  ;;  %v6308_v9 = vcombine.low %v1254_v49, %v1258_v50  ;;  %v6310_v14 = vcombine.low %v1255_v62, %v1259_v63 }
 0x310   : > { %v1164_v22 = vmax.f32 %v1062_v13, 0.0  ;;  %v1065_v23 = vadd.f32 %v8242_v24, %v1064_v21  ;;  %2020 = vmatpush1.bf16.msra.mxu0 %v6276_v7  ;;  %2212 = vmatprep.subr.bf16.mxu1 %v6279_v8  ;;  %v6317_v13 = vcombine.high %v1262_v1, %v1266_v2 }
 0x311   : > { %v1167_v26 = vmax.f32 %v1073_v20, 0.0  ;;  %2021 = vmatprep.subr.bf16.mxu0 %v6285_v11  ;;  %2213 = vmatpush1.bf16.msra.mxu1 %v6278_v12 }
 0x312   : > { %v1165_v32 = vmax.f32 %v1065_v23, 0.0  ;;  %2214 = vmatprep.subr.bf16.mxu1 %v6287_v18  ;;  %v6319_v18 = vcombine.high %v1263_v57, %v1267_v6 }
 0x313   : > { %v8272_v36 = vpack.c.bf16 %v1167_v26, %v1166_v19 }
 0x314   : > { %v8274_v31 = vpack.c.bf16 %v1165_v32, %v1164_v22  ;;  %v6773_v34 = vpop.f32.mrb[28].mxu1  ;;  %2022 = vmatpush1.bf16.msra.mxu0 %v6284_v25  ;;  %v6316_v25 = vcombine.low %v1262_v1, %v1266_v2 }
 0x315   : > { %v1086_v43 = vadd.f32 %v6773_v34, %v8242_v24  ;;  %v1077_v44 = vpop.f32.mrb[29].mxu1  ;;  %2023 = vmatprep.subr.bf16.mxu0 %v6293_v27  ;;  %2215 = vmatpush1.bf16.msra.mxu1 %v6286_v28  ;;  %v6318_v27 = vcombine.low %v1263_v57, %v1267_v6 }
 0x316   : > { %1682 = vmatmul.mubr.bf16.gmra.mrb[24].mxu0 %v8262_v5  ;;  %1875 = vmatmul.mubr.bf16.gmra.mrb[56].mxu1 %v8262_v5  ;;  %v1078_v47 = vadd.f32 %v8242_v24, %v1077_v44  ;;  %v6774_v48 = vpop.f32.mrb[30].mxu1 }
 0x317   : > { %1691 = vmatprep.mubr.bf16.mxu0 %v7810_v15  ;;  %1884 = vmatprep.mubr.bf16.mxu1 %v7810_v15  ;;  %v1170_v52 = vmax.f32 %v1086_v43, 0.0  ;;  %v1089_v53 = vadd.f32 %v6774_v48, %v8242_v24  ;;  %v1080_v54 = vpop.f32.mrb[31].mxu1 }
 0x318   : > { %v1168_v55 = vmax.f32 %v1078_v47, 0.0  ;;  %v1081_v56 = vadd.f32 %v8242_v24, %v1080_v54  ;;  %2024 = vmatpush1.bf16.msra.mxu0 %v6292_v40  ;;  %2216 = vmatprep.subr.bf16.mxu1 %v6295_v41 }
 0x319   : > { %v1171_v59 = vmax.f32 %v1089_v53, 0.0  ;;  %2025 = vmatprep.subr.bf16.mxu0 %v6301_v45  ;;  %2217 = vmatpush1.bf16.msra.mxu1 %v6294_v46 }
 0x31a   : > { %v1169_v0 = vmax.f32 %v1081_v56, 0.0  ;;  %2218 = vmatprep.subr.bf16.mxu1 %v6303_v51 }
 0x31b   : > { %v8284_v4 = vpack.c.bf16 %v1171_v59, %v1170_v52 }
 0x31c   : > { %v8286_v7 = vpack.c.bf16 %v1169_v0, %v1168_v55  ;;  %v6777_v8 = vpop.f32.mrb[32].mxu1  ;;  %2026 = vmatpush1.bf16.msra.mxu0 %v6300_v58 }
 0x31d   : > { %v1102_v11 = vadd.f32 %v6777_v8, %v8242_v24  ;;  %v1093_v12 = vpop.f32.mrb[33].mxu1  ;;  %2027 = vmatprep.subr.bf16.mxu0 %v6309_v60  ;;  %2219 = vmatpush1.bf16.msra.mxu1 %v6302_v61 }
 0x31e   : > { %1692 = vmatmul.mubr.bf16.gmra.mrb[28].mxu0 %v8260_v3  ;;  %1885 = vmatmul.mubr.bf16.gmra.mrb[60].mxu1 %v8260_v3  ;;  %v1094_v16 = vadd.f32 %v8242_v24, %v1093_v12  ;;  %v6778_v17 = vpop.f32.mrb[34].mxu1 }
 0x31f   : > { %1701 = vmatprep.mubr.bf16.mxu0 %v7810_v15  ;;  %1894 = vmatprep.mubr.bf16.mxu1 %v7810_v15  ;;  %v1174_v19 = vmax.f32 %v1102_v11, 0.0  ;;  %v1105_v20 = vadd.f32 %v6778_v17, %v8242_v24  ;;  %v1096_v21 = vpop.f32.mrb[35].mxu1 }
 0x320   : > { %v1172_v22 = vmax.f32 %v1094_v16, 0.0  ;;  %v1097_v23 = vadd.f32 %v8242_v24, %v1096_v21  ;;  %2028 = vmatpush1.bf16.msra.mxu0 %v6308_v9  ;;  %2220 = vmatprep.subr.bf16.mxu1 %v6311_v10  ;;  %v6980_v21 = vld [vmem:[#allocation11 + $0x44] ss:$16 sps:$4 sm:$0xff]  }
 0x321   : > { %v1175_v26 = vmax.f32 %v1105_v20, 0.0  ;;  %2029 = vmatprep.subr.bf16.mxu0 %v6317_v13  ;;  %2221 = vmatpush1.bf16.msra.mxu1 %v6310_v14  ;;  %v6975_v20 = vld [vmem:[#allocation11 + $0x20] ss:$16 sps:$4 sm:$0xff]  }
 0x322   : > { %v1173_v28 = vmax.f32 %v1097_v23, 0.0  ;;  %2222 = vmatprep.subr.bf16.mxu1 %v6319_v18  ;;  %v6972_v18 = vld [vmem:[#allocation11] ss:$16 sps:$4 sm:$0xff]   ;;  %v6983_v23 = vld [vmem:[#allocation11 + $0x64] ss:$16 sps:$4 sm:$0xff]  }
 0x323   : > { %v8296_v29 = vpack.c.bf16 %v1175_v26, %v1174_v19  ;;  %v6977_v19 = vld [vmem:[#allocation11 + $0x24] ss:$16 sps:$4 sm:$0xff]   ;;  %v6984_v26 = vld [vmem:[#allocation11 + $0x80] ss:$16 sps:$4 sm:$0xff]  }
 0x324   : > { %v8298_v30 = vpack.c.bf16 %v1173_v28, %v1172_v22  ;;  %v6781_v32 = vpop.f32.mrb[36].mxu1  ;;  %2030 = vmatpush1.bf16.msra.mxu0 %v6316_v25  ;;  %v6978_v22 = vld [vmem:[#allocation11 + $0x40] ss:$16 sps:$4 sm:$0xff]   ;;  %v6986_v25 = vld [vmem:[#allocation11 + $0x84] ss:$16 sps:$4 sm:$0xff]  }
 0x325   : > { %v1118_v33 = vadd.f32 %v6781_v32, %v8242_v24  ;;  %v1109_v35 = vpop.f32.mrb[37].mxu1  ;;  %2223 = vmatpush1.bf16.msra.mxu1 %v6318_v27  ;;  %v6987_v27 = vld [vmem:[#allocation11 + $0xa0] ss:$16 sps:$4 sm:$0xff]   ;;  %v6995_v28 = vld [vmem:[#allocation11 + $0xe4] ss:$16 sps:$4 sm:$0xff]  }
 0x326   : > { %1702 = vmatmul.mubr.bf16.gmra.mrb[32].mxu0 %v8274_v31  ;;  %1895 = vmatmul.mubr.bf16.gmra.mrb[64].mxu1 %v8274_v31  ;;  %v1110_v38 = vadd.f32 %v8242_v24, %v1109_v35  ;;  %v6782_v39 = vpop.f32.mrb[38].mxu1  ;;  %v6993_v32 = vld [vmem:[#allocation11 + $0xe0] ss:$16 sps:$4 sm:$0xff]   ;;  %v7004_v35 = vld [vmem:[#allocation11 + $0x2c] ss:$16 sps:$4 sm:$0xff]  }
 0x327   : > { %1711 = vmatprep.mubr.bf16.mxu0 %v7810_v15  ;;  %1904 = vmatprep.mubr.bf16.mxu1 %v7810_v15  ;;  %v1178_v34 = vmax.f32 %v1118_v33, 0.0  ;;  %v1121_v40 = vadd.f32 %v6782_v39, %v8242_v24  ;;  %v1112_v41 = vpop.f32.mrb[39].mxu1  ;;  %v6998_v33 = vld [vmem:[#allocation11 + $0xc] ss:$16 sps:$4 sm:$0xff]   ;;  %v7008_v39 = vld [vmem:[#allocation11 + $0x48] ss:$16 sps:$4 sm:$0xff]  }
 0x328   : > { %v1176_v43 = vmax.f32 %v1110_v38, 0.0  ;;  %v1113_v44 = vadd.f32 %v8242_v24, %v1112_v41  ;;  %5135 = vmatprep.subr.bf16.mxu1 %v6998_v33  ;;  %v7010_v38 = vld [vmem:[#allocation11 + $0x4c] ss:$16 sps:$4 sm:$0xff]   ;;  %v7007_v41 = vld [vmem:[#allocation11 + $0x124] ss:$16 sps:$4 sm:$0xff]  }
 0x329   : > { %v1179_v45 = vmax.f32 %v1121_v40, 0.0  ;;  %v7001_v40 = vld [vmem:[#allocation11 + $0x104] ss:$16 sps:$4 sm:$0xff]  }
 0x32a   : > { %v1177_v46 = vmax.f32 %v1113_v44, 0.0  ;;  %v7019_v44 = vld [vmem:[#allocation11 + $0x8c] ss:$16 sps:$4 sm:$0xff]  }
 0x32b   : > { %v8308_v47 = vpack.c.bf16 %v1179_v45, %v1178_v34  ;;  %v7013_v34 = vld [vmem:[#allocation11 + $0x6c] ss:$16 sps:$4 sm:$0xff]   ;;  %v7005_v45 = vld [vmem:[#allocation11 + $0x120] ss:$16 sps:$4 sm:$0xff]  }
 0x32c   : > { %v8310_v48 = vpack.c.bf16 %v1177_v46, %v1176_v43  ;;  %v6785_v49 = vpop.f32.mrb[40].mxu1  ;;  %v7011_v43 = vld [vmem:[#allocation11 + $0x68] ss:$16 sps:$4 sm:$0xff]  }
 0x32d   : > { %v1134_v50 = vadd.f32 %v6785_v49, %v8242_v24  ;;  %v1125_v51 = vpop.f32.mrb[41].mxu1  ;;  %v7017_v46 = vld [vmem:[#allocation11 + $0x88] ss:$16 sps:$4 sm:$0xff]  }
 0x32e   : > { %1712 = vmatmul.mubr.bf16.gmra.mrb[36].mxu0 %v8272_v36  ;;  %1905 = vmatmul.mubr.bf16.gmra.mrb[68].mxu1 %v8272_v36  ;;  %v1126_v52 = vadd.f32 %v8242_v24, %v1125_v51  ;;  %v6786_v53 = vpop.f32.mrb[42].mxu1  ;;  %v7020_v49 = vld [vmem:[#allocation11 + $0xa8] ss:$16 sps:$4 sm:$0xff]   ;;  %v7028_v51 = vld [vmem:[#allocation11 + $0xcc] ss:$16 sps:$4 sm:$0xff]  }
 0x32f   : > { %1721 = vmatprep.mubr.bf16.mxu0 %v7810_v15  ;;  %1914 = vmatprep.mubr.bf16.mxu1 %v7810_v15  ;;  %v1182_v54 = vmax.f32 %v1134_v50, 0.0  ;;  %v1137_v55 = vadd.f32 %v6786_v53, %v8242_v24  ;;  %v1128_v56 = vpop.f32.mrb[43].mxu1  ;;  %v1269_v50 = vlaneseq }
 0x330   : > { %v1180_v58 = vmax.f32 %v1126_v52, 0.0  ;;  %v1129_v59 = vadd.f32 %v8242_v24, %v1128_v56  ;;  %v7026_v52 = vld [vmem:[#allocation11 + $0xc8] ss:$16 sps:$4 sm:$0xff]  }
 0x331   : > { %v1183_v60 = vmax.f32 %v1137_v55, 0.0  ;;  %v8410_v53 = vshrl.u32 %v1269_v50, 7  ;;  %v7025_v55 = vld [vmem:[#allocation11 + $0x164] ss:$16 sps:$4 sm:$0xff]   ;;  %v7029_v56 = vld [vmem:[#allocation11 + $0xe8] ss:$16 sps:$4 sm:$0xff]  }
 0x332   : > { %v1181_v61 = vmax.f32 %v1129_v59, 0.0 }
 0x333   : > { %v8320_v62 = vpack.c.bf16 %v1183_v60, %v1182_v54  ;;  %9500 = vst [vmem:[#allocation22_spill] sm:$0xff] %v8410_v53  ;;  %v7016_v54 = vld [vmem:[#allocation11 + $0x144] ss:$16 sps:$4 sm:$0xff]   ;;  %v8415_v59 = vsub.s32 0, %v8410_v53  ;;  %v9469_v60 = vsub.s32 2, %v8410_v53 }
 0x334   : > { %v8322_v63 = vpack.c.bf16 %v1181_v61, %v1180_v58  ;;  %v6789_v0 = vpop.f32.mrb[44].mxu1  ;;  %v7031_v58 = vld [vmem:[#allocation11 + $0xec] ss:$16 sps:$4 sm:$0xff]   ;;  %v8422_v61 = vsub.s32 1, %v8410_v53 }
 0x335   : > { %v1150_v1 = vadd.f32 %v6789_v0, %v8242_v24  ;;  %v1141_v2 = vpop.f32.mrb[45].mxu1  ;;  %9501 = vst [vmem:[#allocation23_spill] sm:$0xff] %v8415_v59  ;;  %v9470_v0 = vsub.s32 3, %v8410_v53 }
 0x336   : > { %1722 = vmatmul.mubr.bf16.gmra.mrb[40].mxu0 %v8286_v7  ;;  %1915 = vmatmul.mubr.bf16.gmra.mrb[72].mxu1 %v8286_v7  ;;  %v1142_v57 = vadd.f32 %v8242_v24, %v1141_v2  ;;  %v6790_v6 = vpop.f32.mrb[46].mxu1  ;;  %9502 = vst [vmem:[#allocation24_spill] sm:$0xff] %v8422_v61  ;;  %v7037_v2 = vld [vmem:[#allocation11 + $0x10c] ss:$16 sps:$4 sm:$0xff]  }
 0x337   : > { %1731 = vmatprep.mubr.bf16.mxu0 %v7810_v15  ;;  %1924 = vmatprep.mubr.bf16.mxu1 %v7810_v15  ;;  %v1186_v8 = vmax.f32 %v1150_v1, 0.0  ;;  %v1153_v9 = vadd.f32 %v6790_v6, %v8242_v24  ;;  %v1144_v10 = vpop.f32.mrb[47].mxu1  ;;  %v7023_v1 = vld [vmem:[#allocation11 + $0x160] ss:$16 sps:$4 sm:$0xff]  }
 0x338   : > { %v1184_v11 = vmax.f32 %v1142_v57, 0.0  ;;  %v1145_v12 = vadd.f32 %v8242_v24, %v1144_v10  ;;  %v6974_v24 = vld [vmem:[#allocation11 + $0x4] ss:$16 sps:$4 sm:$0xff]   ;;  %v7035_v57 = vld [vmem:[#allocation11 + $0x108] ss:$16 sps:$4 sm:$0xff]  }
 0x339   : > { %v1187_v13 = vmax.f32 %v1153_v9, 0.0  ;;  %4971 = vmatprep.subr.bf16.mxu0 %v6974_v24 }
 0x33a   : > { %v1185_v14 = vmax.f32 %v1145_v12, 0.0 }
 0x33b   : > { %v8332_v16 = vpack.c.bf16 %v1187_v13, %v1186_v8  ;;  %v7038_v13 = vld [vmem:[#allocation11 + $0x128] ss:$16 sps:$4 sm:$0xff]  }
 0x33c   : > { %v8334_v17 = vpack.c.bf16 %v1185_v14, %v1184_v11 }
 0x33e   : > { %1732 = vmatmul.mubr.bf16.gmra.mrb[44].mxu0 %v8284_v4  ;;  %1925 = vmatmul.mubr.bf16.gmra.mrb[76].mxu1 %v8284_v4 }
 0x33f   : > { %1741 = vmatprep.mubr.bf16.mxu0 %v7810_v15  ;;  %1934 = vmatprep.mubr.bf16.mxu1 %v7810_v15 }
 0x346   : > { %1742 = vmatmul.mubr.bf16.gmra.mrb[48].mxu0 %v8298_v30  ;;  %1935 = vmatmul.mubr.bf16.gmra.mrb[80].mxu1 %v8298_v30 }
 0x347   : > { %1751 = vmatprep.mubr.bf16.mxu0 %v7810_v15  ;;  %1944 = vmatprep.mubr.bf16.mxu1 %v7810_v15 }
 0x34e   : > { %1752 = vmatmul.mubr.bf16.gmra.mrb[52].mxu0 %v8296_v29  ;;  %1945 = vmatmul.mubr.bf16.gmra.mrb[84].mxu1 %v8296_v29 }
 0x34f   : > { %1761 = vmatprep.mubr.bf16.mxu0 %v7810_v15  ;;  %1954 = vmatprep.mubr.bf16.mxu1 %v7810_v15 }
 0x356   : > { %1762 = vmatmul.mubr.bf16.gmra.mrb[56].mxu0 %v8310_v48  ;;  %1955 = vmatmul.mubr.bf16.gmra.mrb[88].mxu1 %v8310_v48 }
 0x357   : > { %1771 = vmatprep.mubr.bf16.mxu0 %v7810_v15  ;;  %1964 = vmatprep.mubr.bf16.mxu1 %v7810_v15 }
 0x35e   : > { %1772 = vmatmul.mubr.bf16.gmra.mrb[60].mxu0 %v8308_v47  ;;  %1965 = vmatmul.mubr.bf16.gmra.mrb[92].mxu1 %v8308_v47 }
 0x35f   : > { %1781 = vmatprep.mubr.bf16.mxu0 %v7810_v15  ;;  %1974 = vmatprep.mubr.bf16.mxu1 %v7810_v15 }
 0x366   : > { %1782 = vmatmul.mubr.bf16.gmra.mrb[64].mxu0 %v8322_v63  ;;  %1975 = vmatmul.mubr.bf16.gmra.mrb[96].mxu1 %v8322_v63 }
 0x367   : > { %1791 = vmatprep.mubr.bf16.mxu0 %v7810_v15  ;;  %1984 = vmatprep.mubr.bf16.mxu1 %v7810_v15 }
 0x36e   : > { %1792 = vmatmul.mubr.bf16.gmra.mrb[68].mxu0 %v8320_v62  ;;  %1985 = vmatmul.mubr.bf16.gmra.mrb[100].mxu1 %v8320_v62 }
 0x36f   : > { %1801 = vmatprep.mubr.bf16.mxu0 %v7810_v15  ;;  %1994 = vmatprep.mubr.bf16.mxu1 %v7810_v15 }
 0x376   : > { %1802 = vmatmul.mubr.bf16.gmra.mrb[72].mxu0 %v8334_v17  ;;  %1995 = vmatmul.mubr.bf16.gmra.mrb[104].mxu1 %v8334_v17 }
 0x377   : > { %1811 = vmatprep.mubr.bf16.mxu0 %v7810_v15  ;;  %2004 = vmatprep.mubr.bf16.mxu1 %v7810_v15 }
 0x37e   : > { %1812 = vmatmul.mubr.bf16.gmra.mrb[76].mxu0 %v8332_v16  ;;  %2005 = vmatmul.mubr.bf16.gmra.mrb[108].mxu1 %v8332_v16 }
 0x37f   : > { %2047 = vmatprep.mubr.bf16.mxu0 %v7810_v15  ;;  %2240 = vmatprep.mubr.bf16.mxu1 %v7810_v15 }
 0x386   : > { %2048 = vmatmul.mubr.bf16.vlgmr.msra.gmra.mrb[80].mxu0 %v8250_v42  ;;  %2241 = vmatmul.mubr.bf16.vlgmr.msra.gmra.mrb[112].mxu1 %v8250_v42  ;;  %v6981_v42 = vld [vmem:[#allocation11 + $0x60] ss:$16 sps:$4 sm:$0xff]  }
 0x387   : > { %2057 = vmatprep.mubr.bf16.mxu0 %v7810_v15  ;;  %2250 = vmatprep.mubr.bf16.mxu1 %v7810_v15 }
 0x388   : > { %4972 = vmatpush1.bf16.msra.mxu0 %v6972_v18 }
 0x389   : > { %4973 = vmatprep.subr.bf16.mxu0 %v6977_v19 }
 0x38c   : > { %4974 = vmatpush1.bf16.msra.mxu0 %v6975_v20 }
 0x38d   : > { %4975 = vmatprep.subr.bf16.mxu0 %v6980_v21 }
 0x38e   : > { %2058 = vmatmul.mubr.bf16.gmra.mrb[84].mxu0 %v8248_v37  ;;  %2251 = vmatmul.mubr.bf16.gmra.mrb[116].mxu1 %v8248_v37  ;;  %v6989_v37 = vld [vmem:[#allocation11 + $0xa4] ss:$16 sps:$4 sm:$0xff]  }
 0x38f   : > { %2067 = vmatprep.mubr.bf16.mxu0 %v7810_v15  ;;  %2260 = vmatprep.mubr.bf16.mxu1 %v7810_v15 }
 0x390   : > { %4976 = vmatpush1.bf16.msra.mxu0 %v6978_v22 }
 0x391   : > { %4977 = vmatprep.subr.bf16.mxu0 %v6983_v23 }
 0x394   : > { %4978 = vmatpush1.bf16.msra.mxu0 %v6981_v42 }
 0x395   : > { %4979 = vmatprep.subr.bf16.mxu0 %v6986_v25 }
 0x396   : > { %2068 = vmatmul.mubr.bf16.gmra.mrb[88].mxu0 %v8262_v5  ;;  %2261 = vmatmul.mubr.bf16.gmra.mrb[120].mxu1 %v8262_v5  ;;  %v6990_v5 = vld [vmem:[#allocation11 + $0xc0] ss:$16 sps:$4 sm:$0xff]  }
 0x397   : > { %2077 = vmatprep.mubr.bf16.mxu0 %v7810_v15  ;;  %2270 = vmatprep.mubr.bf16.mxu1 %v7810_v15 }
 0x398   : > { %4980 = vmatpush1.bf16.msra.mxu0 %v6984_v26 }
 0x399   : > { %4981 = vmatprep.subr.bf16.mxu0 %v6989_v37 }
 0x39c   : > { %4982 = vmatpush1.bf16.msra.mxu0 %v6987_v27  ;;  %v7046_v27 = vld [vmem:[#allocation11 + $0x14c] ss:$16 sps:$4 sm:$0xff]  }
 0x39e   : > { %2078 = vmatmul.mubr.bf16.gmra.mrb[92].mxu0 %v8260_v3  ;;  %2271 = vmatmul.mubr.bf16.gmra.mrb[124].mxu1 %v8260_v3  ;;  %v6992_v3 = vld [vmem:[#allocation11 + $0xc4] ss:$16 sps:$4 sm:$0xff]  }
 0x39f   : > { %2087 = vmatprep.mubr.bf16.mxu0 %v7810_v15  ;;  %2280 = vmatprep.mubr.bf16.mxu1 %v7810_v15 }
 0x3a0   : > { %4983 = vmatprep.subr.bf16.mxu0 %v6992_v3 }
 0x3a1   : > { %4984 = vmatpush1.bf16.msra.mxu0 %v6990_v5 }
 0x3a2   : > { %4985 = vmatprep.subr.bf16.mxu0 %v6995_v28  ;;  %v7044_v28 = vld [vmem:[#allocation11 + $0x148] ss:$16 sps:$4 sm:$0xff]  }
 0x3a5   : > { %4986 = vmatpush1.bf16.msra.mxu0 %v6993_v32 }
 0x3a6   : > { %2088 = vmatmul.mubr.bf16.gmra.mrb[96].mxu0 %v8274_v31  ;;  %2281 = vmatmul.mubr.bf16.gmra.mrb[128].mxu1 %v8274_v31  ;;  %v6996_v31 = vld [vmem:[#allocation11 + $0x8] ss:$16 sps:$4 sm:$0xff]  }
 0x3a7   : > { %2097 = vmatprep.mubr.bf16.mxu0 %v7810_v15  ;;  %2290 = vmatprep.mubr.bf16.mxu1 %v7810_v15 }
 0x3a8   : > { %5136 = vmatpush1.bf16.msra.mxu1 %v6996_v31  ;;  %4987 = vmatprep.subr.bf16.mxu0 %v7001_v40 }
 0x3a9   : > { %5137 = vmatprep.subr.bf16.mxu1 %v7004_v35 }
 0x3ae   : > { %2098 = vmatmul.mubr.bf16.gmra.mrb[100].mxu0 %v8272_v36  ;;  %2291 = vmatmul.mubr.bf16.gmra.mrb[132].mxu1 %v8272_v36  ;;  %v7002_v36 = vld [vmem:[#allocation11 + $0x28] ss:$16 sps:$4 sm:$0xff]  }
 0x3af   : > { %2107 = vmatprep.mubr.bf16.mxu0 %v7810_v15  ;;  %2300 = vmatprep.mubr.bf16.mxu1 %v7810_v15 }
 0x3b0   : > { %5138 = vmatpush1.bf16.msra.mxu1 %v7002_v36 }
 0x3b1   : > { %5139 = vmatprep.subr.bf16.mxu1 %v7010_v38 }
 0x3b4   : > { %5140 = vmatpush1.bf16.msra.mxu1 %v7008_v39 }
 0x3b5   : > { %5141 = vmatprep.subr.bf16.mxu1 %v7013_v34 }
 0x3b6   : > { %2108 = vmatmul.mubr.bf16.gmra.mrb[104].mxu0 %v8286_v7  ;;  %2301 = vmatmul.mubr.bf16.gmra.mrb[136].mxu1 %v8286_v7  ;;  %v6999_v7 = vld [vmem:[#allocation11 + $0x100] ss:$16 sps:$4 sm:$0xff]  }
 0x3b7   : > { %2117 = vmatprep.mubr.bf16.mxu0 %v7810_v15  ;;  %2310 = vmatprep.mubr.bf16.mxu1 %v7810_v15 }
 0x3b8   : > { %4988 = vmatpush1.bf16.msra.mxu0 %v6999_v7  ;;  %5142 = vmatpush1.bf16.msra.mxu1 %v7011_v43 }
 0x3b9   : > { %4989 = vmatprep.subr.bf16.mxu0 %v7007_v41  ;;  %5143 = vmatprep.subr.bf16.mxu1 %v7019_v44 }
 0x3bc   : > { %4990 = vmatpush1.bf16.msra.mxu0 %v7005_v45  ;;  %5144 = vmatpush1.bf16.msra.mxu1 %v7017_v46  ;;  %v7049_v46 = vld [vmem:[#allocation11 + $0x16c] ss:$16 sps:$4 sm:$0xff]  }
 0x3bd   : > { %4991 = vmatprep.subr.bf16.mxu0 %v7016_v54 }
 0x3be   : > { %2118 = vmatmul.mubr.bf16.gmra.mrb[108].mxu0 %v8284_v4  ;;  %2311 = vmatmul.mubr.bf16.gmra.mrb[140].mxu1 %v8284_v4  ;;  %v7022_v4 = vld [vmem:[#allocation11 + $0xac] ss:$16 sps:$4 sm:$0xff]  }
 0x3bf   : > { %2127 = vmatprep.mubr.bf16.mxu0 %v7810_v15  ;;  %2320 = vmatprep.mubr.bf16.mxu1 %v7810_v15 }
 0x3c0   : > { %5145 = vmatprep.subr.bf16.mxu1 %v7022_v4 }
 0x3c1   : > { %5146 = vmatpush1.bf16.msra.mxu1 %v7020_v49 }
 0x3c2   : > { %5147 = vmatprep.subr.bf16.mxu1 %v7028_v51  ;;  %v7032_v51 = vld [vmem:[#allocation11 + $0x180] ss:$16 sps:$4 sm:$0xff]  }
 0x3c5   : > { %5148 = vmatpush1.bf16.msra.mxu1 %v7026_v52  ;;  %v7034_v52 = vld [vmem:[#allocation11 + $0x184] ss:$16 sps:$4 sm:$0xff]  }
 0x3c6   : > { %2128 = vmatmul.mubr.bf16.gmra.mrb[112].mxu0 %v8298_v30  ;;  %2321 = vmatmul.mubr.bf16.gmra.mrb[144].mxu1 %v8298_v30  ;;  %v7014_v30 = vld [vmem:[#allocation11 + $0x140] ss:$16 sps:$4 sm:$0xff]  }
 0x3c7   : > { %2137 = vmatprep.mubr.bf16.mxu0 %v7810_v15  ;;  %2330 = vmatprep.mubr.bf16.mxu1 %v7810_v15 }
 0x3c8   : > { %4992 = vmatpush1.bf16.msra.mxu0 %v7014_v30  ;;  %5149 = vmatprep.subr.bf16.mxu1 %v7031_v58  ;;  %v7043_v58 = vld [vmem:[#allocation11 + $0x1a4] ss:$16 sps:$4 sm:$0xff]  }
 0x3c9   : > { %4993 = vmatprep.subr.bf16.mxu0 %v7025_v55  ;;  %5150 = vmatpush1.bf16.msra.mxu1 %v7029_v56 }
 0x3ca   : > { %5151 = vmatprep.subr.bf16.mxu1 %v7037_v2 }
 0x3cc   : > { %4994 = vmatpush1.bf16.msra.mxu0 %v7023_v1 }
 0x3cd   : > { %5152 = vmatpush1.bf16.msra.mxu1 %v7035_v57  ;;  %4995 = vmatprep.subr.bf16.mxu0 %v7034_v52 }
 0x3ce   : > { %2138 = vmatmul.mubr.bf16.gmra.mrb[116].mxu0 %v8296_v29  ;;  %2331 = vmatmul.mubr.bf16.gmra.mrb[148].mxu1 %v8296_v29  ;;  %v635_v29 = vld [vmem:[%s9455_s7 + $0x2] sm:$0xff] }
 0x3cf   : > { %2147 = vmatprep.mubr.bf16.mxu0 %v7810_v15  ;;  %2340 = vmatprep.mubr.bf16.mxu1 %v7810_v15  ;;  %v8428_v6 = vrot.slane %v635_v29, %v8415_v59  ;;  %v8432_v8 = vrot.slane %v635_v29, %v9469_v60  ;;  %v8435_v9 = vrot.slane %v635_v29, %v8422_v61 }
 0x3d0   : > { %v8439_v10 = vrot.slane %v635_v29, %v9470_v0  ;;  %4996 = vmatpush1.bf16.msra.mxu0 %v7032_v51 }
 0x3d1   : > { %4997 = vmatprep.subr.bf16.mxu0 %v7043_v58 }
 0x3d6   : > { %2148 = vmatmul.mubr.bf16.gmra.mrb[120].mxu0 %v8310_v48  ;;  %2341 = vmatmul.mubr.bf16.gmra.mrb[152].mxu1 %v8310_v48  ;;  %v7040_v48 = vld [vmem:[#allocation11 + $0x12c] ss:$16 sps:$4 sm:$0xff]  }
 0x3d7   : > { %2157 = vmatprep.mubr.bf16.mxu0 %v7810_v15  ;;  %2350 = vmatprep.mubr.bf16.mxu1 %v7810_v15 }
 0x3d8   : > { %5153 = vmatprep.subr.bf16.mxu1 %v7040_v48 }
 0x3d9   : > { %v1663_v11 = vpop.f32.mrb[16].mxu0  ;;  %v1856_v12 = vpop.f32.mrb[48].mxu1  ;;  %5154 = vmatpush1.bf16.msra.mxu1 %v7038_v13 }
 0x3da   : > { %v1664_v14 = vadd.f32 %v1663_v11, %v8428_v6  ;;  %v1857_v24 = vadd.f32 %v1856_v12, %v8432_v8  ;;  %v1665_v18 = vpop.f32.mrb[17].mxu0  ;;  %v1858_v19 = vpop.f32.mrb[49].mxu1  ;;  %5155 = vmatprep.subr.bf16.mxu1 %v7046_v27  ;;  %v7047_v12 = vld [vmem:[#allocation11 + $0x168] ss:$16 sps:$4 sm:$0xff]  }
 0x3db   : > { %v1666_v20 = vadd.f32 %v1665_v18, %v8435_v9  ;;  %v1859_v21 = vadd.f32 %v1858_v19, %v8439_v10  ;;  %v1667_v22 = vpop.f32.mrb[18].mxu0  ;;  %v1860_v23 = vpop.f32.mrb[50].mxu1  ;;  %v7041_v19 = vld [vmem:[#allocation11 + $0x1a0] ss:$16 sps:$4 sm:$0xff]  }
 0x3dc   : > { %v1668_v42 = vadd.f32 %v1667_v22, %v8428_v6  ;;  %v1861_v25 = vadd.f32 %v1860_v23, %v8432_v8  ;;  %v1669_v26 = vpop.f32.mrb[19].mxu0  ;;  %v1862_v37 = vpop.f32.mrb[51].mxu1  ;;  %v2401_v32 = vmax.f32 %v1664_v14, 0.0  ;;  %v2403_v33 = vmax.f32 %v1857_v24, 0.0  ;;  %4998 = vmatpush1.bf16.msra.mxu0 %v7041_v19  ;;  %v7050_v19 = vld [vmem:[#allocation11 + $0x1c0] ss:$16 sps:$4 sm:$0xff]  }
 0x3dd   : > { %v1670_v5 = vadd.f32 %v1669_v26, %v8435_v9  ;;  %v1863_v3 = vadd.f32 %v1862_v37, %v8439_v10  ;;  %v2402_v36 = vmax.f32 %v1666_v20, 0.0  ;;  %v2404_v38 = vmax.f32 %v1859_v21, 0.0  ;;  %5156 = vmatpush1.bf16.msra.mxu1 %v7044_v28  ;;  %v7055_v20 = vld [vmem:[#allocation11 + $0x18c] ss:$16 sps:$4 sm:$0xff]  }
 0x3de   : > { %v2409_v31 = vmax.f32 %v1668_v42, 0.0  ;;  %v2411_v35 = vmax.f32 %v1861_v25, 0.0  ;;  %2158 = vmatmul.mubr.bf16.gmra.mrb[124].mxu0 %v8308_v47  ;;  %2351 = vmatmul.mubr.bf16.gmra.mrb[156].mxu1 %v8308_v47  ;;  %v1287_v28 = vsub.s32 4, %v8410_v53 }
 0x3df   : > { %v2410_v39 = vmax.f32 %v1670_v5, 0.0  ;;  %v2412_v34 = vmax.f32 %v1863_v3, 0.0  ;;  %2167 = vmatprep.mubr.bf16.mxu0 %v7810_v15  ;;  %2360 = vmatprep.mubr.bf16.mxu1 %v7810_v15 }
 0x3e0   : > { %v2665_v7 = vmax.f32 %v2401_v32, %v2409_v31  ;;  %v2683_v40 = vmax.f32 %v2403_v33, %v2411_v35  ;;  %5157 = vmatprep.subr.bf16.mxu1 %v7049_v46  ;;  %v1295_v32 = vsub.s32 6, %v8410_v53  ;;  %v7053_v33 = vld [vmem:[#allocation11 + $0x188] ss:$16 sps:$4 sm:$0xff]  }
 0x3e1   : > { %v2674_v41 = vmax.f32 %v2402_v36, %v2410_v39  ;;  %v2692_v43 = vmax.f32 %v2404_v38, %v2412_v34  ;;  %v1673_v44 = vpop.f32.mrb[20].mxu0  ;;  %v1866_v45 = vpop.f32.mrb[52].mxu1  ;;  %5158 = vmatpush1.bf16.msra.mxu1 %v7047_v12  ;;  %v7058_v34 = vld [vmem:[#allocation11 + $0x1ac] ss:$16 sps:$4 sm:$0xff]  }
 0x3e2   : > { %v1674_v4 = vadd.f32 %v1673_v44, %v8428_v6  ;;  %v1867_v47 = vadd.f32 %v1866_v45, %v8432_v8  ;;  %v1675_v49 = vpop.f32.mrb[21].mxu0  ;;  %v1868_v50 = vpop.f32.mrb[53].mxu1  ;;  %5159 = vmatprep.subr.bf16.mxu1 %v7055_v20  ;;  %v7064_v12 = vld [vmem:[#allocation11 + $0x1cc] ss:$16 sps:$4 sm:$0xff]  }
 0x3e3   : > { %v1676_v30 = vadd.f32 %v1675_v49, %v8435_v9  ;;  %v1869_v54 = vadd.f32 %v1868_v50, %v8439_v10  ;;  %v1677_v55 = vpop.f32.mrb[22].mxu0  ;;  %v1870_v56 = vpop.f32.mrb[54].mxu1 }
 0x3e4   : > { %v2417_v29 = vmax.f32 %v1674_v4, 0.0  ;;  %v2419_v1 = vmax.f32 %v1867_v47, 0.0  ;;  %v1678_v2 = vadd.f32 %v1677_v55, %v8428_v6  ;;  %v1871_v57 = vadd.f32 %v1870_v56, %v8432_v8  ;;  %v1679_v48 = vpop.f32.mrb[23].mxu0  ;;  %v1872_v11 = vpop.f32.mrb[55].mxu1 }
 0x3e5   : > { %v2418_v13 = vmax.f32 %v1676_v30, 0.0  ;;  %v2420_v14 = vmax.f32 %v1869_v54, 0.0  ;;  %v1680_v24 = vadd.f32 %v1679_v48, %v8435_v9  ;;  %v1873_v18 = vadd.f32 %v1872_v11, %v8439_v10  ;;  %5160 = vmatpush1.bf16.msra.mxu1 %v7053_v33  ;;  %v7052_v11 = vld [vmem:[#allocation11 + $0x1c4] ss:$16 sps:$4 sm:$0xff]  }
 0x3e6   : > { %v2666_v21 = vmax.f32 %v2665_v7, %v2417_v29  ;;  %v2684_v22 = vmax.f32 %v2683_v40, %v2419_v1  ;;  %v2425_v23 = vmax.f32 %v1678_v2, 0.0  ;;  %v2427_v42 = vmax.f32 %v1871_v57, 0.0  ;;  %2168 = vmatmul.mubr.bf16.gmra.mrb[128].mxu0 %v8322_v63  ;;  %2361 = vmatmul.mubr.bf16.gmra.mrb[160].mxu1 %v8322_v63  ;;  %v7056_v29 = vld [vmem:[#allocation11 + $0x1a8] ss:$16 sps:$4 sm:$0xff]  }
 0x3e7   : > { %v2675_v25 = vmax.f32 %v2674_v41, %v2418_v13  ;;  %v2693_v26 = vmax.f32 %v2692_v43, %v2420_v14  ;;  %v2426_v37 = vmax.f32 %v1680_v24, 0.0  ;;  %v2428_v27 = vmax.f32 %v1873_v18, 0.0  ;;  %2177 = vmatprep.mubr.bf16.mxu0 %v7810_v15  ;;  %2370 = vmatprep.mubr.bf16.mxu1 %v7810_v15 }
 0x3e8   : > { %v2667_v5 = vmax.f32 %v2666_v21, %v2425_v23  ;;  %v2685_v3 = vmax.f32 %v2684_v22, %v2427_v42  ;;  %5161 = vmatprep.subr.bf16.mxu1 %v7058_v34  ;;  %4999 = vmatprep.subr.bf16.mxu0 %v7052_v11 }
 0x3e9   : > { %v2676_v31 = vmax.f32 %v2675_v25, %v2426_v37  ;;  %v2694_v35 = vmax.f32 %v2693_v26, %v2428_v27  ;;  %v1683_v63 = vpop.f32.mrb[24].mxu0  ;;  %v1876_v36 = vpop.f32.mrb[56].mxu1  ;;  %5162 = vmatpush1.bf16.msra.mxu1 %v7056_v29  ;;  %v7062_v27 = vld [vmem:[#allocation11 + $0x1c8] ss:$16 sps:$4 sm:$0xff]   ;;  %5000 = vmatpush1.bf16.msra.mxu0 %v7050_v19 }
 0x3ea   : > { %v2668_v7 = vrot.slane %v2667_v5, 4  ;;  %v2686_v40 = vrot.slane %v2685_v3, 4  ;;  %v1684_v41 = vadd.f32 %v1683_v63, %v8428_v6  ;;  %v1877_v43 = vadd.f32 %v1876_v36, %v8432_v8  ;;  %v1685_v44 = vpop.f32.mrb[25].mxu0  ;;  %v1878_v45 = vpop.f32.mrb[57].mxu1  ;;  %v7061_v63 = vld [vmem:[#allocation11 + $0x1e4] ss:$16 sps:$4 sm:$0xff]   ;;  %5163 = vmatprep.subr.bf16.mxu1 %v7064_v12 }
 0x3eb   : > { %v2677_v46 = vrot.slane %v2676_v31, 4  ;;  %v2695_v4 = vrot.slane %v2694_v35, 4  ;;  %v1686_v47 = vadd.f32 %v1685_v44, %v8435_v9  ;;  %v1879_v49 = vadd.f32 %v1878_v45, %v8439_v10  ;;  %v1687_v50 = vpop.f32.mrb[26].mxu0  ;;  %v1880_v51 = vpop.f32.mrb[58].mxu1  ;;  %v7059_v44 = vld [vmem:[#allocation11 + $0x1e0] ss:$16 sps:$4 sm:$0xff]   ;;  %5001 = vmatprep.subr.bf16.mxu0 %v7061_v63 }
 0x3ec   : > { %v2669_v52 = vmax.f32 %v2667_v5, %v2668_v7  ;;  %v2687_v30 = vmax.f32 %v2685_v3, %v2686_v40  ;;  %v2433_v54 = vmax.f32 %v1684_v41, 0.0  ;;  %v2435_v55 = vmax.f32 %v1877_v43, 0.0  ;;  %v1689_v56 = vpop.f32.mrb[27].mxu0  ;;  %v1882_v58 = vpop.f32.mrb[59].mxu1 }
 0x3ed   : > { %v2678_v1 = vmax.f32 %v2676_v31, %v2677_v46  ;;  %v2696_v2 = vmax.f32 %v2694_v35, %v2695_v4  ;;  %v2434_v57 = vmax.f32 %v1686_v47, 0.0  ;;  %v2436_v48 = vmax.f32 %v1879_v49, 0.0  ;;  %5164 = vmatpush1.bf16.msra.mxu1 %v7062_v27  ;;  %5002 = vmatpush1.bf16.msra.mxu0 %v7059_v44 }
 0x3ee   : > { %v2670_v13 = vrot.slane %v2669_v52, 2  ;;  %v2688_v14 = vrot.slane %v2687_v30, 2  ;;  %v1688_v24 = vadd.f32 %v1687_v50, %v8428_v6  ;;  %v1881_v18 = vadd.f32 %v1880_v51, %v8432_v8  ;;  %2178 = vmatmul.mubr.bf16.gmra.mrb[132].mxu0 %v8320_v62  ;;  %2371 = vmatmul.mubr.bf16.gmra.mrb[164].mxu1 %v8320_v62 }
 0x3ef   : > { %v2679_v20 = vrot.slane %v2678_v1, 2  ;;  %v2697_v21 = vrot.slane %v2696_v2, 2  ;;  %v1690_v22 = vadd.f32 %v1689_v56, %v8435_v9  ;;  %v1883_v23 = vadd.f32 %v1882_v58, %v8439_v10  ;;  %2187 = vmatprep.mubr.bf16.mxu0 %v7810_v15  ;;  %2380 = vmatprep.mubr.bf16.mxu1 %v7810_v15  ;;  %v7067_v58 = vld [vmem:[#allocation11 + $0x1ec] ss:$16 sps:$4 sm:$0xff]  }
 0x3f0   : > { %v2671_v42 = vmax.f32 %v2669_v52, %v2670_v13  ;;  %v2689_v25 = vmax.f32 %v2687_v30, %v2688_v14  ;;  %v2441_v26 = vmax.f32 %v1688_v24, 0.0  ;;  %v2443_v37 = vmax.f32 %v1881_v18, 0.0  ;;  %5165 = vmatprep.subr.bf16.mxu1 %v7067_v58 }
 0x3f1   : > { %v2680_v5 = vmax.f32 %v2678_v1, %v2679_v20  ;;  %v2698_v62 = vmax.f32 %v2696_v2, %v2697_v21  ;;  %v2442_v3 = vmax.f32 %v1690_v22, 0.0  ;;  %v2444_v33 = vmax.f32 %v1883_v23, 0.0  ;;  %v1693_v31 = vpop.f32.mrb[28].mxu0  ;;  %v1886_v35 = vpop.f32.mrb[60].mxu1 }
 0x3f2   : > { %v2672_v36 = vrot.slane %v2671_v42, 1  ;;  %v2690_v34 = vrot.slane %v2689_v25, 1  ;;  %v2737_v7 = vmax.f32 %v2433_v54, %v2441_v26  ;;  %v2755_v40 = vmax.f32 %v2435_v55, %v2443_v37  ;;  %v1695_v41 = vpop.f32.mrb[29].mxu0  ;;  %v1888_v43 = vpop.f32.mrb[61].mxu1 }
 0x3f3   : > { %v2681_v45 = vrot.slane %v2680_v5, 1  ;;  %v2699_v46 = vrot.slane %v2698_v62, 1  ;;  %v2746_v4 = vmax.f32 %v2434_v57, %v2442_v3  ;;  %v2764_v47 = vmax.f32 %v2436_v48, %v2444_v33  ;;  %v1697_v49 = vpop.f32.mrb[30].mxu0  ;;  %v1890_v50 = vpop.f32.mrb[62].mxu1  ;;  %v7065_v48 = vld [vmem:[#allocation11 + $0x1e8] ss:$16 sps:$4 sm:$0xff]  }
 0x3f4   : > { %v8483_v51 = vmax.f32 %v2671_v42, %v2672_v36  ;;  %v8485_v52 = vmax.f32 %v2689_v25, %v2690_v34  ;;  %v1694_v30 = vadd.f32 %v1693_v31, %v8428_v6  ;;  %v1887_v56 = vadd.f32 %v1886_v35, %v8432_v8  ;;  %v1699_v54 = vpop.f32.mrb[31].mxu0  ;;  %v1892_v55 = vpop.f32.mrb[63].mxu1  ;;  %5166 = vmatpush1.bf16.msra.mxu1 %v7065_v48 }
 0x3f5   : > { %v8489_v29 = vmax.f32 %v2680_v5, %v2681_v45  ;;  %v8491_v1 = vmax.f32 %v2698_v62, %v2699_v46  ;;  %v1696_v2 = vadd.f32 %v1695_v41, %v8435_v9  ;;  %v1889_v57 = vadd.f32 %v1888_v43, %v8439_v10 }
 0x3f6   : > { %v2449_v11 = vmax.f32 %v1694_v30, 0.0  ;;  %v2451_v12 = vmax.f32 %v1887_v56, 0.0  ;;  %v1698_v13 = vadd.f32 %v1697_v49, %v8428_v6  ;;  %v1891_v14 = vadd.f32 %v1890_v50, %v8432_v8  ;;  %2188 = vmatmul.mubr.bf16.gmra.mrb[136].mxu0 %v8334_v17  ;;  %2381 = vmatmul.mubr.bf16.gmra.mrb[168].mxu1 %v8334_v17 }
 0x3f7   : > { %v2450_v24 = vmax.f32 %v1696_v2, 0.0  ;;  %v2452_v18 = vmax.f32 %v1889_v57, 0.0  ;;  %v1700_v19 = vadd.f32 %v1699_v54, %v8435_v9  ;;  %v1893_v20 = vadd.f32 %v1892_v55, %v8439_v10  ;;  %2197 = vmatprep.mubr.bf16.mxu0 %v7810_v15  ;;  %2390 = vmatprep.mubr.bf16.mxu1 %v7810_v15 }
 0x3f8   : > { %v2738_v21 = vmax.f32 %v2737_v7, %v2449_v11  ;;  %v2756_v22 = vmax.f32 %v2755_v40, %v2451_v12  ;;  %v2457_v23 = vmax.f32 %v1698_v13, 0.0  ;;  %v2459_v42 = vmax.f32 %v1891_v14, 0.0 }
 0x3f9   : > { %v2747_v25 = vmax.f32 %v2746_v4, %v2450_v24  ;;  %v2765_v26 = vmax.f32 %v2764_v47, %v2452_v18  ;;  %v2458_v37 = vmax.f32 %v1700_v19, 0.0  ;;  %v2460_v27 = vmax.f32 %v1893_v20, 0.0  ;;  %v1703_v17 = vpop.f32.mrb[32].mxu0  ;;  %v1896_v5 = vpop.f32.mrb[64].mxu1 }
 0x3fa   : > { %v2739_v62 = vmax.f32 %v2738_v21, %v2457_v23  ;;  %v2757_v3 = vmax.f32 %v2756_v22, %v2459_v42  ;;  %v1704_v33 = vadd.f32 %v1703_v17, %v8428_v6  ;;  %v1897_v31 = vadd.f32 %v1896_v5, %v8432_v8  ;;  %v1705_v35 = vpop.f32.mrb[33].mxu0  ;;  %v1898_v15 = vpop.f32.mrb[65].mxu1 }
 0x3fb   : > { %v2748_v63 = vmax.f32 %v2747_v25, %v2458_v37  ;;  %v2766_v36 = vmax.f32 %v2765_v26, %v2460_v27  ;;  %v1706_v34 = vadd.f32 %v1705_v35, %v8435_v9  ;;  %v1899_v7 = vadd.f32 %v1898_v15, %v8439_v10  ;;  %v1707_v40 = vpop.f32.mrb[34].mxu0  ;;  %v1900_v41 = vpop.f32.mrb[66].mxu1  ;;  %v7070_v15 = vld [vmem:[#allocation11 + $0x204] ss:$16 sps:$4 sm:$0xff]  }
 0x3fc   : > { %v2740_v43 = vrot.slane %v2739_v62, 4  ;;  %v2758_v44 = vrot.slane %v2757_v3, 4  ;;  %v2465_v45 = vmax.f32 %v1704_v33, 0.0  ;;  %v2467_v46 = vmax.f32 %v1897_v31, 0.0  ;;  %v1709_v4 = vpop.f32.mrb[35].mxu0  ;;  %v1902_v47 = vpop.f32.mrb[67].mxu1  ;;  %5012 = vmatprep.subr.bf16.mxu0 %v7070_v15 }
 0x3fd   : > { %v2749_v49 = vrot.slane %v2748_v63, 4  ;;  %v2767_v50 = vrot.slane %v2766_v36, 4  ;;  %v2466_v30 = vmax.f32 %v1706_v34, 0.0  ;;  %v2468_v56 = vmax.f32 %v1899_v7, 0.0 }
 0x3fe   : > { %v2741_v54 = vmax.f32 %v2739_v62, %v2740_v43  ;;  %v2759_v55 = vmax.f32 %v2757_v3, %v2758_v44  ;;  %v1708_v58 = vadd.f32 %v1707_v40, %v8428_v6  ;;  %v1901_v2 = vadd.f32 %v1900_v41, %v8432_v8  ;;  %2198 = vmatmul.mubr.bf16.gmra.mrb[140].mxu0 %v8332_v16 }
 0x3ff   : > { %v2750_v57 = vmax.f32 %v2748_v63, %v2749_v49  ;;  %v2768_v48 = vmax.f32 %v2766_v36, %v2767_v50  ;;  %v1710_v11 = vadd.f32 %v1709_v4, %v8435_v9  ;;  %v1903_v12 = vadd.f32 %v1902_v47, %v8439_v10  ;;  %2391 = vmatmul.mubr.bf16.gmra.mrb[172].mxu1 %v8332_v16  ;;  %v7073_v4 = vld [vmem:[#allocation11 + $0x20c] ss:$16 sps:$4 sm:$0xff]  }
 0x400   : > { %v2742_v13 = vrot.slane %v2741_v54, 2  ;;  %v2760_v14 = vrot.slane %v2759_v55, 2  ;;  %v2473_v24 = vmax.f32 %v1708_v58, 0.0  ;;  %v2475_v18 = vmax.f32 %v1901_v2, 0.0  ;;  %5176 = vmatprep.subr.bf16.mxu1 %v7073_v4 }
 0x401   : > { %v2751_v19 = vrot.slane %v2750_v57, 2  ;;  %v2769_v20 = vrot.slane %v2768_v48, 2  ;;  %v2474_v21 = vmax.f32 %v1710_v11, 0.0  ;;  %v2476_v22 = vmax.f32 %v1903_v12, 0.0  ;;  %v1713_v23 = vpop.f32.mrb[36].mxu0  ;;  %v1906_v42 = vpop.f32.mrb[68].mxu1 }
 0x402   : > { %v2743_v25 = vmax.f32 %v2741_v54, %v2742_v13  ;;  %v2761_v26 = vmax.f32 %v2759_v55, %v2760_v14  ;;  %v2809_v37 = vmax.f32 %v2465_v45, %v2473_v24  ;;  %v2827_v27 = vmax.f32 %v2467_v46, %v2475_v18  ;;  %v1715_v17 = vpop.f32.mrb[37].mxu0  ;;  %v1908_v5 = vpop.f32.mrb[69].mxu1 }
 0x403   : > { %v2752_v62 = vmax.f32 %v2750_v57, %v2751_v19  ;;  %v2770_v3 = vmax.f32 %v2768_v48, %v2769_v20  ;;  %v2818_v33 = vmax.f32 %v2466_v30, %v2474_v21  ;;  %v2836_v16 = vmax.f32 %v2468_v56, %v2476_v22  ;;  %v1717_v31 = vpop.f32.mrb[38].mxu0  ;;  %v1910_v35 = vpop.f32.mrb[70].mxu1 }
 0x404   : > { %v2744_v63 = vrot.slane %v2743_v25, 1  ;;  %v2762_v36 = vrot.slane %v2761_v26, 1  ;;  %v1714_v34 = vadd.f32 %v1713_v23, %v8428_v6  ;;  %v1907_v7 = vadd.f32 %v1906_v42, %v8432_v8  ;;  %v1719_v40 = vpop.f32.mrb[39].mxu0  ;;  %v1912_v41 = vpop.f32.mrb[71].mxu1 }
 0x405   : > { %v2753_v43 = vrot.slane %v2752_v62, 1  ;;  %v2771_v44 = vrot.slane %v2770_v3, 1  ;;  %v1716_v45 = vadd.f32 %v1715_v17, %v8435_v9  ;;  %v1909_v46 = vadd.f32 %v1908_v5, %v8439_v10 }
 0x406   : > { %v2745_v47 = vmax.f32 %v2743_v25, %v2744_v63  ;;  %v2763_v49 = vmax.f32 %v2761_v26, %v2762_v36  ;;  %v2481_v50 = vmax.f32 %v1714_v34, 0.0  ;;  %v2483_v30 = vmax.f32 %v1907_v7, 0.0 }
 0x407   : > { %v2754_v56 = vmax.f32 %v2752_v62, %v2753_v43  ;;  %v2772_v54 = vmax.f32 %v2770_v3, %v2771_v44  ;;  %v2482_v55 = vmax.f32 %v1716_v45, 0.0  ;;  %v2484_v58 = vmax.f32 %v1909_v46, 0.0 }
 0x408   : > { %v8519_v2 = vsel %vm3305_vm2, %v2745_v47, %v8483_v51  ;;  %v8523_v57 = vsel %vm3305_vm2, %v2763_v49, %v8485_v52  ;;  %v2810_v48 = vmax.f32 %v2809_v37, %v2481_v50  ;;  %v2828_v11 = vmax.f32 %v2827_v27, %v2483_v30 }
 0x409   : > { %v8527_v12 = vsel %vm3305_vm2, %v2754_v56, %v8489_v29  ;;  %v8531_v13 = vsel %vm3305_vm2, %v2772_v54, %v8491_v1  ;;  %v2819_v14 = vmax.f32 %v2818_v33, %v2482_v55  ;;  %v2837_v24 = vmax.f32 %v2836_v16, %v2484_v58  ;;  %v1723_v18 = vpop.f32.mrb[40].mxu0  ;;  %v1916_v19 = vpop.f32.mrb[72].mxu1 }
 0x40a   : > { %v1718_v51 = vadd.f32 %v1717_v31, %v8428_v6  ;;  %v1911_v20 = vadd.f32 %v1910_v35, %v8432_v8  ;;  %v1720_v52 = vadd.f32 %v1719_v40, %v8435_v9  ;;  %v1913_v21 = vadd.f32 %v1912_v41, %v8439_v10  ;;  %v1725_v22 = vpop.f32.mrb[41].mxu0  ;;  %v1918_v23 = vpop.f32.mrb[73].mxu1 }
 0x40b   : > { %v1724_v29 = vadd.f32 %v1723_v18, %v8428_v6  ;;  %v1917_v42 = vadd.f32 %v1916_v19, %v8432_v8  ;;  %v1726_v1 = vadd.f32 %v1725_v22, %v8435_v9  ;;  %v1919_v25 = vadd.f32 %v1918_v23, %v8439_v10  ;;  %v1727_v26 = vpop.f32.mrb[42].mxu0  ;;  %v1920_v37 = vpop.f32.mrb[74].mxu1 }
 0x40c   : > { %v2489_v27 = vmax.f32 %v1718_v51, 0.0  ;;  %v2491_v17 = vmax.f32 %v1911_v20, 0.0  ;;  %v2490_v5 = vmax.f32 %v1720_v52, 0.0  ;;  %v2492_v62 = vmax.f32 %v1913_v21, 0.0  ;;  %v1729_v3 = vpop.f32.mrb[43].mxu0  ;;  %v1922_v33 = vpop.f32.mrb[75].mxu1 }
 0x40d   : > { %v2497_v16 = vmax.f32 %v1724_v29, 0.0  ;;  %v2499_v31 = vmax.f32 %v1917_v42, 0.0  ;;  %v2498_v35 = vmax.f32 %v1726_v1, 0.0  ;;  %v2500_v15 = vmax.f32 %v1919_v25, 0.0 }
 0x40e   : > { %v2811_v63 = vmax.f32 %v2810_v48, %v2489_v27  ;;  %v2829_v36 = vmax.f32 %v2828_v11, %v2491_v17  ;;  %v2820_v34 = vmax.f32 %v2819_v14, %v2490_v5  ;;  %v2838_v7 = vmax.f32 %v2837_v24, %v2492_v62 }
 0x40f   : > { %v1728_v40 = vadd.f32 %v1727_v26, %v8428_v6  ;;  %v1921_v41 = vadd.f32 %v1920_v37, %v8432_v8  ;;  %v1730_v43 = vadd.f32 %v1729_v3, %v8435_v9  ;;  %v1923_v44 = vadd.f32 %v1922_v33, %v8439_v10 }
 0x410   : > { %v2812_v45 = vrot.slane %v2811_v63, 4  ;;  %v2830_v46 = vrot.slane %v2829_v36, 4  ;;  %v2821_v4 = vrot.slane %v2820_v34, 4  ;;  %v2839_v47 = vrot.slane %v2838_v7, 4 }
 0x411   : > { %v2505_v49 = vmax.f32 %v1728_v40, 0.0  ;;  %v2507_v50 = vmax.f32 %v1921_v41, 0.0  ;;  %v2506_v30 = vmax.f32 %v1730_v43, 0.0  ;;  %v2508_v56 = vmax.f32 %v1923_v44, 0.0  ;;  %v1733_v54 = vpop.f32.mrb[44].mxu0  ;;  %v1926_v55 = vpop.f32.mrb[76].mxu1 }
 0x412   : > { %v2813_v58 = vmax.f32 %v2811_v63, %v2812_v45  ;;  %v2831_v48 = vmax.f32 %v2829_v36, %v2830_v46  ;;  %v2822_v11 = vmax.f32 %v2820_v34, %v2821_v4  ;;  %v2840_v14 = vmax.f32 %v2838_v7, %v2839_v47  ;;  %v1735_v24 = vpop.f32.mrb[45].mxu0  ;;  %v1928_v18 = vpop.f32.mrb[77].mxu1 }
 0x413   : > { %v2881_v19 = vmax.f32 %v2497_v16, %v2505_v49  ;;  %v2899_v51 = vmax.f32 %v2499_v31, %v2507_v50  ;;  %v2890_v20 = vmax.f32 %v2498_v35, %v2506_v30  ;;  %v2908_v52 = vmax.f32 %v2500_v15, %v2508_v56  ;;  %v1737_v21 = vpop.f32.mrb[46].mxu0  ;;  %v1930_v22 = vpop.f32.mrb[78].mxu1 }
 0x414   : > { %v2814_v23 = vrot.slane %v2813_v58, 2  ;;  %v2832_v29 = vrot.slane %v2831_v48, 2  ;;  %v2823_v42 = vrot.slane %v2822_v11, 2  ;;  %v2841_v1 = vrot.slane %v2840_v14, 2  ;;  %v1739_v25 = vpop.f32.mrb[47].mxu0  ;;  %v1932_v26 = vpop.f32.mrb[79].mxu1 }
 0x415   : > { %v1734_v37 = vadd.f32 %v1733_v54, %v8428_v6  ;;  %v1927_v27 = vadd.f32 %v1926_v55, %v8432_v8  ;;  %v1736_v17 = vadd.f32 %v1735_v24, %v8435_v9  ;;  %v1929_v5 = vadd.f32 %v1928_v18, %v8439_v10 }
 0x416   : > { %v2815_v62 = vmax.f32 %v2813_v58, %v2814_v23  ;;  %v2833_v3 = vmax.f32 %v2831_v48, %v2832_v29  ;;  %v2824_v33 = vmax.f32 %v2822_v11, %v2823_v42  ;;  %v2842_v16 = vmax.f32 %v2840_v14, %v2841_v1 }
 0x417   : > { %v2513_v31 = vmax.f32 %v1734_v37, 0.0  ;;  %v2515_v35 = vmax.f32 %v1927_v27, 0.0  ;;  %v2514_v15 = vmax.f32 %v1736_v17, 0.0  ;;  %v2516_v63 = vmax.f32 %v1929_v5, 0.0 }
 0x418   : > { %v2816_v36 = vrot.slane %v2815_v62, 1  ;;  %v2834_v34 = vrot.slane %v2833_v3, 1  ;;  %v2825_v7 = vrot.slane %v2824_v33, 1  ;;  %v2843_v40 = vrot.slane %v2842_v16, 1 }
 0x419   : > { %v2882_v41 = vmax.f32 %v2881_v19, %v2513_v31  ;;  %v2900_v43 = vmax.f32 %v2899_v51, %v2515_v35  ;;  %v2891_v44 = vmax.f32 %v2890_v20, %v2514_v15  ;;  %v2909_v45 = vmax.f32 %v2908_v52, %v2516_v63  ;;  %v1743_v46 = vpop.f32.mrb[48].mxu0  ;;  %v1936_v4 = vpop.f32.mrb[80].mxu1 }
 0x41a   : > { %v2817_v47 = vmax.f32 %v2815_v62, %v2816_v36  ;;  %v2835_v49 = vmax.f32 %v2833_v3, %v2834_v34  ;;  %v2826_v50 = vmax.f32 %v2824_v33, %v2825_v7  ;;  %v2844_v30 = vmax.f32 %v2842_v16, %v2843_v40  ;;  %v1745_v56 = vpop.f32.mrb[49].mxu0  ;;  %v1938_v54 = vpop.f32.mrb[81].mxu1 }
 0x41b   : > { %v1738_v55 = vadd.f32 %v1737_v21, %v8428_v6  ;;  %v1931_v58 = vadd.f32 %v1930_v22, %v8432_v8  ;;  %v1740_v48 = vadd.f32 %v1739_v25, %v8435_v9  ;;  %v1933_v11 = vadd.f32 %v1932_v26, %v8439_v10  ;;  %v1747_v14 = vpop.f32.mrb[50].mxu0  ;;  %v1940_v24 = vpop.f32.mrb[82].mxu1 }
 0x41c   : > { %v8555_v18 = vsel %vm3307_vm3, %v2817_v47, %v8519_v2  ;;  %v8559_v19 = vsel %vm3307_vm3, %v2835_v49, %v8523_v57  ;;  %v8563_v51 = vsel %vm3307_vm3, %v2826_v50, %v8527_v12  ;;  %v8567_v20 = vsel %vm3307_vm3, %v2844_v30, %v8531_v13  ;;  %v1749_v52 = vpop.f32.mrb[51].mxu0  ;;  %v1942_v21 = vpop.f32.mrb[83].mxu1 }
 0x41d   : > { %v2521_v22 = vmax.f32 %v1738_v55, 0.0  ;;  %v2523_v23 = vmax.f32 %v1931_v58, 0.0  ;;  %v2522_v29 = vmax.f32 %v1740_v48, 0.0  ;;  %v2524_v42 = vmax.f32 %v1933_v11, 0.0 }
 0x41e   : > { %v1744_v2 = vadd.f32 %v1743_v46, %v8428_v6  ;;  %v1937_v1 = vadd.f32 %v1936_v4, %v8432_v8  ;;  %v1746_v57 = vadd.f32 %v1745_v56, %v8435_v9  ;;  %v1939_v25 = vadd.f32 %v1938_v54, %v8439_v10 }
 0x41f   : > { %v2883_v12 = vmax.f32 %v2882_v41, %v2521_v22  ;;  %v2901_v26 = vmax.f32 %v2900_v43, %v2523_v23  ;;  %v2892_v37 = vmax.f32 %v2891_v44, %v2522_v29  ;;  %v2910_v27 = vmax.f32 %v2909_v45, %v2524_v42 }
 0x420   : > { %v2529_v13 = vmax.f32 %v1744_v2, 0.0  ;;  %v2531_v17 = vmax.f32 %v1937_v1, 0.0  ;;  %v2530_v5 = vmax.f32 %v1746_v57, 0.0  ;;  %v2532_v62 = vmax.f32 %v1939_v25, 0.0 }
 0x421   : > { %v2884_v3 = vrot.slane %v2883_v12, 4  ;;  %v2902_v33 = vrot.slane %v2901_v26, 4  ;;  %v2893_v16 = vrot.slane %v2892_v37, 4  ;;  %v2911_v31 = vrot.slane %v2910_v27, 4  ;;  %v1753_v35 = vpop.f32.mrb[52].mxu0  ;;  %v1946_v15 = vpop.f32.mrb[84].mxu1 }
 0x422   : > { %v1748_v63 = vadd.f32 %v1747_v14, %v8428_v6  ;;  %v1941_v36 = vadd.f32 %v1940_v24, %v8432_v8  ;;  %v1750_v34 = vadd.f32 %v1749_v52, %v8435_v9  ;;  %v1943_v7 = vadd.f32 %v1942_v21, %v8439_v10  ;;  %v1755_v40 = vpop.f32.mrb[53].mxu0  ;;  %v1948_v41 = vpop.f32.mrb[85].mxu1 }
 0x423   : > { %v2885_v43 = vmax.f32 %v2883_v12, %v2884_v3  ;;  %v2903_v44 = vmax.f32 %v2901_v26, %v2902_v33  ;;  %v2894_v45 = vmax.f32 %v2892_v37, %v2893_v16  ;;  %v2912_v46 = vmax.f32 %v2910_v27, %v2911_v31  ;;  %v1757_v4 = vpop.f32.mrb[54].mxu0  ;;  %v1950_v47 = vpop.f32.mrb[86].mxu1 }
 0x424   : > { %v2537_v49 = vmax.f32 %v1748_v63, 0.0  ;;  %v2539_v50 = vmax.f32 %v1941_v36, 0.0  ;;  %v2538_v30 = vmax.f32 %v1750_v34, 0.0  ;;  %v2540_v56 = vmax.f32 %v1943_v7, 0.0  ;;  %v1759_v54 = vpop.f32.mrb[55].mxu0  ;;  %v1952_v55 = vpop.f32.mrb[87].mxu1 }
 0x425   : > { %v2886_v58 = vrot.slane %v2885_v43, 2  ;;  %v2904_v48 = vrot.slane %v2903_v44, 2  ;;  %v2895_v11 = vrot.slane %v2894_v45, 2  ;;  %v2913_v14 = vrot.slane %v2912_v46, 2 }
 0x426   : > { %v2953_v24 = vmax.f32 %v2529_v13, %v2537_v49  ;;  %v2971_v52 = vmax.f32 %v2531_v17, %v2539_v50  ;;  %v2962_v21 = vmax.f32 %v2530_v5, %v2538_v30  ;;  %v2980_v22 = vmax.f32 %v2532_v62, %v2540_v56 }
 0x427   : > { %v2887_v23 = vmax.f32 %v2885_v43, %v2886_v58  ;;  %v2905_v29 = vmax.f32 %v2903_v44, %v2904_v48  ;;  %v2896_v42 = vmax.f32 %v2894_v45, %v2895_v11  ;;  %v2914_v2 = vmax.f32 %v2912_v46, %v2913_v14 }
 0x428   : > { %v1754_v1 = vadd.f32 %v1753_v35, %v8428_v6  ;;  %v1947_v57 = vadd.f32 %v1946_v15, %v8432_v8  ;;  %v1756_v25 = vadd.f32 %v1755_v40, %v8435_v9  ;;  %v1949_v12 = vadd.f32 %v1948_v41, %v8439_v10 }
 0x429   : > { %v2888_v26 = vrot.slane %v2887_v23, 1  ;;  %v2906_v37 = vrot.slane %v2905_v29, 1  ;;  %v2897_v27 = vrot.slane %v2896_v42, 1  ;;  %v2915_v3 = vrot.slane %v2914_v2, 1  ;;  %v1763_v13 = vpop.f32.mrb[56].mxu0  ;;  %v1956_v17 = vpop.f32.mrb[88].mxu1 }
 0x42a   : > { %v2545_v5 = vmax.f32 %v1754_v1, 0.0  ;;  %v2547_v62 = vmax.f32 %v1947_v57, 0.0  ;;  %v2546_v33 = vmax.f32 %v1756_v25, 0.0  ;;  %v2548_v16 = vmax.f32 %v1949_v12, 0.0  ;;  %v1765_v31 = vpop.f32.mrb[57].mxu0  ;;  %v1958_v63 = vpop.f32.mrb[89].mxu1 }
 0x42b   : > { %v2889_v36 = vmax.f32 %v2887_v23, %v2888_v26  ;;  %v2907_v35 = vmax.f32 %v2905_v29, %v2906_v37  ;;  %v8581_v34 = vmax.f32 %v2896_v42, %v2897_v27  ;;  %v8583_v15 = vmax.f32 %v2914_v2, %v2915_v3  ;;  %v1767_v7 = vpop.f32.mrb[58].mxu0  ;;  %v1960_v40 = vpop.f32.mrb[90].mxu1 }
 0x42c   : > { %v2954_v41 = vmax.f32 %v2953_v24, %v2545_v5  ;;  %v2972_v43 = vmax.f32 %v2971_v52, %v2547_v62  ;;  %v2963_v44 = vmax.f32 %v2962_v21, %v2546_v33  ;;  %v2981_v45 = vmax.f32 %v2980_v22, %v2548_v16  ;;  %v1769_v46 = vpop.f32.mrb[59].mxu0  ;;  %v1962_v49 = vpop.f32.mrb[91].mxu1 }
 0x42d   : > { %v8587_v50 = vsel %vm3309_vm4, %v2889_v36, %v8555_v18  ;;  %v8591_v30 = vsel %vm3309_vm4, %v2907_v35, %v8559_v19  ;;  %v1758_v56 = vadd.f32 %v1757_v4, %v8428_v6  ;;  %v1951_v58 = vadd.f32 %v1950_v47, %v8432_v8 }
 0x42e   : > { %v1760_v48 = vadd.f32 %v1759_v54, %v8435_v9  ;;  %v1953_v11 = vadd.f32 %v1952_v55, %v8439_v10  ;;  %v1764_v14 = vadd.f32 %v1763_v13, %v8428_v6  ;;  %v1957_v24 = vadd.f32 %v1956_v17, %v8432_v8 }
 0x42f   : > { %v2553_v52 = vmax.f32 %v1758_v56, 0.0  ;;  %v2555_v21 = vmax.f32 %v1951_v58, 0.0  ;;  %v1766_v18 = vadd.f32 %v1765_v31, %v8435_v9  ;;  %v1959_v22 = vadd.f32 %v1958_v63, %v8439_v10 }
 0x430   : > { %v2554_v19 = vmax.f32 %v1760_v48, 0.0  ;;  %v2556_v23 = vmax.f32 %v1953_v11, 0.0  ;;  %v2561_v29 = vmax.f32 %v1764_v14, 0.0  ;;  %v2563_v4 = vmax.f32 %v1957_v24, 0.0 }
 0x431   : > { %v2955_v42 = vmax.f32 %v2954_v41, %v2553_v52  ;;  %v2973_v47 = vmax.f32 %v2972_v43, %v2555_v21  ;;  %v2562_v2 = vmax.f32 %v1766_v18, 0.0  ;;  %v2564_v54 = vmax.f32 %v1959_v22, 0.0  ;;  %v1773_v1 = vpop.f32.mrb[60].mxu0  ;;  %v1966_v55 = vpop.f32.mrb[92].mxu1 }
 0x432   : > { %v2964_v57 = vmax.f32 %v2963_v44, %v2554_v19  ;;  %v2982_v25 = vmax.f32 %v2981_v45, %v2556_v23  ;;  %v1768_v12 = vadd.f32 %v1767_v7, %v8428_v6  ;;  %v1961_v26 = vadd.f32 %v1960_v40, %v8432_v8  ;;  %v1775_v37 = vpop.f32.mrb[61].mxu0  ;;  %v1968_v27 = vpop.f32.mrb[93].mxu1 }
 0x433   : > { %v2956_v3 = vrot.slane %v2955_v42, 4  ;;  %v2974_v13 = vrot.slane %v2973_v47, 4  ;;  %v1770_v17 = vadd.f32 %v1769_v46, %v8435_v9  ;;  %v1963_v5 = vadd.f32 %v1962_v49, %v8439_v10  ;;  %v1777_v62 = vpop.f32.mrb[62].mxu0  ;;  %v1970_v33 = vpop.f32.mrb[94].mxu1 }
 0x434   : > { %v2965_v16 = vrot.slane %v2964_v57, 4  ;;  %v2983_v31 = vrot.slane %v2982_v25, 4  ;;  %v2569_v63 = vmax.f32 %v1768_v12, 0.0  ;;  %v2571_v36 = vmax.f32 %v1961_v26, 0.0  ;;  %v1779_v35 = vpop.f32.mrb[63].mxu0  ;;  %v1972_v41 = vpop.f32.mrb[95].mxu1 }
 0x435   : > { %v2957_v7 = vmax.f32 %v2955_v42, %v2956_v3  ;;  %v2975_v43 = vmax.f32 %v2973_v47, %v2974_v13  ;;  %v2570_v40 = vmax.f32 %v1770_v17, 0.0  ;;  %v2572_v44 = vmax.f32 %v1963_v5, 0.0 }
 0x436   : > { %v2966_v45 = vmax.f32 %v2964_v57, %v2965_v16  ;;  %v2984_v56 = vmax.f32 %v2982_v25, %v2983_v31  ;;  %v3025_v58 = vmax.f32 %v2561_v29, %v2569_v63  ;;  %v3043_v48 = vmax.f32 %v2563_v4, %v2571_v36 }
 0x437   : > { %v2958_v46 = vrot.slane %v2957_v7, 2  ;;  %v2976_v11 = vrot.slane %v2975_v43, 2  ;;  %v3034_v49 = vmax.f32 %v2562_v2, %v2570_v40  ;;  %v3052_v14 = vmax.f32 %v2564_v54, %v2572_v44 }
 0x438   : > { %v2967_v24 = vrot.slane %v2966_v45, 2  ;;  %v2985_v52 = vrot.slane %v2984_v56, 2  ;;  %v1774_v21 = vadd.f32 %v1773_v1, %v8428_v6  ;;  %v1967_v18 = vadd.f32 %v1966_v55, %v8432_v8 }
 0x439   : > { %v2959_v22 = vmax.f32 %v2957_v7, %v2958_v46  ;;  %v2977_v19 = vmax.f32 %v2975_v43, %v2976_v11  ;;  %v1776_v23 = vadd.f32 %v1775_v37, %v8435_v9  ;;  %v1969_v42 = vadd.f32 %v1968_v27, %v8439_v10  ;;  %v1783_v47 = vpop.f32.mrb[64].mxu0  ;;  %v1976_v57 = vpop.f32.mrb[96].mxu1 }
 0x43a   : > { %v2968_v29 = vmax.f32 %v2966_v45, %v2967_v24  ;;  %v2986_v4 = vmax.f32 %v2984_v56, %v2985_v52  ;;  %v2577_v25 = vmax.f32 %v1774_v21, 0.0  ;;  %v2579_v12 = vmax.f32 %v1967_v18, 0.0  ;;  %v1785_v2 = vpop.f32.mrb[65].mxu0  ;;  %v1978_v54 = vpop.f32.mrb[97].mxu1 }
 0x43b   : > { %v2960_v26 = vrot.slane %v2959_v22, 1  ;;  %v2978_v3 = vrot.slane %v2977_v19, 1  ;;  %v2578_v13 = vmax.f32 %v1776_v23, 0.0  ;;  %v2580_v1 = vmax.f32 %v1969_v42, 0.0  ;;  %v1787_v17 = vpop.f32.mrb[66].mxu0  ;;  %v1980_v55 = vpop.f32.mrb[98].mxu1 }
 0x43c   : > { %v2969_v5 = vrot.slane %v2968_v29, 1  ;;  %v2987_v16 = vrot.slane %v2986_v4, 1  ;;  %v3026_v31 = vmax.f32 %v3025_v58, %v2577_v25  ;;  %v3044_v37 = vmax.f32 %v3043_v48, %v2579_v12  ;;  %v1789_v63 = vpop.f32.mrb[67].mxu0  ;;  %v1982_v27 = vpop.f32.mrb[99].mxu1 }
 0x43d   : > { %v2961_v36 = vmax.f32 %v2959_v22, %v2960_v26  ;;  %v2979_v7 = vmax.f32 %v2977_v19, %v2978_v3  ;;  %v3035_v43 = vmax.f32 %v3034_v49, %v2578_v13  ;;  %v3053_v40 = vmax.f32 %v3052_v14, %v2580_v1 }
 0x43e   : > { %v8609_v44 = vmax.f32 %v2968_v29, %v2969_v5  ;;  %v8611_v45 = vmax.f32 %v2986_v4, %v2987_v16  ;;  %v1778_v56 = vadd.f32 %v1777_v62, %v8428_v6  ;;  %v1971_v46 = vadd.f32 %v1970_v33, %v8432_v8 }
 0x43f   : > { %v8617_v11 = vsel %vm3311_vm5, %v2961_v36, %v8587_v50  ;;  %v8621_v58 = vsel %vm3311_vm5, %v2979_v7, %v8591_v30  ;;  %v1780_v48 = vadd.f32 %v1779_v35, %v8435_v9  ;;  %v1973_v49 = vadd.f32 %v1972_v41, %v8439_v10 }
 0x440   : > { %9503 = vst [vmem:[#allocation25_spill] sm:$0xff] %v8621_v58  ;;  %v2585_v14 = vmax.f32 %v1778_v56, 0.0  ;;  %v2587_v24 = vmax.f32 %v1971_v46, 0.0  ;;  %v1784_v52 = vadd.f32 %v1783_v47, %v8428_v6  ;;  %v1977_v62 = vadd.f32 %v1976_v57, %v8432_v8 }
 0x441   : > { %v2586_v21 = vmax.f32 %v1780_v48, 0.0  ;;  %v2588_v33 = vmax.f32 %v1973_v49, 0.0  ;;  %v1786_v18 = vadd.f32 %v1785_v2, %v8435_v9  ;;  %v1979_v50 = vadd.f32 %v1978_v54, %v8439_v10  ;;  %v1793_v22 = vpop.f32.mrb[68].mxu0  ;;  %v1986_v19 = vpop.f32.mrb[100].mxu1 }
 0x442   : > { %v3027_v30 = vmax.f32 %v3026_v31, %v2585_v14  ;;  %v3045_v23 = vmax.f32 %v3044_v37, %v2587_v24  ;;  %v2593_v42 = vmax.f32 %v1784_v52, 0.0  ;;  %v2595_v35 = vmax.f32 %v1977_v62, 0.0  ;;  %v1795_v29 = vpop.f32.mrb[69].mxu0  ;;  %v1988_v41 = vpop.f32.mrb[101].mxu1 }
 0x443   : > { %v3036_v4 = vmax.f32 %v3035_v43, %v2586_v21  ;;  %v3054_v25 = vmax.f32 %v3053_v40, %v2588_v33  ;;  %v2594_v12 = vmax.f32 %v1786_v18, 0.0  ;;  %v2596_v47 = vmax.f32 %v1979_v50, 0.0  ;;  %v8629_v26 = vpop.f32.mrb[70].mxu0  ;;  %v1990_v57 = vpop.f32.mrb[102].mxu1 }
 0x444   : > { %v3028_v3 = vrot.slane %v3027_v30, 4  ;;  %v3046_v13 = vrot.slane %v3045_v23, 4  ;;  %v1788_v2 = vadd.f32 %v1787_v17, %v8428_v6  ;;  %v1981_v54 = vadd.f32 %v1980_v55, %v8432_v8  ;;  %v1799_v1 = vpop.f32.mrb[71].mxu0  ;;  %v1992_v5 = vpop.f32.mrb[103].mxu1 }
 0x445   : > { %v3037_v16 = vrot.slane %v3036_v4, 4  ;;  %v3055_v31 = vrot.slane %v3054_v25, 4  ;;  %v1790_v37 = vadd.f32 %v1789_v63, %v8435_v9  ;;  %v1983_v36 = vadd.f32 %v1982_v27, %v8439_v10 }
 0x446   : > { %v3029_v7 = vmax.f32 %v3027_v30, %v3028_v3  ;;  %v3047_v43 = vmax.f32 %v3045_v23, %v3046_v13  ;;  %v2601_v40 = vmax.f32 %v1788_v2, 0.0  ;;  %v2603_v56 = vmax.f32 %v1981_v54, 0.0 }
 0x447   : > { %v3038_v46 = vmax.f32 %v3036_v4, %v3037_v16  ;;  %v3056_v48 = vmax.f32 %v3054_v25, %v3055_v31  ;;  %v2602_v49 = vmax.f32 %v1790_v37, 0.0  ;;  %v2604_v14 = vmax.f32 %v1983_v36, 0.0 }
 0x448   : > { %v3030_v17 = vrot.slane %v3029_v7, 2  ;;  %v3048_v24 = vrot.slane %v3047_v43, 2  ;;  %v3097_v55 = vmax.f32 %v2593_v42, %v2601_v40  ;;  %v3115_v52 = vmax.f32 %v2595_v35, %v2603_v56 }
 0x449   : > { %v3039_v62 = vrot.slane %v3038_v46, 2  ;;  %v3057_v21 = vrot.slane %v3056_v48, 2  ;;  %v3106_v33 = vmax.f32 %v2594_v12, %v2602_v49  ;;  %v3124_v18 = vmax.f32 %v2596_v47, %v2604_v14  ;;  %v1803_v50 = vpop.f32.mrb[72].mxu0  ;;  %v1996_v63 = vpop.f32.mrb[104].mxu1 }
 0x44a   : > { %v3031_v60 = vmax.f32 %v3029_v7, %v3030_v17  ;;  %v3049_v27 = vmax.f32 %v3047_v43, %v3048_v24  ;;  %v1794_v30 = vadd.f32 %v1793_v22, %v8428_v6  ;;  %v1987_v23 = vadd.f32 %v1986_v19, %v8432_v8  ;;  %v1805_v4 = vpop.f32.mrb[73].mxu0  ;;  %v1998_v25 = vpop.f32.mrb[105].mxu1 }
 0x44b   : > { %v3040_v3 = vmax.f32 %v3038_v46, %v3039_v62  ;;  %v3058_v13 = vmax.f32 %v3056_v48, %v3057_v21  ;;  %v1796_v2 = vadd.f32 %v1795_v29, %v8435_v9  ;;  %v1989_v42 = vadd.f32 %v1988_v41, %v8439_v10  ;;  %v1807_v35 = vpop.f32.mrb[74].mxu0  ;;  %v2000_v54 = vpop.f32.mrb[106].mxu1 }
 0x44c   : > { %v3032_v12 = vrot.slane %v3031_v60, 1  ;;  %v3050_v47 = vrot.slane %v3049_v27, 1  ;;  %v2609_v16 = vmax.f32 %v1794_v30, 0.0  ;;  %v2611_v31 = vmax.f32 %v1987_v23, 0.0  ;;  %v1809_v37 = vpop.f32.mrb[75].mxu0  ;;  %v2002_v36 = vpop.f32.mrb[107].mxu1 }
 0x44d   : > { %v3041_v7 = vrot.slane %v3040_v3, 1  ;;  %v3059_v22 = vrot.slane %v3058_v13, 1  ;;  %v2610_v43 = vmax.f32 %v1796_v2, 0.0  ;;  %v2612_v19 = vmax.f32 %v1989_v42, 0.0 }
 0x44e   : > { %v3033_v40 = vmax.f32 %v3031_v60, %v3032_v12  ;;  %v8639_v56 = vmax.f32 %v3049_v27, %v3050_v47  ;;  %v3098_v46 = vmax.f32 %v3097_v55, %v2609_v16  ;;  %v3116_v48 = vmax.f32 %v3115_v52, %v2611_v31 }
 0x44f   : > { %v8641_v29 = vmax.f32 %v3040_v3, %v3041_v7  ;;  %v8643_v41 = vmax.f32 %v3058_v13, %v3059_v22  ;;  %v3107_v49 = vmax.f32 %v3106_v33, %v2610_v43  ;;  %v3125_v14 = vmax.f32 %v3124_v18, %v2612_v19 }
 0x450   : > { %9504 = vst [vmem:[#allocation26_spill] sm:$0xff] %v8639_v56  ;;  %v8647_v17 = vsel %vm3313_vm6, %v3033_v40, %v8617_v11  ;;  %v1798_v24 = vadd.f32 %v8629_v26, %v8428_v6  ;;  %v1991_v62 = vadd.f32 %v1990_v57, %v8432_v8  ;;  %v1800_v60 = vadd.f32 %v1799_v1, %v8435_v9 }
 0x451   : > { %v1993_v55 = vadd.f32 %v1992_v5, %v8439_v10  ;;  %v1804_v52 = vadd.f32 %v1803_v50, %v8428_v6  ;;  %v1997_v21 = vadd.f32 %v1996_v63, %v8432_v8  ;;  %v1806_v33 = vadd.f32 %v1805_v4, %v8435_v9  ;;  %v1813_v18 = vpop.f32.mrb[76].mxu0  ;;  %v2006_v27 = vpop.f32.mrb[108].mxu1 }
 0x452   : > { %v2617_v30 = vmax.f32 %v1798_v24, 0.0  ;;  %v2619_v11 = vmax.f32 %v1991_v62, 0.0  ;;  %v2618_v23 = vmax.f32 %v1800_v60, 0.0  ;;  %v1999_v3 = vadd.f32 %v1998_v25, %v8439_v10  ;;  %v1815_v26 = vpop.f32.mrb[77].mxu0  ;;  %v2008_v13 = vpop.f32.mrb[109].mxu1 }
 0x453   : > { %v2620_v57 = vmax.f32 %v1993_v55, 0.0  ;;  %v2625_v2 = vmax.f32 %v1804_v52, 0.0  ;;  %v2627_v1 = vmax.f32 %v1997_v21, 0.0  ;;  %v2626_v42 = vmax.f32 %v1806_v33, 0.0  ;;  %v8658_v5 = vpop.f32.mrb[78].mxu0  ;;  %v8660_v50 = vpop.f32.mrb[110].mxu1 }
 0x454   : > { %v3099_v63 = vmax.f32 %v3098_v46, %v2617_v30  ;;  %v3117_v12 = vmax.f32 %v3116_v48, %v2619_v11  ;;  %v3108_v4 = vmax.f32 %v3107_v49, %v2618_v23  ;;  %v2628_v47 = vmax.f32 %v1999_v3, 0.0  ;;  %v1819_v16 = vpop.f32.mrb[79].mxu0  ;;  %v8662_v31 = vpop.f32.mrb[111].mxu1 }
 0x455   : > { %v3126_v7 = vmax.f32 %v3125_v14, %v2620_v57  ;;  %v1808_v25 = vadd.f32 %v1807_v35, %v8428_v6  ;;  %v2001_v22 = vadd.f32 %v2000_v54, %v8432_v8  ;;  %v1810_v43 = vadd.f32 %v1809_v37, %v8435_v9 }
 0x456   : > { %v3100_v19 = vrot.slane %v3099_v63, 4  ;;  %v3118_v40 = vrot.slane %v3117_v12, 4  ;;  %v3109_v24 = vrot.slane %v3108_v4, 4  ;;  %v2003_v62 = vadd.f32 %v2002_v36, %v8439_v10 }
 0x457   : > { %v3127_v46 = vrot.slane %v3126_v7, 4  ;;  %v2633_v48 = vmax.f32 %v1808_v25, 0.0  ;;  %v2635_v49 = vmax.f32 %v2001_v22, 0.0  ;;  %v2634_v60 = vmax.f32 %v1810_v43, 0.0 }
 0x458   : > { %v3101_v55 = vmax.f32 %v3099_v63, %v3100_v19  ;;  %v3119_v52 = vmax.f32 %v3117_v12, %v3118_v40  ;;  %v3110_v21 = vmax.f32 %v3108_v4, %v3109_v24  ;;  %v2636_v14 = vmax.f32 %v2003_v62, 0.0 }
 0x459   : > { %v3128_v33 = vmax.f32 %v3126_v7, %v3127_v46  ;;  %v3169_v35 = vmax.f32 %v2625_v2, %v2633_v48  ;;  %v3187_v30 = vmax.f32 %v2627_v1, %v2635_v49  ;;  %v3178_v54 = vmax.f32 %v2626_v42, %v2634_v60  ;;  %v2049_v11 = vpop.f32.mrb[80].mxu0  ;;  %v2242_v37 = vpop.f32.mrb[112].mxu1 }
 0x45a   : > { %v3102_v23 = vrot.slane %v3101_v55, 2  ;;  %v3120_v3 = vrot.slane %v3119_v52, 2  ;;  %v3111_v57 = vrot.slane %v3110_v21, 2  ;;  %v3196_v0 = vmax.f32 %v2628_v47, %v2636_v14  ;;  %v2051_v36 = vpop.f32.mrb[81].mxu0  ;;  %v2244_v39 = vpop.f32.mrb[113].mxu1 }
 0x45b   : > { %v3129_v38 = vrot.slane %v3128_v33, 2  ;;  %v1814_v25 = vadd.f32 %v1813_v18, %v8428_v6  ;;  %v2007_v63 = vadd.f32 %v2006_v27, %v8432_v8  ;;  %v1816_v12 = vadd.f32 %v1815_v26, %v8435_v9  ;;  %v8671_v4 = vpop.f32.mrb[82].mxu0  ;;  %v8673_v2 = vpop.f32.mrb[114].mxu1 }
 0x45c   : > { %v3103_v1 = vmax.f32 %v3101_v55, %v3102_v23  ;;  %v3121_v42 = vmax.f32 %v3119_v52, %v3120_v3  ;;  %v3112_v7 = vmax.f32 %v3110_v21, %v3111_v57  ;;  %v2009_v22 = vadd.f32 %v2008_v13, %v8439_v10  ;;  %v2055_v43 = vpop.f32.mrb[83].mxu0  ;;  %v8676_v47 = vpop.f32.mrb[115].mxu1 }
 0x45d   : > { %v3130_v19 = vmax.f32 %v3128_v33, %v3129_v38  ;;  %v2641_v40 = vmax.f32 %v1814_v25, 0.0  ;;  %v2643_v24 = vmax.f32 %v2007_v63, 0.0  ;;  %v2642_v18 = vmax.f32 %v1816_v12, 0.0 }
 0x45e   : > { %v3104_v62 = vrot.slane %v3103_v1, 1  ;;  %v3122_v27 = vrot.slane %v3121_v42, 1  ;;  %v3113_v46 = vrot.slane %v3112_v7, 1  ;;  %v2644_v26 = vmax.f32 %v2009_v22, 0.0 }
 0x45f   : > { %v3131_v48 = vrot.slane %v3130_v19, 1  ;;  %v3170_v49 = vmax.f32 %v3169_v35, %v2641_v40  ;;  %v3188_v60 = vmax.f32 %v3187_v30, %v2643_v24  ;;  %v3179_v14 = vmax.f32 %v3178_v54, %v2642_v18 }
 0x460   : > { %v3105_v55 = vmax.f32 %v3103_v1, %v3104_v62  ;;  %v8678_v52 = vmax.f32 %v3121_v42, %v3122_v27  ;;  %v8680_v21 = vmax.f32 %v3112_v7, %v3113_v46  ;;  %v3197_v13 = vmax.f32 %v3196_v0, %v2644_v26 }
 0x461   : > { %v8682_v23 = vmax.f32 %v3130_v19, %v3131_v48  ;;  %v1818_v38 = vadd.f32 %v8658_v5, %v8428_v6  ;;  %v2011_v33 = vadd.f32 %v8660_v50, %v8432_v8  ;;  %v1820_v3 = vadd.f32 %v1819_v16, %v8435_v9  ;;  %v8689_v57 = vpop.f32.mrb[84].mxu0  ;;  %v8691_v35 = vpop.f32.mrb[116].mxu1  ;;  %v7500_v6 = vld [vmem:[%s9455_s7 + $0x2] sm:$0xff] }
 0x462   : > { %9505 = vst [vmem:[#allocation27_spill] sm:$0xff] %v8678_v52  ;;  %v8695_v30 = vsel %vm3315_vm7, %v3105_v55, %v8647_v17  ;;  %v2013_v0 = vadd.f32 %v8662_v31, %v8439_v10  ;;  %v8704_v8 = vrot.slane %v7500_v6, %v1287_v28  ;;  %v8708_v9 = vrot.slane %v7500_v6, %v1295_v32  ;;  %v8710_v5 = vpop.f32.mrb[85].mxu0  ;;  %v8712_v50 = vpop.f32.mrb[117].mxu1 }
 0x463   : > { %v2649_v17 = vmax.f32 %v1818_v38, 0.0  ;;  %v2651_v16 = vmax.f32 %v2011_v33, 0.0  ;;  %v2650_v54 = vmax.f32 %v1820_v3, 0.0  ;;  %v9506_v10 = vsub.s32 5, %v8410_v53  ;;  %v8718_v25 = vpop.f32.mrb[86].mxu0  ;;  %v8720_v63 = vpop.f32.mrb[118].mxu1 }
 0x464   : > { %v2652_v28 = vmax.f32 %v2013_v0, 0.0  ;;  %v2050_v12 = vadd.f32 %v2049_v11, %v8704_v8  ;;  %v2243_v32 = vadd.f32 %v2242_v37, %v8708_v9  ;;  %v9507_v1 = vsub.s32 7, %v8410_v53  ;;  %v8728_v7 = vpop.f32.mrb[87].mxu0  ;;  %v8730_v22 = vpop.f32.mrb[119].mxu1 }
 0x465   : > { %v8716_v31 = vrot.slane %v7500_v6, %v9506_v10  ;;  %v3171_v19 = vmax.f32 %v3170_v49, %v2649_v17  ;;  %v3189_v40 = vmax.f32 %v3188_v60, %v2651_v16  ;;  %v3180_v24 = vmax.f32 %v3179_v14, %v2650_v54 }
 0x466   : > { %v8726_v42 = vrot.slane %v7500_v6, %v9507_v1  ;;  %v3198_v62 = vmax.f32 %v3197_v13, %v2652_v28  ;;  %v2405_v27 = vmax.f32 %v2050_v12, 0.0  ;;  %v2407_v46 = vmax.f32 %v2243_v32, 0.0 }
 0x467   : > { %v2052_v18 = vadd.f32 %v2051_v36, %v8716_v31  ;;  %v3172_v26 = vrot.slane %v3171_v19, 4  ;;  %v3190_v37 = vrot.slane %v3189_v40, 4  ;;  %v3181_v48 = vrot.slane %v3180_v24, 4 }
 0x468   : > { %v2245_v11 = vadd.f32 %v2244_v39, %v8726_v42  ;;  %v3199_v38 = vrot.slane %v3198_v62, 4  ;;  %v2054_v3 = vadd.f32 %v8671_v4, %v8704_v8  ;;  %v2247_v49 = vadd.f32 %v8673_v2, %v8708_v9 }
 0x469   : > { %v2406_v55 = vmax.f32 %v2052_v18, 0.0  ;;  %v3173_v60 = vmax.f32 %v3171_v19, %v3172_v26  ;;  %v3191_v14 = vmax.f32 %v3189_v40, %v3190_v37  ;;  %v3182_v36 = vmax.f32 %v3180_v24, %v3181_v48  ;;  %v2069_v0 = vpop.f32.mrb[88].mxu0  ;;  %v2262_v6 = vpop.f32.mrb[120].mxu1 }
 0x46a   : > { %v2408_v33 = vmax.f32 %v2245_v11, 0.0  ;;  %v2056_v13 = vadd.f32 %v2055_v43, %v8716_v31  ;;  %v3200_v39 = vmax.f32 %v3198_v62, %v3199_v38  ;;  %v2413_v17 = vmax.f32 %v2054_v3, 0.0  ;;  %v2071_v10 = vpop.f32.mrb[89].mxu0  ;;  %v2264_v28 = vpop.f32.mrb[121].mxu1 }
 0x46b   : > { %v2415_v16 = vmax.f32 %v2247_v49, 0.0  ;;  %v2249_v54 = vadd.f32 %v8676_v47, %v8726_v42  ;;  %v3174_v12 = vrot.slane %v3173_v60, 2  ;;  %v3192_v4 = vrot.slane %v3191_v14, 2  ;;  %v8741_v2 = vpop.f32.mrb[90].mxu0  ;;  %v8743_v19 = vpop.f32.mrb[122].mxu1 }
 0x46c   : > { %v3183_v32 = vrot.slane %v3182_v36, 2  ;;  %v2414_v1 = vmax.f32 %v2056_v13, 0.0  ;;  %v3201_v40 = vrot.slane %v3200_v39, 2  ;;  %v2701_v43 = vmax.f32 %v2405_v27, %v2413_v17  ;;  %v8745_v62 = vpop.f32.mrb[91].mxu0  ;;  %v8747_v11 = vpop.f32.mrb[123].mxu1 }
 0x46d   : > { %v2719_v24 = vmax.f32 %v2407_v46, %v2415_v16  ;;  %v2416_v18 = vmax.f32 %v2249_v54, 0.0  ;;  %v3175_v26 = vmax.f32 %v3173_v60, %v3174_v12  ;;  %v3193_v47 = vmax.f32 %v3191_v14, %v3192_v4 }
 0x46e   : > { %v3184_v37 = vmax.f32 %v3182_v36, %v3183_v32  ;;  %v2710_v48 = vmax.f32 %v2406_v55, %v2414_v1  ;;  %v8749_v38 = vmax.f32 %v3200_v39, %v3201_v40  ;;  %v2060_v49 = vadd.f32 %v8689_v57, %v8704_v8 }
 0x46f   : > { %v2728_v3 = vmax.f32 %v2408_v33, %v2416_v18  ;;  %v2253_v13 = vadd.f32 %v8691_v35, %v8708_v9  ;;  %v3176_v27 = vrot.slane %v3175_v26, 1  ;;  %v3194_v46 = vrot.slane %v3193_v47, 1 }
 0x470   : > { %v3185_v17 = vrot.slane %v3184_v37, 1  ;;  %v2062_v16 = vadd.f32 %v8710_v5, %v8716_v31  ;;  %v2421_v14 = vmax.f32 %v2060_v49, 0.0  ;;  %v2255_v55 = vadd.f32 %v8712_v50, %v8726_v42 }
 0x471   : > { %v2423_v36 = vmax.f32 %v2253_v13, 0.0  ;;  %v8760_v33 = vmax.f32 %v3175_v26, %v3176_v27  ;;  %v8762_v39 = vmax.f32 %v3193_v47, %v3194_v46  ;;  %v2064_v35 = vadd.f32 %v8718_v25, %v8704_v8  ;;  %v8766_v54 = vpop.f32.mrb[92].mxu0  ;;  %v8768_v12 = vpop.f32.mrb[124].mxu1 }
 0x472   : > { %v2422_v57 = vmax.f32 %v2062_v16, 0.0  ;;  %v2702_v5 = vmax.f32 %v2701_v43, %v2421_v14  ;;  %v2424_v32 = vmax.f32 %v2255_v55, 0.0  ;;  %v2257_v1 = vadd.f32 %v8720_v63, %v8708_v9  ;;  %v8772_v40 = vpop.f32.mrb[93].mxu0  ;;  %v8774_v50 = vpop.f32.mrb[125].mxu1 }
 0x473   : > { %9508 = vst [vmem:[#allocation28_spill] sm:$0xff] %v8762_v39  ;;  %v2720_v4 = vmax.f32 %v2719_v24, %v2423_v36  ;;  %v2429_v26 = vmax.f32 %v2064_v35, 0.0  ;;  %v2066_v47 = vadd.f32 %v8728_v7, %v8716_v31  ;;  %v2259_v25 = vadd.f32 %v8730_v22, %v8726_v42  ;;  %v8780_v49 = vpop.f32.mrb[94].mxu0  ;;  %v8782_v43 = vpop.f32.mrb[126].mxu1 }
 0x474   : > { %v2711_v18 = vmax.f32 %v2710_v48, %v2422_v57  ;;  %v2729_v24 = vmax.f32 %v2728_v3, %v2424_v32  ;;  %v2431_v13 = vmax.f32 %v2257_v1, 0.0  ;;  %v2070_v63 = vadd.f32 %v2069_v0, %v8704_v8  ;;  %v8786_v46 = vpop.f32.mrb[95].mxu0  ;;  %v8788_v48 = vpop.f32.mrb[127].mxu1 }
 0x475   : > { %v2263_v27 = vadd.f32 %v2262_v6, %v8708_v9  ;;  %v2703_v16 = vmax.f32 %v2702_v5, %v2429_v26  ;;  %v2430_v14 = vmax.f32 %v2066_v47, 0.0  ;;  %v2432_v7 = vmax.f32 %v2259_v25, 0.0 }
 0x476   : > { %v8791_v36 = vadd.f32 %v2071_v10, %v8716_v31  ;;  %v2721_v22 = vmax.f32 %v2720_v4, %v2431_v13  ;;  %v2437_v55 = vmax.f32 %v2070_v63, 0.0  ;;  %v8794_v3 = vadd.f32 %v2264_v28, %v8726_v42 }
 0x477   : > { %v2439_v57 = vmax.f32 %v2263_v27, 0.0  ;;  %v2704_v35 = vrot.slane %v2703_v16, 4  ;;  %v2712_v0 = vmax.f32 %v2711_v18, %v2430_v14  ;;  %v2730_v32 = vmax.f32 %v2729_v24, %v2432_v7 }
 0x478   : > { %v2722_v1 = vrot.slane %v2721_v22, 4  ;;  %v3186_v5 = vmax.f32 %v3184_v37, %v3185_v17  ;;  %v3321_v4 = vsel %vm3309_vm4, %v8581_v34, %v8563_v51  ;;  %v2074_v13 = vadd.f32 %v8741_v2, %v8704_v8 }
 0x479   : > { %v2705_v26 = vmax.f32 %v2703_v16, %v2704_v35  ;;  %v2713_v47 = vrot.slane %v2712_v0, 4  ;;  %v2731_v10 = vrot.slane %v2730_v32, 4  ;;  %v8801_v25 = vpop.f32.mrb[96].mxu0  ;;  %v8803_v28 = vpop.f32.mrb[128].mxu1  ;;  %v3322_v24 = vsel %vm3311_vm5, %v8609_v44, %v3321_v4 }
 0x47a   : > { %v2723_v18 = vmax.f32 %v2721_v22, %v2722_v1  ;;  %v2267_v37 = vadd.f32 %v8743_v19, %v8708_v9  ;;  %v8811_v17 = vpop.f32.mrb[97].mxu0  ;;  %v8813_v63 = vpop.f32.mrb[129].mxu1  ;;  %v3323_v16 = vsel %vm3313_vm6, %v8641_v29, %v3322_v24  ;;  %v2445_v22 = vmax.f32 %v2074_v13, 0.0  ;;  %v7068_v13 = vld [vmem:[#allocation11 + $0x200] ss:$16 sps:$4 sm:$0xff]  }
 0x47b   : > { %v2706_v27 = vrot.slane %v2705_v26, 2  ;;  %v2714_v51 = vmax.f32 %v2712_v0, %v2713_v47  ;;  %v2732_v34 = vmax.f32 %v2730_v32, %v2731_v10  ;;  %v8817_v14 = vpop.f32.mrb[98].mxu0  ;;  %v8819_v7 = vpop.f32.mrb[130].mxu1  ;;  %v3324_v2 = vsel %vm3315_vm7, %v8680_v21, %v3323_v16 }
 0x47c   : > { %v2724_v44 = vrot.slane %v2723_v18, 2  ;;  %v2447_v19 = vmax.f32 %v2267_v37, 0.0  ;;  %v8823_v35 = vpop.f32.mrb[99].mxu0  ;;  %v8825_v1 = vpop.f32.mrb[131].mxu1  ;;  %v3325_v47 = vsel %vm3317_vm8, %v3186_v5, %v3324_v2  ;;  %v8828_v24 = vmax.f32 %v2437_v55, %v2445_v22  ;;  %v7071_v37 = vld [vmem:[#allocation11 + $0x208] ss:$16 sps:$4 sm:$0xff]  }
 0x47d   : > { %v2707_v4 = vmax.f32 %v2705_v26, %v2706_v27  ;;  %v2715_v0 = vrot.slane %v2714_v51, 2  ;;  %v2733_v32 = vrot.slane %v2732_v34, 2  ;;  %v3407_v10 = vpack.c.bf16 %v3325_v47, %v3325_v47 }
 0x47e   : > { %v2725_v29 = vmax.f32 %v2723_v18, %v2724_v44  ;;  %v8830_v60 = vmax.f32 %v2439_v57, %v2447_v19  ;;  %v3318_v16 = vsel %vm3317_vm8, %v8760_v33, %v8695_v30  ;;  %v2076_v5 = vadd.f32 %v8745_v62, %v8716_v31  ;;  %v7076_v57 = vld [vmem:[#allocation11 + $0x224] ss:$16 sps:$4 sm:$0xff]   ;;  %v7079_v18 = vld [vmem:[#allocation11 + $0x22c] ss:$16 sps:$4 sm:$0xff]  }
 0x47f   : > { %v2708_v6 = vrot.slane %v2707_v4, 1  ;;  %v2716_v53 = vmax.f32 %v2714_v51, %v2715_v0  ;;  %v2734_v21 = vmax.f32 %v2732_v34, %v2733_v32  ;;  %5003 = vmatprep.mubr.bf16.mxu0 %v3407_v10  ;;  %5167 = vmatprep.mubr.bf16.mxu1 %v3407_v10  ;;  %v3406_v27 = vpack.c.bf16 %v3318_v16, %v3318_v16  ;;  %v7077_v10 = vld [vmem:[#allocation11 + $0x228] ss:$16 sps:$4 sm:$0xff]  }
 0x480   : > { %v2726_v26 = vrot.slane %v2725_v29, 1  ;;  %v2269_v55 = vadd.f32 %v8747_v11, %v8726_v42  ;;  %v9509_v2 = vrot.slane %v8749_v38, 1  ;;  %v2446_v62 = vmax.f32 %v2076_v5, 0.0 }
 0x481   : > { %v8839_v51 = vmax.f32 %v2707_v4, %v2708_v6  ;;  %v2717_v34 = vrot.slane %v2716_v53, 1  ;;  %v2735_v44 = vrot.slane %v2734_v21, 1  ;;  %v8844_v33 = vpop.f32.mrb[100].mxu0  ;;  %v8846_v22 = vpop.f32.mrb[132].mxu1  ;;  %5004 = vmatmul.mubr.bf16.vlgmr.msra.gmra.mrb[144].mxu0 %v3406_v27  ;;  %5168 = vmatmul.mubr.bf16.vlgmr.msra.gmra.mrb[176].mxu1 %v3406_v27  ;;  %v3335_v6 = vsel %vm3309_vm4, %v8583_v15, %v8567_v20 }
 0x482   : > { %v3204_v30 = vmax.f32 %v8749_v38, %v9509_v2  ;;  %v8848_v19 = vmax.f32 %v2725_v29, %v2726_v26  ;;  %v2448_v11 = vmax.f32 %v2269_v55, 0.0  ;;  %v8853_v4 = vpop.f32.mrb[101].mxu0  ;;  %v8855_v0 = vpop.f32.mrb[133].mxu1  ;;  %5013 = vmatpush1.bf16.msra.mxu0 %v7068_v13  ;;  %5177 = vmatpush1.bf16.msra.mxu1 %v7071_v37  ;;  %v3336_v47 = vsel %vm3311_vm5, %v8611_v45, %v3335_v6  ;;  %v7074_v29 = vld [vmem:[#allocation11 + $0x220] ss:$16 sps:$4 sm:$0xff]  }
 0x483   : > { %v8857_v32 = vmax.f32 %v2716_v53, %v2717_v34  ;;  %v8859_v38 = vmax.f32 %v2734_v21, %v2735_v44  ;;  %v8863_v16 = vpop.f32.mrb[102].mxu0  ;;  %v8865_v26 = vpop.f32.mrb[134].mxu1  ;;  %v9510_v20 = vmax.f32 %v8791_v36, 0.0  ;;  %v9511_v27 = vmax.f32 %v8794_v3, 0.0  ;;  %5014 = vmatprep.subr.bf16.mxu0 %v7076_v57  ;;  %5178 = vmatprep.subr.bf16.mxu1 %v7079_v18  ;;  %v7082_v13 = vld [vmem:[#allocation11 + $0x244] ss:$16 sps:$4 sm:$0xff]  }
 0x484   : > { %v3337_v21 = vsel %vm3313_vm6, %v8643_v41, %v3336_v47  ;;  %v7085_v37 = vld [vmem:[#allocation11 + $0x24c] ss:$16 sps:$4 sm:$0xff]   ;;  %v8873_v45 = vpop.f32.mrb[103].mxu0  ;;  %v8875_v5 = vpop.f32.mrb[135].mxu1  ;;  %v2080_v36 = vadd.f32 %v8766_v54, %v8704_v8  ;;  %v2273_v3 = vadd.f32 %v8768_v12, %v8708_v9  ;;  %v2082_v41 = vadd.f32 %v8772_v40, %v8716_v31  ;;  %v7080_v34 = vld [vmem:[#allocation11 + $0x240] ss:$16 sps:$4 sm:$0xff]  }
 0x485   : > { %v2782_v15 = vmax.f32 %v9510_v20, %v2446_v62  ;;  %v2800_v53 = vmax.f32 %v9511_v27, %v2448_v11  ;;  %v3338_v55 = vsel %vm3315_vm7, %v8682_v23, %v3337_v21  ;;  %v2275_v18 = vadd.f32 %v8774_v50, %v8726_v42  ;;  %v7083_v44 = vld [vmem:[#allocation11 + $0x248] ss:$16 sps:$4 sm:$0xff]   ;;  %v7088_v40 = vld [vmem:[#allocation11 + $0x264] ss:$16 sps:$4 sm:$0xff]   ;;  %v7091_v20 = vld [vmem:[#allocation11 + $0x26c] ss:$16 sps:$4 sm:$0xff]  }
 0x486   : > { %v3339_v57 = vsel %vm3317_vm8, %v3204_v30, %v3338_v55  ;;  %v2084_v2 = vadd.f32 %v8780_v49, %v8704_v8  ;;  %v2277_v23 = vadd.f32 %v8782_v43, %v8708_v9  ;;  %5015 = vmatpush1.bf16.msra.mxu0 %v7074_v29  ;;  %5179 = vmatpush1.bf16.msra.mxu1 %v7077_v10  ;;  %v2453_v12 = vmax.f32 %v2080_v36, 0.0  ;;  %v7086_v55 = vld [vmem:[#allocation11 + $0x260] ss:$16 sps:$4 sm:$0xff]  }
 0x487   : > { %v3409_v54 = vpack.c.bf16 %v3339_v57, %v3339_v57  ;;  %v2455_v62 = vmax.f32 %v2273_v3, 0.0  ;;  %v2454_v11 = vmax.f32 %v2082_v41, 0.0  ;;  %v2456_v6 = vmax.f32 %v2275_v18, 0.0  ;;  %5016 = vmatprep.subr.bf16.mxu0 %v7082_v13  ;;  %5180 = vmatprep.subr.bf16.mxu1 %v7085_v37  ;;  %v7094_v41 = vld [vmem:[#allocation11 + $0x284] ss:$16 sps:$4 sm:$0xff]  }
 0x488   : > { %v2461_v30 = vmax.f32 %v2084_v2, 0.0  ;;  %v2463_v50 = vmax.f32 %v2277_v23, 0.0  ;;  %v2086_v47 = vadd.f32 %v8786_v46, %v8716_v31  ;;  %v2774_v49 = vmax.f32 %v8828_v24, %v2453_v12 }
 0x489   : > { %5044 = vmatprep.mubr.bf16.mxu0 %v3409_v54  ;;  %5208 = vmatprep.mubr.bf16.mxu1 %v3409_v54  ;;  %v2792_v43 = vmax.f32 %v8830_v60, %v2455_v62  ;;  %v2783_v29 = vmax.f32 %v2782_v15, %v2454_v11  ;;  %v8896_v10 = vpop.f32.mrb[104].mxu0  ;;  %v8898_v27 = vpop.f32.mrb[136].mxu1  ;;  %v2801_v21 = vmax.f32 %v2800_v53, %v2456_v6  ;;  %v7089_v15 = vld [vmem:[#allocation11 + $0x268] ss:$16 sps:$4 sm:$0xff]   ;;  %v7097_v54 = vld [vmem:[#allocation11 + $0x28c] ss:$16 sps:$4 sm:$0xff]  }
 0x48a   : > { %v2462_v13 = vmax.f32 %v2086_v47, 0.0  ;;  %v2279_v37 = vadd.f32 %v8788_v48, %v8726_v42  ;;  %v2090_v46 = vadd.f32 %v8801_v25, %v8704_v8  ;;  %v8904_v36 = vpop.f32.mrb[105].mxu0  ;;  %v8906_v3 = vpop.f32.mrb[137].mxu1  ;;  %v2775_v24 = vmax.f32 %v2774_v49, %v2461_v30  ;;  %5017 = vmatpush1.bf16.msra.mxu0 %v7080_v34  ;;  %5181 = vmatpush1.bf16.msra.mxu1 %v7083_v44  ;;  %v7092_v49 = vld [vmem:[#allocation11 + $0x280] ss:$16 sps:$4 sm:$0xff]  }
 0x48b   : > { %v2793_v60 = vmax.f32 %v2792_v43, %v2463_v50  ;;  %v2283_v53 = vadd.f32 %v8803_v28, %v8708_v9  ;;  %v8910_v57 = vpop.f32.mrb[106].mxu0  ;;  %v8912_v48 = vpop.f32.mrb[138].mxu1  ;;  %5018 = vmatprep.subr.bf16.mxu0 %v7088_v40  ;;  %5182 = vmatprep.subr.bf16.mxu1 %v7091_v20  ;;  %v2092_v23 = vadd.f32 %v8811_v17, %v8716_v31  ;;  %v7095_v43 = vld [vmem:[#allocation11 + $0x288] ss:$16 sps:$4 sm:$0xff]  }
 0x48c   : > { %v2784_v18 = vmax.f32 %v2783_v29, %v2462_v13  ;;  %v2464_v2 = vmax.f32 %v2279_v37, 0.0  ;;  %v2469_v25 = vmax.f32 %v2090_v46, 0.0  ;;  %v8916_v34 = vpop.f32.mrb[107].mxu0  ;;  %v8918_v44 = vpop.f32.mrb[139].mxu1  ;;  %v2776_v12 = vrot.slane %v2775_v24, 4 }
 0x48d   : > { %v2794_v28 = vrot.slane %v2793_v60, 4  ;;  %v2471_v62 = vmax.f32 %v2283_v53, 0.0  ;;  %v2285_v11 = vadd.f32 %v8813_v63, %v8726_v42  ;;  %v2470_v50 = vmax.f32 %v2092_v23, 0.0  ;;  %v7100_v46 = vld [vmem:[#allocation11 + $0x2a4] ss:$16 sps:$4 sm:$0xff]  }
 0x48e   : > { %v2785_v6 = vrot.slane %v2784_v18, 4  ;;  %v2802_v30 = vmax.f32 %v2801_v21, %v2464_v2  ;;  %v2094_v40 = vadd.f32 %v8817_v14, %v8704_v8  ;;  %v2777_v47 = vmax.f32 %v2775_v24, %v2776_v12  ;;  %5019 = vmatpush1.bf16.msra.mxu0 %v7086_v55  ;;  %5183 = vmatpush1.bf16.msra.mxu1 %v7089_v15  ;;  %v7103_v14 = vld [vmem:[#allocation11 + $0x2ac] ss:$16 sps:$4 sm:$0xff]   ;;  %v7098_v53 = vld [vmem:[#allocation11 + $0x2a0] ss:$16 sps:$4 sm:$0xff]  }
 0x48f   : > { %v2795_v20 = vmax.f32 %v2793_v60, %v2794_v28  ;;  %v2472_v17 = vmax.f32 %v2285_v11, 0.0  ;;  %v2287_v29 = vadd.f32 %v8819_v7, %v8708_v9  ;;  %5020 = vmatprep.subr.bf16.mxu0 %v7094_v41  ;;  %5184 = vmatprep.subr.bf16.mxu1 %v7097_v54  ;;  %v2096_v21 = vadd.f32 %v8823_v35, %v8716_v31  ;;  %v7101_v12 = vld [vmem:[#allocation11 + $0x2a8] ss:$16 sps:$4 sm:$0xff]  }
 0x490   : > { %v2786_v13 = vmax.f32 %v2784_v18, %v2785_v6  ;;  %v2803_v37 = vrot.slane %v2802_v30, 4  ;;  %v2477_v63 = vmax.f32 %v2094_v40, 0.0  ;;  %v2778_v24 = vrot.slane %v2777_v47, 2 }
 0x491   : > { %v2796_v60 = vrot.slane %v2795_v20, 2  ;;  %v2479_v55 = vmax.f32 %v2287_v29, 0.0  ;;  %v2289_v15 = vadd.f32 %v8825_v1, %v8726_v42  ;;  %v8930_v2 = vpop.f32.mrb[108].mxu0  ;;  %v8932_v7 = vpop.f32.mrb[140].mxu1  ;;  %v2478_v54 = vmax.f32 %v2096_v21, 0.0 }
 0x492   : > { %v2787_v18 = vrot.slane %v2786_v13, 2  ;;  %v2804_v41 = vmax.f32 %v2802_v30, %v2803_v37  ;;  %v2845_v23 = vmax.f32 %v2469_v25, %v2477_v63  ;;  %v8934_v28 = vpop.f32.mrb[109].mxu0  ;;  %v8936_v35 = vpop.f32.mrb[141].mxu1  ;;  %v2779_v11 = vmax.f32 %v2777_v47, %v2778_v24  ;;  %5021 = vmatpush1.bf16.msra.mxu0 %v7092_v49  ;;  %5185 = vmatpush1.bf16.msra.mxu1 %v7095_v43  ;;  %v7106_v29 = vld [vmem:[#allocation11 + $0x2c4] ss:$16 sps:$4 sm:$0xff]  }
 0x493   : > { %v2797_v6 = vmax.f32 %v2795_v20, %v2796_v60  ;;  %v2863_v40 = vmax.f32 %v2471_v62, %v2479_v55  ;;  %v2480_v1 = vmax.f32 %v2289_v15, 0.0  ;;  %v8938_v61 = vpop.f32.mrb[110].mxu0  ;;  %v8940_v59 = vpop.f32.mrb[142].mxu1  ;;  %v2854_v25 = vmax.f32 %v2470_v50, %v2478_v54  ;;  %5022 = vmatprep.subr.bf16.mxu0 %v7100_v46  ;;  %5186 = vmatprep.subr.bf16.mxu1 %v7103_v14  ;;  %v7109_v63 = vld [vmem:[#allocation11 + $0x2cc] ss:$16 sps:$4 sm:$0xff]  }
 0x494   : > { %v2788_v39 = vmax.f32 %v2786_v13, %v2787_v18  ;;  %v2805_v30 = vrot.slane %v2804_v41, 2  ;;  %v2100_v37 = vadd.f32 %v8844_v33, %v8704_v8  ;;  %v8944_v47 = vpop.f32.mrb[111].mxu0  ;;  %v8946_v62 = vpop.f32.mrb[143].mxu1  ;;  %v2780_v20 = vrot.slane %v2779_v11, 1  ;;  %v7104_v15 = vld [vmem:[#allocation11 + $0x2c0] ss:$16 sps:$4 sm:$0xff]  }
 0x495   : > { %v2798_v49 = vrot.slane %v2797_v6, 1  ;;  %v2872_v43 = vmax.f32 %v2472_v17, %v2480_v1  ;;  %v2293_v21 = vadd.f32 %v8846_v22, %v8708_v9  ;;  %v2102_v50 = vadd.f32 %v8853_v4, %v8716_v31  ;;  %v7107_v18 = vld [vmem:[#allocation11 + $0x2c8] ss:$16 sps:$4 sm:$0xff]  }
 0x496   : > { %v2789_v24 = vrot.slane %v2788_v39, 1  ;;  %v2806_v13 = vmax.f32 %v2804_v41, %v2805_v30  ;;  %v2485_v60 = vmax.f32 %v2100_v37, 0.0  ;;  %v2781_v46 = vmax.f32 %v2779_v11, %v2780_v20  ;;  %5023 = vmatpush1.bf16.msra.mxu0 %v7098_v53  ;;  %5187 = vmatpush1.bf16.msra.mxu1 %v7101_v12  ;;  %v7112_v41 = vld [vmem:[#allocation11 + $0x2e4] ss:$16 sps:$4 sm:$0xff]   ;;  %v7115_v30 = vld [vmem:[#allocation11 + $0x2ec] ss:$16 sps:$4 sm:$0xff]  }
 0x497   : > { %v2799_v14 = vmax.f32 %v2797_v6, %v2798_v49  ;;  %v2487_v33 = vmax.f32 %v2293_v21, 0.0  ;;  %v2295_v55 = vadd.f32 %v8855_v0, %v8726_v42  ;;  %v2486_v22 = vmax.f32 %v2102_v50, 0.0  ;;  %5024 = vmatprep.subr.bf16.mxu0 %v7106_v29  ;;  %5188 = vmatprep.subr.bf16.mxu1 %v7109_v63  ;;  %v7110_v37 = vld [vmem:[#allocation11 + $0x2e0] ss:$16 sps:$4 sm:$0xff]   ;;  %v7113_v49 = vld [vmem:[#allocation11 + $0x2e8] ss:$16 sps:$4 sm:$0xff]  }
 0x498   : > { %v2790_v17 = vmax.f32 %v2788_v39, %v2789_v24  ;;  %v2807_v54 = vrot.slane %v2806_v13, 1  ;;  %v2846_v1 = vmax.f32 %v2845_v23, %v2485_v60  ;;  %v8956_v4 = vsel %vm3305_vm2, %v2781_v46, %v8839_v51  ;;  %v7118_v21 = vld [vmem:[#allocation11 + $0x304] ss:$16 sps:$4 sm:$0xff]  }
 0x499   : > { %v8960_v53 = vsel %vm3305_vm2, %v2799_v14, %v8848_v19  ;;  %v2864_v12 = vmax.f32 %v2863_v40, %v2487_v33  ;;  %v2488_v0 = vmax.f32 %v2295_v55, 0.0  ;;  %v8962_v11 = vpop.f32.mrb[112].mxu0  ;;  %v8964_v39 = vpop.f32.mrb[144].mxu1  ;;  %v2855_v29 = vmax.f32 %v2854_v25, %v2486_v22 }
 0x49a   : > { %v8968_v23 = vsel %vm3305_vm2, %v2790_v17, %v8857_v32  ;;  %v2808_v6 = vmax.f32 %v2806_v13, %v2807_v54  ;;  %v2104_v51 = vadd.f32 %v8863_v16, %v8704_v8  ;;  %v8972_v63 = vpop.f32.mrb[113].mxu0  ;;  %v8974_v19 = vpop.f32.mrb[145].mxu1  ;;  %v2297_v20 = vadd.f32 %v8865_v26, %v8708_v9  ;;  %5025 = vmatpush1.bf16.msra.mxu0 %v7104_v15 }
 0x49b   : > { %v2873_v40 = vmax.f32 %v2872_v43, %v2488_v0  ;;  %5189 = vmatpush1.bf16.msra.mxu1 %v7107_v18  ;;  %v2106_v32 = vadd.f32 %v8873_v45, %v8716_v31  ;;  %v8980_v25 = vpop.f32.mrb[114].mxu0  ;;  %v8982_v24 = vpop.f32.mrb[146].mxu1  ;;  %v2299_v43 = vadd.f32 %v8875_v5, %v8726_v42  ;;  %5026 = vmatprep.subr.bf16.mxu0 %v7112_v41  ;;  %v7121_v45 = vld [vmem:[#allocation11 + $0x30c] ss:$16 sps:$4 sm:$0xff]   ;;  %v7116_v41 = vld [vmem:[#allocation11 + $0x300] ss:$16 sps:$4 sm:$0xff]  }
 0x49c   : > { %v8986_v16 = vsel %vm3305_vm2, %v2808_v6, %v8859_v38  ;;  %v2493_v13 = vmax.f32 %v2104_v51, 0.0  ;;  %5190 = vmatprep.subr.bf16.mxu1 %v7115_v30  ;;  %v2110_v26 = vadd.f32 %v8896_v10, %v8704_v8  ;;  %v8992_v60 = vpop.f32.mrb[115].mxu0  ;;  %v8994_v50 = vpop.f32.mrb[147].mxu1  ;;  %v2495_v46 = vmax.f32 %v2297_v20, 0.0  ;;  %v7119_v30 = vld [vmem:[#allocation11 + $0x308] ss:$16 sps:$4 sm:$0xff]  }
 0x49d   : > { %v2494_v14 = vmax.f32 %v2106_v32, 0.0  ;;  %v2303_v38 = vadd.f32 %v8898_v27, %v8708_v9  ;;  %v2112_v33 = vadd.f32 %v8904_v36, %v8716_v31  ;;  %v2496_v5 = vmax.f32 %v2299_v43, 0.0  ;;  %v7127_v51 = vld [vmem:[#allocation11 + $0x32c] ss:$16 sps:$4 sm:$0xff]   ;;  %v7125_v43 = vld [vmem:[#allocation11 + $0x328] ss:$16 sps:$4 sm:$0xff]  }
 0x49e   : > { %v2847_v55 = vmax.f32 %v2846_v1, %v2493_v13  ;;  %v2501_v15 = vmax.f32 %v2110_v26, 0.0  ;;  %v2305_v18 = vadd.f32 %v8906_v3, %v8726_v42  ;;  %v2865_v10 = vmax.f32 %v2864_v12, %v2495_v46  ;;  %5027 = vmatpush1.bf16.msra.mxu0 %v7110_v37  ;;  %v7124_v1 = vld [vmem:[#allocation11 + $0x324] ss:$16 sps:$4 sm:$0xff]   ;;  %v7122_v37 = vld [vmem:[#allocation11 + $0x320] ss:$16 sps:$4 sm:$0xff]  }
 0x49f   : > { %v2856_v17 = vmax.f32 %v2855_v29, %v2494_v14  ;;  %5191 = vmatpush1.bf16.msra.mxu1 %v7113_v49  ;;  %v2503_v54 = vmax.f32 %v2303_v38, 0.0  ;;  %v2502_v22 = vmax.f32 %v2112_v33, 0.0  ;;  %v2874_v6 = vmax.f32 %v2873_v40, %v2496_v5  ;;  %5028 = vmatprep.subr.bf16.mxu0 %v7118_v21  ;;  %v7130_v38 = vld [vmem:[#allocation11 + $0x344] ss:$16 sps:$4 sm:$0xff]  }
 0x4a0   : > { %v2848_v0 = vrot.slane %v2847_v55, 4  ;;  %v2504_v27 = vmax.f32 %v2305_v18, 0.0  ;;  %5192 = vmatprep.subr.bf16.mxu1 %v7121_v45  ;;  %v2114_v36 = vadd.f32 %v8910_v57, %v8704_v8  ;;  %v2866_v20 = vrot.slane %v2865_v10, 4 }
 0x4a1   : > { %v2857_v3 = vrot.slane %v2856_v17, 4  ;;  %v2307_v12 = vadd.f32 %v8912_v48, %v8708_v9  ;;  %v2116_v29 = vadd.f32 %v8916_v34, %v8716_v31  ;;  %v9008_v32 = vpop.f32.mrb[116].mxu0  ;;  %v9010_v40 = vpop.f32.mrb[148].mxu1  ;;  %v2875_v21 = vrot.slane %v2874_v6, 4 }
 0x4a2   : > { %v2849_v49 = vmax.f32 %v2847_v55, %v2848_v0  ;;  %v2509_v13 = vmax.f32 %v2114_v36, 0.0  ;;  %v2309_v57 = vadd.f32 %v8918_v44, %v8726_v42  ;;  %v9014_v26 = vpop.f32.mrb[117].mxu0  ;;  %v9016_v45 = vpop.f32.mrb[149].mxu1  ;;  %v2867_v48 = vmax.f32 %v2865_v10, %v2866_v20  ;;  %5029 = vmatpush1.bf16.msra.mxu0 %v7116_v41  ;;  %v7133_v36 = vld [vmem:[#allocation11 + $0x34c] ss:$16 sps:$4 sm:$0xff]  }
 0x4a3   : > { %v2858_v46 = vmax.f32 %v2856_v17, %v2857_v3  ;;  %v2511_v14 = vmax.f32 %v2307_v12, 0.0  ;;  %5193 = vmatpush1.bf16.msra.mxu1 %v7119_v30  ;;  %v2510_v34 = vmax.f32 %v2116_v29, 0.0  ;;  %v9018_v33 = vpop.f32.mrb[118].mxu0  ;;  %v9020_v55 = vpop.f32.mrb[150].mxu1  ;;  %v2876_v18 = vmax.f32 %v2874_v6, %v2875_v21  ;;  %5030 = vmatprep.subr.bf16.mxu0 %v7124_v1  ;;  %v7131_v21 = vld [vmem:[#allocation11 + $0x348] ss:$16 sps:$4 sm:$0xff]  }
 0x4a4   : > { %v2850_v5 = vrot.slane %v2849_v49, 2  ;;  %v2917_v0 = vmax.f32 %v2501_v15, %v2509_v13  ;;  %v2512_v44 = vmax.f32 %v2309_v57, 0.0  ;;  %5194 = vmatprep.subr.bf16.mxu1 %v7127_v51  ;;  %v9022_v52 = vpop.f32.mrb[119].mxu0  ;;  %v9024_v10 = vpop.f32.mrb[151].mxu1  ;;  %v2868_v17 = vrot.slane %v2867_v48, 2 }
 0x4a5   : > { %v2859_v41 = vrot.slane %v2858_v46, 2  ;;  %v2935_v30 = vmax.f32 %v2503_v54, %v2511_v14  ;;  %v2926_v20 = vmax.f32 %v2502_v22, %v2510_v34  ;;  %v2877_v12 = vrot.slane %v2876_v18, 2  ;;  %v7128_v51 = vld [vmem:[#allocation11 + $0x340] ss:$16 sps:$4 sm:$0xff]   ;;  %v7136_v22 = vld [vmem:[#allocation11 + $0x364] ss:$16 sps:$4 sm:$0xff]  }
 0x4a6   : > { %v2851_v3 = vmax.f32 %v2849_v49, %v2850_v5  ;;  %v2944_v29 = vmax.f32 %v2504_v27, %v2512_v44  ;;  %v2120_v56 = vadd.f32 %v8930_v2, %v8704_v8  ;;  %v2869_v6 = vmax.f32 %v2867_v48, %v2868_v17  ;;  %5031 = vmatpush1.bf16.msra.mxu0 %v7122_v37  ;;  %v7139_v27 = vld [vmem:[#allocation11 + $0x36c] ss:$16 sps:$4 sm:$0xff]   ;;  %v7134_v5 = vld [vmem:[#allocation11 + $0x360] ss:$16 sps:$4 sm:$0xff]  }
 0x4a7   : > { %v2860_v15 = vmax.f32 %v2858_v46, %v2859_v41  ;;  %5195 = vmatpush1.bf16.msra.mxu1 %v7125_v43  ;;  %v2313_v1 = vadd.f32 %v8932_v7, %v8708_v9  ;;  %v2878_v57 = vmax.f32 %v2876_v18, %v2877_v12  ;;  %v2122_v54 = vadd.f32 %v8934_v28, %v8716_v31 }
 0x4a8   : > { %v2852_v13 = vrot.slane %v2851_v3, 1  ;;  %v2517_v58 = vmax.f32 %v2120_v56, 0.0  ;;  %5032 = vmatprep.subr.bf16.mxu0 %v7130_v38  ;;  %5196 = vmatprep.subr.bf16.mxu1 %v7133_v36  ;;  %v2870_v2 = vrot.slane %v2869_v6, 1  ;;  %v2315_v37 = vadd.f32 %v8936_v35, %v8726_v42  ;;  %v7137_v35 = vld [vmem:[#allocation11 + $0x368] ss:$16 sps:$4 sm:$0xff]  }
 0x4a9   : > { %v2861_v49 = vrot.slane %v2860_v15, 1  ;;  %v2519_v48 = vmax.f32 %v2313_v1, 0.0  ;;  %v9034_v43 = vpop.f32.mrb[120].mxu0  ;;  %v9036_v7 = vpop.f32.mrb[152].mxu1  ;;  %v2879_v14 = vrot.slane %v2878_v57, 1  ;;  %v2518_v34 = vmax.f32 %v2122_v54, 0.0 }
 0x4aa   : > { %v2853_v46 = vmax.f32 %v2851_v3, %v2852_v13  ;;  %v2918_v56 = vmax.f32 %v2917_v0, %v2517_v58  ;;  %v9038_v28 = vpop.f32.mrb[121].mxu0  ;;  %v9040_v38 = vpop.f32.mrb[153].mxu1  ;;  %v2871_v18 = vmax.f32 %v2869_v6, %v2870_v2  ;;  %v2520_v17 = vmax.f32 %v2315_v37, 0.0  ;;  %5033 = vmatpush1.bf16.msra.mxu0 %v7128_v51  ;;  %v7142_v6 = vld [vmem:[#allocation11 + $0x384] ss:$16 sps:$4 sm:$0xff]  }
 0x4ab   : > { %v2862_v44 = vmax.f32 %v2860_v15, %v2861_v49  ;;  %v2936_v36 = vmax.f32 %v2935_v30, %v2519_v48  ;;  %5197 = vmatpush1.bf16.msra.mxu1 %v7131_v21  ;;  %v9042_v41 = vpop.f32.mrb[122].mxu0  ;;  %v9044_v12 = vpop.f32.mrb[154].mxu1  ;;  %v2880_v0 = vmax.f32 %v2878_v57, %v2879_v14  ;;  %v2927_v3 = vmax.f32 %v2926_v20, %v2518_v34  ;;  %v7145_v30 = vld [vmem:[#allocation11 + $0x38c] ss:$16 sps:$4 sm:$0xff]   ;;  %v7148_v48 = vld [vmem:[#allocation11 + $0x3a4] ss:$16 sps:$4 sm:$0xff]  }
 0x4ac   : > { %v9048_v58 = vsel %vm3307_vm3, %v2853_v46, %v8956_v4  ;;  %v2124_v1 = vadd.f32 %v8938_v61, %v8704_v8  ;;  %5034 = vmatprep.subr.bf16.mxu0 %v7136_v22  ;;  %v9052_v15 = vpop.f32.mrb[123].mxu0  ;;  %v9054_v51 = vpop.f32.mrb[155].mxu1  ;;  %v9058_v21 = vsel %vm3307_vm3, %v2871_v18, %v8960_v53  ;;  %v2945_v13 = vmax.f32 %v2944_v29, %v2520_v17  ;;  %v7140_v29 = vld [vmem:[#allocation11 + $0x380] ss:$16 sps:$4 sm:$0xff]   ;;  %v7151_v37 = vld [vmem:[#allocation11 + $0x3ac] ss:$16 sps:$4 sm:$0xff]  }
 0x4ad   : > { %v9062_v4 = vsel %vm3307_vm3, %v2862_v44, %v8968_v23  ;;  %v2317_v20 = vadd.f32 %v8940_v59, %v8708_v9  ;;  %5198 = vmatprep.subr.bf16.mxu1 %v7139_v27  ;;  %v9068_v61 = vsel %vm3307_vm3, %v2880_v0, %v8986_v16  ;;  %v2126_v54 = vadd.f32 %v8944_v47, %v8716_v31  ;;  %v7143_v27 = vld [vmem:[#allocation11 + $0x388] ss:$16 sps:$4 sm:$0xff]  }
 0x4ae   : > { %9512 = vst [vmem:[#allocation29_spill] sm:$0xff] %v9062_v4  ;;  %9513 = vst [vmem:[#allocation30_spill] sm:$0xff] %v9068_v61  ;;  %v2525_v57 = vmax.f32 %v2124_v1, 0.0  ;;  %v2319_v53 = vadd.f32 %v8946_v62, %v8726_v42  ;;  %5035 = vmatpush1.bf16.msra.mxu0 %v7134_v5  ;;  %v2130_v23 = vadd.f32 %v8962_v11, %v8704_v8 }
 0x4af   : > { %v2527_v22 = vmax.f32 %v2317_v20, 0.0  ;;  %5199 = vmatpush1.bf16.msra.mxu1 %v7137_v35  ;;  %v2323_v59 = vadd.f32 %v8964_v39, %v8708_v9  ;;  %v2132_v16 = vadd.f32 %v8972_v63, %v8716_v31  ;;  %v2526_v49 = vmax.f32 %v2126_v54, 0.0  ;;  %5036 = vmatprep.subr.bf16.mxu0 %v7142_v6  ;;  %v7146_v39 = vld [vmem:[#allocation11 + $0x3a0] ss:$16 sps:$4 sm:$0xff]   ;;  %v7149_v35 = vld [vmem:[#allocation11 + $0x3a8] ss:$16 sps:$4 sm:$0xff]  }
 0x4b0   : > { %v2919_v2 = vmax.f32 %v2918_v56, %v2525_v57  ;;  %v2528_v47 = vmax.f32 %v2319_v53, 0.0  ;;  %v2325_v62 = vadd.f32 %v8974_v19, %v8726_v42  ;;  %5200 = vmatprep.subr.bf16.mxu1 %v7145_v30  ;;  %v2533_v11 = vmax.f32 %v2130_v23, 0.0 }
 0x4b1   : > { %v2937_v46 = vmax.f32 %v2936_v36, %v2527_v22  ;;  %v2535_v14 = vmax.f32 %v2323_v59, 0.0  ;;  %v2534_v34 = vmax.f32 %v2132_v16, 0.0  ;;  %v9082_v5 = vpop.f32.mrb[124].mxu0  ;;  %v9084_v63 = vpop.f32.mrb[156].mxu1  ;;  %v2928_v56 = vmax.f32 %v2927_v3, %v2526_v49  ;;  %v7154_v3 = vld [vmem:[#allocation11 + $0x3c4] ss:$16 sps:$4 sm:$0xff]  }
 0x4b2   : > { %v2920_v18 = vrot.slane %v2919_v2, 4  ;;  %v2946_v44 = vmax.f32 %v2945_v13, %v2528_v47  ;;  %v2536_v17 = vmax.f32 %v2325_v62, 0.0  ;;  %v9086_v0 = vpop.f32.mrb[125].mxu0  ;;  %v9088_v19 = vpop.f32.mrb[157].mxu1  ;;  %v2134_v36 = vadd.f32 %v8980_v25, %v8704_v8  ;;  %5037 = vmatpush1.bf16.msra.mxu0 %v7140_v29  ;;  %v7157_v25 = vld [vmem:[#allocation11 + $0x3cc] ss:$16 sps:$4 sm:$0xff]  }
 0x4b3   : > { %v2938_v1 = vrot.slane %v2937_v46, 4  ;;  %v2327_v6 = vadd.f32 %v8982_v24, %v8708_v9  ;;  %5201 = vmatpush1.bf16.msra.mxu1 %v7143_v27  ;;  %v2136_v30 = vadd.f32 %v8992_v60, %v8716_v31  ;;  %v9096_v13 = vpop.f32.mrb[126].mxu0  ;;  %v9098_v20 = vpop.f32.mrb[158].mxu1  ;;  %v2929_v54 = vrot.slane %v2928_v56, 4  ;;  %5038 = vmatprep.subr.bf16.mxu0 %v7148_v48  ;;  %v7155_v48 = vld [vmem:[#allocation11 + $0x3c8] ss:$16 sps:$4 sm:$0xff]  }
 0x4b4   : > { %9514 = vst [vmem:[#allocation31_spill] sm:$0xff] %v9098_v20  ;;  %v2921_v57 = vmax.f32 %v2919_v2, %v2920_v18  ;;  %v2947_v53 = vrot.slane %v2946_v44, 4  ;;  %v2329_v22 = vadd.f32 %v8994_v50, %v8726_v42  ;;  %5202 = vmatprep.subr.bf16.mxu1 %v7151_v37  ;;  %v9102_v24 = vpop.f32.mrb[127].mxu0  ;;  %v9104_v23 = vpop.f32.mrb[159].mxu1  ;;  %v2541_v60 = vmax.f32 %v2134_v36, 0.0 }
 0x4b5   : > { %9515 = vst [vmem:[#allocation32_spill] sm:$0xff] %v9102_v24  ;;  %9516 = vst [vmem:[#allocation33_spill] sm:$0xff] %v9104_v23  ;;  %v2939_v59 = vmax.f32 %v2937_v46, %v2938_v1  ;;  %v2543_v16 = vmax.f32 %v2327_v6, 0.0  ;;  %v2542_v29 = vmax.f32 %v2136_v30, 0.0  ;;  %v2930_v49 = vmax.f32 %v2928_v56, %v2929_v54  ;;  %v7152_v50 = vld [vmem:[#allocation11 + $0x3c0] ss:$16 sps:$4 sm:$0xff]  }
 0x4b6   : > { %v2922_v27 = vrot.slane %v2921_v57, 2  ;;  %v2948_v47 = vmax.f32 %v2946_v44, %v2947_v53  ;;  %v2544_v2 = vmax.f32 %v2329_v22, 0.0  ;;  %v2989_v18 = vmax.f32 %v2533_v11, %v2541_v60  ;;  %5039 = vmatpush1.bf16.msra.mxu0 %v7146_v39  ;;  %v7160_v46 = vld [vmem:[#allocation11 + $0x3e4] ss:$16 sps:$4 sm:$0xff]   ;;  %v7163_v1 = vld [vmem:[#allocation11 + $0x3ec] ss:$16 sps:$4 sm:$0xff]  }
 0x4b7   : > { %v2940_v62 = vrot.slane %v2939_v59, 2  ;;  %v3007_v61 = vmax.f32 %v2535_v14, %v2543_v16  ;;  %v2998_v4 = vmax.f32 %v2534_v34, %v2542_v29  ;;  %5203 = vmatpush1.bf16.msra.mxu1 %v7149_v35  ;;  %v2931_v24 = vrot.slane %v2930_v49, 2  ;;  %5040 = vmatprep.subr.bf16.mxu0 %v7154_v3  ;;  %v7158_v34 = vld [vmem:[#allocation11 + $0x3e0] ss:$16 sps:$4 sm:$0xff]   ;;  %v7161_v3 = vld [vmem:[#allocation11 + $0x3e8] ss:$16 sps:$4 sm:$0xff]  }
 0x4b8   : > { %v2923_v37 = vmax.f32 %v2921_v57, %v2922_v27  ;;  %v2949_v20 = vrot.slane %v2948_v47, 2  ;;  %v3016_v23 = vmax.f32 %v2536_v17, %v2544_v2  ;;  %5204 = vmatprep.subr.bf16.mxu1 %v7157_v25  ;;  %v2140_v56 = vadd.f32 %v9008_v32, %v8704_v8  ;;  %v7166_v2 = vld [vmem:[#allocation11 + $0x404] ss:$16 sps:$4 sm:$0xff]  }
 0x4b9   : > { %v2941_v36 = vmax.f32 %v2939_v59, %v2940_v62  ;;  %v2333_v11 = vadd.f32 %v9010_v40, %v8708_v9  ;;  %v2142_v14 = vadd.f32 %v9014_v26, %v8716_v31  ;;  %v9112_v39 = vpop.f32.mrb[128].mxu0  ;;  %v9114_v44 = vpop.f32.mrb[160].mxu1  ;;  %v2932_v35 = vmax.f32 %v2930_v49, %v2931_v24  ;;  %v7169_v62 = vld [vmem:[#allocation11 + $0x40c] ss:$16 sps:$4 sm:$0xff]  }
 0x4ba   : > { %v2924_v17 = vrot.slane %v2923_v37, 1  ;;  %v2950_v6 = vmax.f32 %v2948_v47, %v2949_v20  ;;  %v2335_v30 = vadd.f32 %v9016_v45, %v8726_v42  ;;  %v9118_v57 = vpop.f32.mrb[129].mxu0  ;;  %v9120_v32 = vpop.f32.mrb[161].mxu1  ;;  %v2549_v54 = vmax.f32 %v2140_v56, 0.0  ;;  %5041 = vmatpush1.bf16.msra.mxu0 %v7152_v50 }
 0x4bb   : > { %v2942_v40 = vrot.slane %v2941_v36, 1  ;;  %v2551_v53 = vmax.f32 %v2333_v11, 0.0  ;;  %v2550_v26 = vmax.f32 %v2142_v14, 0.0  ;;  %5205 = vmatpush1.bf16.msra.mxu1 %v7155_v48  ;;  %v9122_v22 = vpop.f32.mrb[130].mxu0  ;;  %v9124_v25 = vpop.f32.mrb[162].mxu1  ;;  %v2933_v20 = vrot.slane %v2932_v35, 1  ;;  %5042 = vmatprep.subr.bf16.mxu0 %v7160_v46 }
 0x4bc   : > { %v2925_v24 = vmax.f32 %v2923_v37, %v2924_v17  ;;  %v2951_v59 = vrot.slane %v2950_v6, 1  ;;  %v2552_v60 = vmax.f32 %v2335_v30, 0.0  ;;  %5206 = vmatprep.subr.bf16.mxu1 %v7163_v1  ;;  %v9126_v45 = vpop.f32.mrb[131].mxu0  ;;  %v9128_v16 = vpop.f32.mrb[163].mxu1  ;;  %v2990_v27 = vmax.f32 %v2989_v18, %v2549_v54 }
 0x4bd   : > { %v2943_v29 = vmax.f32 %v2941_v36, %v2942_v40  ;;  %v3008_v49 = vmax.f32 %v3007_v61, %v2551_v53  ;;  %v2999_v47 = vmax.f32 %v2998_v4, %v2550_v26  ;;  %v9134_v48 = vmax.f32 %v2932_v35, %v2933_v20  ;;  %v9519_v53 = vld [vmem:[#allocation25_spill] sm:$0xff]  ;;  %v9520_v26 = vld [vmem:[#allocation26_spill] sm:$0xff] }
 0x4be   : > { %v9132_v50 = vsel %vm3309_vm4, %v2925_v24, %v9048_v58  ;;  %v9136_v37 = vmax.f32 %v2950_v6, %v2951_v59  ;;  %v3017_v46 = vmax.f32 %v3016_v23, %v2552_v60  ;;  %v2144_v18 = vadd.f32 %v9018_v33, %v8704_v8  ;;  %5043 = vmatpush1.bf16.msra.mxu0 %v7158_v34 }
 0x4bf   : > { %9517 = vst [vmem:[#allocation34_spill] sm:$0xff] %v9134_v48  ;;  %v9140_v1 = vsel %vm3309_vm4, %v2943_v29, %v9058_v21  ;;  %v2337_v4 = vadd.f32 %v9020_v55, %v8708_v9  ;;  %v2146_v61 = vadd.f32 %v9022_v52, %v8716_v31  ;;  %v2339_v58 = vadd.f32 %v9024_v10, %v8726_v42 }
 0x4c0   : > { %9518 = vst [vmem:[#allocation35_spill] sm:$0xff] %v9136_v37  ;;  %5207 = vmatpush1.bf16.msra.mxu1 %v7161_v3  ;;  %v2150_v23 = vadd.f32 %v9034_v43, %v8704_v8  ;;  %v2343_v21 = vadd.f32 %v9036_v7, %v8708_v9  ;;  %v9156_v33 = vadd.f32 %v9038_v28, %v8716_v31  ;;  %v2557_v36 = vmax.f32 %v2144_v18, 0.0 }
 0x4c1   : > { %v2559_v55 = vmax.f32 %v2337_v4, 0.0  ;;  %v2558_v56 = vmax.f32 %v2146_v61, 0.0  ;;  %v9160_v52 = vadd.f32 %v9040_v38, %v8726_v42  ;;  %5053 = vmatprep.subr.bf16.mxu0 %v7166_v2  ;;  %5217 = vmatprep.subr.bf16.mxu1 %v7169_v62  ;;  %v9162_v10 = vpop.f32.mrb[132].mxu0  ;;  %v9164_v11 = vpop.f32.mrb[164].mxu1  ;;  %v2560_v43 = vmax.f32 %v2339_v58, 0.0  ;;  %v9521_v2 = vld [vmem:[#allocation27_spill] sm:$0xff] }
 0x4c2   : > { %v2565_v14 = vmax.f32 %v2150_v23, 0.0  ;;  %v2567_v7 = vmax.f32 %v2343_v21, 0.0  ;;  %v9167_v28 = vpop.f32.mrb[133].mxu0  ;;  %v9169_v17 = vpop.f32.mrb[165].mxu1  ;;  %v2991_v35 = vmax.f32 %v2990_v27, %v2557_v36  ;;  %v3330_v24 = vsel %vm3313_vm6, %v9520_v26, %v9519_v53  ;;  %v9522_v4 = vld [vmem:[#allocation28_spill] sm:$0xff] }
 0x4c3   : > { %v3009_v6 = vmax.f32 %v3008_v49, %v2559_v55  ;;  %v3000_v30 = vmax.f32 %v2999_v47, %v2558_v56  ;;  %v9172_v3 = vpop.f32.mrb[134].mxu0  ;;  %v9174_v40 = vpop.f32.mrb[166].mxu1  ;;  %v3018_v54 = vmax.f32 %v3017_v46, %v2560_v43  ;;  %v2154_v20 = vadd.f32 %v9042_v41, %v8704_v8  ;;  %v7164_v46 = vld [vmem:[#allocation11 + $0x400] ss:$16 sps:$4 sm:$0xff]   ;;  %v7167_v58 = vld [vmem:[#allocation11 + $0x408] ss:$16 sps:$4 sm:$0xff]  }
 0x4c4   : > { %v2347_v59 = vadd.f32 %v9044_v12, %v8708_v9  ;;  %v9183_v60 = vpop.f32.mrb[135].mxu0  ;;  %v9185_v29 = vpop.f32.mrb[167].mxu1  ;;  %v2992_v27 = vrot.slane %v2991_v35, 4  ;;  %v3331_v62 = vsel %vm3315_vm7, %v9521_v2, %v3330_v24  ;;  %v7172_v56 = vld [vmem:[#allocation11 + $0x424] ss:$16 sps:$4 sm:$0xff]   ;;  %v2156_v24 = vadd.f32 %v9052_v15, %v8716_v31 }
 0x4c5   : > { %v3010_v49 = vrot.slane %v3009_v6, 4  ;;  %v3001_v47 = vrot.slane %v3000_v30, 4  ;;  %v3019_v18 = vrot.slane %v3018_v54, 4  ;;  %v3332_v61 = vsel %vm3317_vm8, %v9522_v4, %v3331_v62  ;;  %v7175_v43 = vld [vmem:[#allocation11 + $0x42c] ss:$16 sps:$4 sm:$0xff]  }
 0x4c6   : > { %v2573_v41 = vmax.f32 %v2154_v20, 0.0  ;;  %v2575_v23 = vmax.f32 %v2347_v59, 0.0  ;;  %v2993_v21 = vmax.f32 %v2991_v35, %v2992_v27  ;;  %v3408_v55 = vpack.c.bf16 %v3332_v61, %v3332_v61  ;;  %v7170_v2 = vld [vmem:[#allocation11 + $0x420] ss:$16 sps:$4 sm:$0xff]  }
 0x4c7   : > { %v3011_v12 = vmax.f32 %v3009_v6, %v3010_v49  ;;  %v3002_v36 = vmax.f32 %v3000_v30, %v3001_v47  ;;  %v3020_v53 = vmax.f32 %v3018_v54, %v3019_v18  ;;  %v2349_v35 = vadd.f32 %v9054_v51, %v8726_v42 }
 0x4c8   : > { %v3061_v26 = vmax.f32 %v2565_v14, %v2573_v41  ;;  %v3079_v38 = vmax.f32 %v2567_v7, %v2575_v23  ;;  %v2994_v34 = vrot.slane %v2993_v21, 2  ;;  %5045 = vmatmul.mubr.bf16.vlgmr.msra.gmra.mrb[144].mxu0 %v3408_v55  ;;  %5209 = vmatmul.mubr.bf16.vlgmr.msra.gmra.mrb[176].mxu1 %v3408_v55  ;;  %v2574_v14 = vmax.f32 %v2156_v24, 0.0  ;;  %v7173_v7 = vld [vmem:[#allocation11 + $0x428] ss:$16 sps:$4 sm:$0xff]   ;;  %v7181_v23 = vld [vmem:[#allocation11 + $0x44c] ss:$16 sps:$4 sm:$0xff]  }
 0x4c9   : > { %v3012_v37 = vrot.slane %v3011_v12, 2  ;;  %v3003_v48 = vrot.slane %v3002_v36, 2  ;;  %v9195_v6 = vpop.f32.mrb[136].mxu0  ;;  %v9197_v30 = vpop.f32.mrb[168].mxu1  ;;  %v3021_v20 = vrot.slane %v3020_v53, 2  ;;  %5054 = vmatpush1.bf16.msra.mxu0 %v7164_v46  ;;  %5218 = vmatpush1.bf16.msra.mxu1 %v7167_v58  ;;  %v2160_v15 = vadd.f32 %v9082_v5, %v8704_v8 }
 0x4ca   : > { %v2353_v54 = vadd.f32 %v9084_v63, %v8708_v9  ;;  %v9203_v59 = vpop.f32.mrb[137].mxu0  ;;  %v9205_v27 = vpop.f32.mrb[169].mxu1  ;;  %v2995_v51 = vmax.f32 %v2993_v21, %v2994_v34  ;;  %v2576_v62 = vmax.f32 %v2349_v35, 0.0  ;;  %5055 = vmatprep.subr.bf16.mxu0 %v7172_v56  ;;  %5219 = vmatprep.subr.bf16.mxu1 %v7175_v43  ;;  %v7178_v46 = vld [vmem:[#allocation11 + $0x444] ss:$16 sps:$4 sm:$0xff]   ;;  %v9523_v5 = vmax.f32 %v9156_v33, 0.0 }
 0x4cb   : > { %v3013_v49 = vmax.f32 %v3011_v12, %v3012_v37  ;;  %v3004_v47 = vmax.f32 %v3002_v36, %v3003_v48  ;;  %v9207_v18 = vpop.f32.mrb[138].mxu0  ;;  %v9209_v4 = vpop.f32.mrb[170].mxu1  ;;  %v3022_v61 = vmax.f32 %v3020_v53, %v3021_v20  ;;  %v2581_v63 = vmax.f32 %v2160_v15, 0.0  ;;  %v7176_v24 = vld [vmem:[#allocation11 + $0x440] ss:$16 sps:$4 sm:$0xff]  }
 0x4cc   : > { %v3070_v58 = vmax.f32 %v9523_v5, %v2574_v14  ;;  %v2583_v41 = vmax.f32 %v2353_v54, 0.0  ;;  %v9213_v55 = vpop.f32.mrb[139].mxu0  ;;  %v9215_v34 = vpop.f32.mrb[171].mxu1  ;;  %v2996_v48 = vrot.slane %v2995_v51, 1  ;;  %v9524_v12 = vmax.f32 %v9160_v52, 0.0 }
 0x4cd   : > { %v3014_v37 = vrot.slane %v3013_v49, 1  ;;  %v3005_v21 = vrot.slane %v3004_v47, 1  ;;  %v3023_v56 = vrot.slane %v3022_v61, 1  ;;  %5056 = vmatpush1.bf16.msra.mxu0 %v7170_v2  ;;  %5220 = vmatpush1.bf16.msra.mxu1 %v7173_v7  ;;  %v3062_v43 = vmax.f32 %v3061_v26, %v2581_v63  ;;  %v7179_v35 = vld [vmem:[#allocation11 + $0x448] ss:$16 sps:$4 sm:$0xff]  }
 0x4ce   : > { %v3088_v36 = vmax.f32 %v9524_v12, %v2576_v62  ;;  %v3080_v53 = vmax.f32 %v3079_v38, %v2583_v41  ;;  %v2162_v33 = vadd.f32 %v9086_v0, %v8716_v31  ;;  %v2997_v20 = vmax.f32 %v2995_v51, %v2996_v48  ;;  %5057 = vmatprep.subr.bf16.mxu0 %v7178_v46  ;;  %v7184_v52 = vld [vmem:[#allocation11 + $0x464] ss:$16 sps:$4 sm:$0xff]   ;;  %v7187_v62 = vld [vmem:[#allocation11 + $0x46c] ss:$16 sps:$4 sm:$0xff]   ;;  %v7182_v46 = vld [vmem:[#allocation11 + $0x460] ss:$16 sps:$4 sm:$0xff]  }
 0x4cf   : > { %v3015_v14 = vmax.f32 %v3013_v49, %v3014_v37  ;;  %v9221_v15 = vmax.f32 %v3004_v47, %v3005_v21  ;;  %v2355_v54 = vadd.f32 %v9088_v19, %v8726_v42  ;;  %v9225_v5 = vmax.f32 %v3022_v61, %v3023_v56  ;;  %5221 = vmatprep.subr.bf16.mxu1 %v7181_v23  ;;  %v9527_v0 = vld [vmem:[#allocation31_spill] sm:$0xff]  ;;  %v9529_v49 = vld [vmem:[#allocation32_spill] sm:$0xff] }
 0x4d0   : > { %v2582_v2 = vmax.f32 %v2162_v33, 0.0  ;;  %v2164_v38 = vadd.f32 %v9096_v13, %v8704_v8  ;;  %v2357_v26 = vadd.f32 %v9527_v0, %v8708_v9  ;;  %v9233_v7 = vsel %vm3311_vm5, %v2997_v20, %v9132_v50  ;;  %v7185_v61 = vld [vmem:[#allocation11 + $0x468] ss:$16 sps:$4 sm:$0xff]   ;;  %v7190_v37 = vld [vmem:[#allocation11 + $0x484] ss:$16 sps:$4 sm:$0xff]  }
 0x4d1   : > { %9525 = vst [vmem:[#allocation25_spill] sm:$0xff] %v9221_v15  ;;  %9526 = vst [vmem:[#allocation26_spill] sm:$0xff] %v9225_v5  ;;  %v9237_v19 = vsel %vm3311_vm5, %v3015_v14, %v9140_v1  ;;  %v2584_v51 = vmax.f32 %v2355_v54, 0.0  ;;  %v2166_v47 = vadd.f32 %v9529_v49, %v8716_v31  ;;  %v9241_v63 = vpop.f32.mrb[140].mxu0  ;;  %5058 = vmatpush1.bf16.msra.mxu0 %v7176_v24  ;;  %5222 = vmatpush1.bf16.msra.mxu1 %v7179_v35  ;;  %v9530_v50 = vld [vmem:[#allocation33_spill] sm:$0xff] }
 0x4d2   : > { %9528 = vst [vmem:[#allocation27_spill] sm:$0xff] %v9237_v19  ;;  %v3071_v13 = vmax.f32 %v3070_v58, %v2582_v2  ;;  %v2589_v41 = vmax.f32 %v2164_v38, 0.0  ;;  %v2591_v23 = vmax.f32 %v2357_v26, 0.0  ;;  %v2359_v48 = vadd.f32 %v9530_v50, %v8726_v42  ;;  %v9245_v21 = vpop.f32.mrb[172].mxu1  ;;  %v9247_v1 = vpop.f32.mrb[141].mxu0  ;;  %5059 = vmatprep.subr.bf16.mxu0 %v7184_v52  ;;  %5223 = vmatprep.subr.bf16.mxu1 %v7187_v62 }
 0x4d3   : > { %v3089_v12 = vmax.f32 %v3088_v36, %v2584_v51  ;;  %v2590_v56 = vmax.f32 %v2166_v47, 0.0  ;;  %v2170_v33 = vadd.f32 %v9112_v39, %v8704_v8  ;;  %v2363_v58 = vadd.f32 %v9114_v44, %v8708_v9  ;;  %v7193_v24 = vld [vmem:[#allocation11 + $0x48c] ss:$16 sps:$4 sm:$0xff]   ;;  %v9253_v35 = vpop.f32.mrb[173].mxu1  ;;  %v9255_v20 = vpop.f32.mrb[142].mxu0 }
 0x4d4   : > { %v3063_v14 = vmax.f32 %v3062_v43, %v2589_v41  ;;  %v3081_v54 = vmax.f32 %v3080_v53, %v2591_v23  ;;  %v2592_v2 = vmax.f32 %v2359_v48, 0.0  ;;  %v2172_v36 = vadd.f32 %v9118_v57, %v8716_v31  ;;  %v9259_v38 = vpop.f32.mrb[174].mxu1  ;;  %v9261_v52 = vpop.f32.mrb[143].mxu0  ;;  %v7188_v26 = vld [vmem:[#allocation11 + $0x480] ss:$16 sps:$4 sm:$0xff]  }
 0x4d5   : > { %v3072_v62 = vmax.f32 %v3071_v13, %v2590_v56  ;;  %v2597_v39 = vmax.f32 %v2170_v33, 0.0  ;;  %v2599_v0 = vmax.f32 %v2363_v58, 0.0  ;;  %v2365_v44 = vadd.f32 %v9120_v32, %v8726_v42  ;;  %v9265_v51 = vpop.f32.mrb[175].mxu1  ;;  %5060 = vmatpush1.bf16.msra.mxu0 %v7182_v46  ;;  %5224 = vmatpush1.bf16.msra.mxu1 %v7185_v61  ;;  %v7191_v57 = vld [vmem:[#allocation11 + $0x488] ss:$16 sps:$4 sm:$0xff]  }
 0x4d6   : > { %v3064_v49 = vrot.slane %v3063_v14, 4  ;;  %v3082_v43 = vrot.slane %v3081_v54, 4  ;;  %v3090_v53 = vmax.f32 %v3089_v12, %v2592_v2  ;;  %v2598_v47 = vmax.f32 %v2172_v36, 0.0  ;;  %5061 = vmatprep.subr.bf16.mxu0 %v7190_v37  ;;  %5225 = vmatprep.subr.bf16.mxu1 %v7193_v24  ;;  %v7196_v50 = vld [vmem:[#allocation11 + $0x4a4] ss:$16 sps:$4 sm:$0xff]  }
 0x4d7   : > { %v3073_v41 = vrot.slane %v3072_v62, 4  ;;  %v2600_v23 = vmax.f32 %v2365_v44, 0.0  ;;  %v2174_v13 = vadd.f32 %v9122_v22, %v8704_v8  ;;  %v2367_v32 = vadd.f32 %v9124_v25, %v8708_v9  ;;  %v7199_v48 = vld [vmem:[#allocation11 + $0x4ac] ss:$16 sps:$4 sm:$0xff]   ;;  %v7194_v24 = vld [vmem:[#allocation11 + $0x4a0] ss:$16 sps:$4 sm:$0xff]  }
 0x4d8   : > { %v3065_v56 = vmax.f32 %v3063_v14, %v3064_v49  ;;  %v3083_v33 = vmax.f32 %v3081_v54, %v3082_v43  ;;  %v3091_v58 = vrot.slane %v3090_v53, 4  ;;  %v2176_v46 = vadd.f32 %v9126_v45, %v8716_v31  ;;  %v7197_v5 = vld [vmem:[#allocation11 + $0x4a8] ss:$16 sps:$4 sm:$0xff]   ;;  %v7202_v45 = vld [vmem:[#allocation11 + $0x4c4] ss:$16 sps:$4 sm:$0xff]  }
 0x4d9   : > { %v3074_v61 = vmax.f32 %v3072_v62, %v3073_v41  ;;  %v2605_v12 = vmax.f32 %v2174_v13, 0.0  ;;  %v2607_v2 = vmax.f32 %v2367_v32, 0.0  ;;  %v2369_v37 = vadd.f32 %v9128_v16, %v8726_v42  ;;  %5062 = vmatpush1.bf16.msra.mxu0 %v7188_v26  ;;  %5226 = vmatpush1.bf16.msra.mxu1 %v7191_v57  ;;  %v7205_v62 = vld [vmem:[#allocation11 + $0x4cc] ss:$16 sps:$4 sm:$0xff]  }
 0x4da   : > { %v3066_v36 = vrot.slane %v3065_v56, 2  ;;  %v3084_v22 = vrot.slane %v3083_v33, 2  ;;  %v3092_v44 = vmax.f32 %v3090_v53, %v3091_v58  ;;  %v2606_v25 = vmax.f32 %v2176_v46, 0.0  ;;  %5063 = vmatprep.subr.bf16.mxu0 %v7196_v50  ;;  %5227 = vmatprep.subr.bf16.mxu1 %v7199_v48  ;;  %v7200_v48 = vld [vmem:[#allocation11 + $0x4c0] ss:$16 sps:$4 sm:$0xff]  }
 0x4db   : > { %v3075_v14 = vrot.slane %v3074_v61, 2  ;;  %v3133_v54 = vmax.f32 %v2597_v39, %v2605_v12  ;;  %v3151_v49 = vmax.f32 %v2599_v0, %v2607_v2  ;;  %v2608_v43 = vmax.f32 %v2369_v37, 0.0  ;;  %v7211_v12 = vld [vmem:[#allocation11 + $0x4ec] ss:$16 sps:$4 sm:$0xff]  }
 0x4dc   : > { %v3067_v41 = vmax.f32 %v3065_v56, %v3066_v36  ;;  %v3085_v13 = vmax.f32 %v3083_v33, %v3084_v22  ;;  %v3093_v32 = vrot.slane %v3092_v44, 2  ;;  %v3142_v16 = vmax.f32 %v2598_v47, %v2606_v25  ;;  %v7203_v56 = vld [vmem:[#allocation11 + $0x4c8] ss:$16 sps:$4 sm:$0xff]   ;;  %v7206_v25 = vld [vmem:[#allocation11 + $0x4e0] ss:$16 sps:$4 sm:$0xff]  }
 0x4dd   : > { %v3076_v15 = vmax.f32 %v3074_v61, %v3075_v14  ;;  %v3160_v19 = vmax.f32 %v2600_v23, %v2608_v43  ;;  %v2180_v26 = vadd.f32 %v9162_v10, %v8704_v8  ;;  %v2373_v53 = vadd.f32 %v9164_v11, %v8708_v9  ;;  %5064 = vmatpush1.bf16.msra.mxu0 %v7194_v24  ;;  %v7208_v10 = vld [vmem:[#allocation11 + $0x4e4] ss:$16 sps:$4 sm:$0xff]  }
 0x4de   : > { %v3068_v57 = vrot.slane %v3067_v41, 1  ;;  %v3086_v39 = vrot.slane %v3085_v13, 1  ;;  %v3094_v0 = vmax.f32 %v3092_v44, %v3093_v32  ;;  %5228 = vmatpush1.bf16.msra.mxu1 %v7197_v5  ;;  %v2182_v50 = vadd.f32 %v9167_v28, %v8716_v31  ;;  %5065 = vmatprep.subr.bf16.mxu0 %v7202_v45  ;;  %v7214_v43 = vld [vmem:[#allocation11 + $0x504] ss:$16 sps:$4 sm:$0xff]  }
 0x4df   : > { %v3077_v33 = vrot.slane %v3076_v15, 1  ;;  %v2613_v47 = vmax.f32 %v2180_v26, 0.0  ;;  %v2615_v58 = vmax.f32 %v2373_v53, 0.0  ;;  %v2375_v23 = vadd.f32 %v9169_v17, %v8726_v42  ;;  %5229 = vmatprep.subr.bf16.mxu1 %v7205_v62 }
 0x4e0   : > { %v9283_v11 = vmax.f32 %v3067_v41, %v3068_v57  ;;  %v9285_v46 = vmax.f32 %v3085_v13, %v3086_v39  ;;  %v3095_v61 = vrot.slane %v3094_v0, 1  ;;  %v2614_v5 = vmax.f32 %v2182_v50, 0.0  ;;  %v7212_v57 = vld [vmem:[#allocation11 + $0x500] ss:$16 sps:$4 sm:$0xff]   ;;  %v7215_v50 = vld [vmem:[#allocation11 + $0x508] ss:$16 sps:$4 sm:$0xff]  }
 0x4e1   : > { %v9287_v2 = vmax.f32 %v3076_v15, %v3077_v33  ;;  %v3134_v28 = vmax.f32 %v3133_v54, %v2613_v47  ;;  %v3152_v37 = vmax.f32 %v3151_v49, %v2615_v58  ;;  %v2616_v24 = vmax.f32 %v2375_v23, 0.0  ;;  %5066 = vmatpush1.bf16.msra.mxu0 %v7200_v48  ;;  %v7209_v49 = vld [vmem:[#allocation11 + $0x4e8] ss:$16 sps:$4 sm:$0xff]   ;;  %v7220_v48 = vld [vmem:[#allocation11 + $0x524] ss:$16 sps:$4 sm:$0xff]  }
 0x4e2   : > { %v9289_v36 = vmax.f32 %v3094_v0, %v3095_v61  ;;  %v3143_v22 = vmax.f32 %v3142_v16, %v2614_v5  ;;  %v2184_v17 = vadd.f32 %v9172_v3, %v8704_v8  ;;  %v2377_v44 = vadd.f32 %v9174_v40, %v8708_v9  ;;  %5230 = vmatpush1.bf16.msra.mxu1 %v7203_v56  ;;  %v7223_v47 = vld [vmem:[#allocation11 + $0x52c] ss:$16 sps:$4 sm:$0xff]  }
 0x4e3   : > { %v3161_v14 = vmax.f32 %v3160_v19, %v2616_v24  ;;  %v2186_v15 = vadd.f32 %v9183_v60, %v8716_v31  ;;  %v2379_v54 = vadd.f32 %v9185_v29, %v8726_v42  ;;  %5067 = vmatprep.subr.bf16.mxu0 %v7208_v10  ;;  %5231 = vmatprep.subr.bf16.mxu1 %v7211_v12  ;;  %v7217_v19 = vld [vmem:[#allocation11 + $0x50c] ss:$16 sps:$4 sm:$0xff]   ;;  %v7218_v24 = vld [vmem:[#allocation11 + $0x520] ss:$16 sps:$4 sm:$0xff]  }
 0x4e4   : > { %v2621_v45 = vmax.f32 %v2184_v17, 0.0  ;;  %v2623_v62 = vmax.f32 %v2377_v44, 0.0  ;;  %v2190_v3 = vadd.f32 %v9195_v6, %v8704_v8  ;;  %v2383_v40 = vadd.f32 %v9197_v30, %v8708_v9  ;;  %v7221_v44 = vld [vmem:[#allocation11 + $0x528] ss:$16 sps:$4 sm:$0xff]  }
 0x4e5   : > { %v2622_v41 = vmax.f32 %v2186_v15, 0.0  ;;  %v2624_v13 = vmax.f32 %v2379_v54, 0.0  ;;  %v2192_v60 = vadd.f32 %v9203_v59, %v8716_v31  ;;  %v2385_v29 = vadd.f32 %v9205_v27, %v8726_v42  ;;  %5068 = vmatpush1.bf16.msra.mxu0 %v7206_v25  ;;  %v7226_v54 = vld [vmem:[#allocation11 + $0x544] ss:$16 sps:$4 sm:$0xff]  }
 0x4e6   : > { %v3135_v32 = vmax.f32 %v3134_v28, %v2621_v45  ;;  %v3153_v16 = vmax.f32 %v3152_v37, %v2623_v62  ;;  %v2629_v26 = vmax.f32 %v2190_v3, 0.0  ;;  %v2631_v53 = vmax.f32 %v2383_v40, 0.0  ;;  %5232 = vmatpush1.bf16.msra.mxu1 %v7209_v49  ;;  %5069 = vmatprep.subr.bf16.mxu0 %v7214_v43 }
 0x4e7   : > { %v3144_v39 = vmax.f32 %v3143_v22, %v2622_v41  ;;  %v3162_v6 = vmax.f32 %v3161_v14, %v2624_v13  ;;  %v2630_v0 = vmax.f32 %v2192_v60, 0.0  ;;  %v2632_v30 = vmax.f32 %v2385_v29, 0.0  ;;  %5233 = vmatprep.subr.bf16.mxu1 %v7217_v19  ;;  %v7224_v13 = vld [vmem:[#allocation11 + $0x540] ss:$16 sps:$4 sm:$0xff]  }
 0x4e8   : > { %v3136_v56 = vrot.slane %v3135_v32, 4  ;;  %v3154_v33 = vrot.slane %v3153_v16, 4  ;;  %v2194_v59 = vadd.f32 %v9207_v18, %v8704_v8  ;;  %v2387_v27 = vadd.f32 %v9209_v4, %v8708_v9 }
 0x4e9   : > { %v3145_v58 = vrot.slane %v3144_v39, 4  ;;  %v3163_v23 = vrot.slane %v3162_v6, 4  ;;  %v2196_v10 = vadd.f32 %v9213_v55, %v8716_v31  ;;  %v2389_v61 = vadd.f32 %v9215_v34, %v8726_v42  ;;  %5070 = vmatpush1.bf16.msra.mxu0 %v7212_v57  ;;  %v7229_v34 = vld [vmem:[#allocation11 + $0x54c] ss:$16 sps:$4 sm:$0xff]  }
 0x4ea   : > { %v3137_v5 = vmax.f32 %v3135_v32, %v3136_v56  ;;  %v3155_v12 = vmax.f32 %v3153_v16, %v3154_v33  ;;  %v2637_v28 = vmax.f32 %v2194_v59, 0.0  ;;  %v2639_v37 = vmax.f32 %v2387_v27, 0.0  ;;  %5234 = vmatpush1.bf16.msra.mxu1 %v7215_v50  ;;  %5071 = vmatprep.subr.bf16.mxu0 %v7220_v48  ;;  %v7235_v48 = vld [vmem:[#allocation11 + $0x56c] ss:$16 sps:$4 sm:$0xff]   ;;  %v7230_v27 = vld [vmem:[#allocation11 + $0x560] ss:$16 sps:$4 sm:$0xff]  }
 0x4eb   : > { %v3146_v22 = vmax.f32 %v3144_v39, %v3145_v58  ;;  %v3164_v18 = vmax.f32 %v3162_v6, %v3163_v23  ;;  %v2638_v17 = vmax.f32 %v2196_v10, 0.0  ;;  %v2640_v4 = vmax.f32 %v2389_v61, 0.0  ;;  %5235 = vmatprep.subr.bf16.mxu1 %v7223_v47  ;;  %v7233_v10 = vld [vmem:[#allocation11 + $0x568] ss:$16 sps:$4 sm:$0xff]   ;;  %v7238_v61 = vld [vmem:[#allocation11 + $0x584] ss:$16 sps:$4 sm:$0xff]  }
 0x4ec   : > { %v3138_v25 = vrot.slane %v3137_v5, 2  ;;  %v3156_v14 = vrot.slane %v3155_v12, 2  ;;  %v3205_v15 = vmax.f32 %v2629_v26, %v2637_v28  ;;  %v3223_v55 = vmax.f32 %v2631_v53, %v2639_v37  ;;  %v7227_v26 = vld [vmem:[#allocation11 + $0x548] ss:$16 sps:$4 sm:$0xff]  }
 0x4ed   : > { %v3147_v49 = vrot.slane %v3146_v22, 2  ;;  %v3165_v43 = vrot.slane %v3164_v18, 2  ;;  %v3214_v45 = vmax.f32 %v2630_v0, %v2638_v17  ;;  %v3232_v62 = vmax.f32 %v2632_v30, %v2640_v4  ;;  %5072 = vmatpush1.bf16.msra.mxu0 %v7218_v24  ;;  %v7241_v24 = vld [vmem:[#allocation11 + $0x58c] ss:$16 sps:$4 sm:$0xff]  }
 0x4ee   : > { %v3139_v3 = vmax.f32 %v3137_v5, %v3138_v25  ;;  %v3157_v40 = vmax.f32 %v3155_v12, %v3156_v14  ;;  %v2200_v19 = vadd.f32 %v9241_v63, %v8704_v8  ;;  %v2393_v41 = vadd.f32 %v9245_v21, %v8708_v9  ;;  %5236 = vmatpush1.bf16.msra.mxu1 %v7221_v44  ;;  %v7232_v63 = vld [vmem:[#allocation11 + $0x564] ss:$16 sps:$4 sm:$0xff]   ;;  %v9534_v4 = vld [vmem:[#allocation35_spill] sm:$0xff]  ;;  %v7236_v25 = vld [vmem:[#allocation11 + $0x580] ss:$16 sps:$4 sm:$0xff]  }
 0x4ef   : > { %v3148_v60 = vmax.f32 %v3146_v22, %v3147_v49  ;;  %v3166_v29 = vmax.f32 %v3164_v18, %v3165_v43  ;;  %v2202_v32 = vadd.f32 %v9247_v1, %v8716_v31  ;;  %v2395_v16 = vadd.f32 %v9253_v35, %v8726_v42  ;;  %5073 = vmatprep.subr.bf16.mxu0 %v7226_v54  ;;  %v9531_v22 = vld [vmem:[#allocation29_spill] sm:$0xff]  ;;  %v9532_v18 = vld [vmem:[#allocation34_spill] sm:$0xff] }
 0x4f0   : > { %v3140_v53 = vrot.slane %v3139_v3, 1  ;;  %v3158_v57 = vrot.slane %v3157_v40, 1  ;;  %v2645_v39 = vmax.f32 %v2200_v19, 0.0  ;;  %v2647_v6 = vmax.f32 %v2393_v41, 0.0  ;;  %5237 = vmatprep.subr.bf16.mxu1 %v7229_v34  ;;  %v7239_v14 = vld [vmem:[#allocation11 + $0x588] ss:$16 sps:$4 sm:$0xff]  }
 0x4f1   : > { %v3149_v0 = vrot.slane %v3148_v60, 1  ;;  %v3167_v21 = vrot.slane %v3166_v29, 1  ;;  %v2646_v30 = vmax.f32 %v2202_v32, 0.0  ;;  %v2648_v50 = vmax.f32 %v2395_v16, 0.0  ;;  %5074 = vmatpush1.bf16.msra.mxu0 %v7224_v13  ;;  %v9537_v54 = vld [vmem:[#allocation26_spill] sm:$0xff] }
 0x4f2   : > { %v3141_v56 = vmax.f32 %v3139_v3, %v3140_v53  ;;  %v3159_v33 = vmax.f32 %v3157_v40, %v3158_v57  ;;  %v3206_v59 = vmax.f32 %v3205_v15, %v2645_v39  ;;  %v3224_v1 = vmax.f32 %v3223_v55, %v2647_v6  ;;  %5238 = vmatpush1.bf16.msra.mxu1 %v7227_v26  ;;  %v7244_v15 = vld [vmem:[#allocation11 + $0x5a4] ss:$16 sps:$4 sm:$0xff]   ;;  %v9536_v55 = vld [vmem:[#allocation25_spill] sm:$0xff]  ;;  %v7242_v32 = vld [vmem:[#allocation11 + $0x5a0] ss:$16 sps:$4 sm:$0xff]  }
 0x4f3   : > { %v3150_v35 = vmax.f32 %v3148_v60, %v3149_v0  ;;  %v3168_v47 = vmax.f32 %v3166_v29, %v3167_v21  ;;  %v3215_v58 = vmax.f32 %v3214_v45, %v2646_v30  ;;  %v3233_v23 = vmax.f32 %v3232_v62, %v2648_v50  ;;  %5075 = vmatprep.subr.bf16.mxu0 %v7232_v63  ;;  %v7247_v62 = vld [vmem:[#allocation11 + $0x5ac] ss:$16 sps:$4 sm:$0xff]   ;;  %v7245_v16 = vld [vmem:[#allocation11 + $0x5a8] ss:$16 sps:$4 sm:$0xff]   ;;  %v7250_v26 = vld [vmem:[#allocation11 + $0x5c4] ss:$16 sps:$4 sm:$0xff]  }
 0x4f4   : > { %v2204_v5 = vadd.f32 %v9255_v20, %v8704_v8  ;;  %v2397_v12 = vadd.f32 %v9259_v38, %v8708_v9  ;;  %v2206_v28 = vadd.f32 %v9261_v52, %v8716_v31  ;;  %v2399_v37 = vadd.f32 %v9265_v51, %v8726_v42  ;;  %5239 = vmatprep.subr.bf16.mxu1 %v7235_v48  ;;  %v9533_v20 = vld [vmem:[#allocation30_spill] sm:$0xff]  ;;  %v9535_v38 = vld [vmem:[#allocation27_spill] sm:$0xff] }
 0x4f5   : > { %v3349_v17 = vsel %vm3309_vm4, %v9532_v18, %v9531_v22  ;;  %v3344_v8 = vsel %vm3313_vm6, %v9283_v11, %v9233_v7  ;;  %v3363_v9 = vsel %vm3309_vm4, %v9534_v4, %v9533_v20  ;;  %v3358_v31 = vsel %vm3313_vm6, %v9285_v46, %v9535_v38  ;;  %5076 = vmatpush1.bf16.msra.mxu0 %v7230_v27  ;;  %v7253_v63 = vld [vmem:[#allocation11 + $0x5cc] ss:$16 sps:$4 sm:$0xff]   ;;  %v7248_v48 = vld [vmem:[#allocation11 + $0x5c0] ss:$16 sps:$4 sm:$0xff]  }
 0x4f6   : > { %v2653_v42 = vmax.f32 %v2204_v5, 0.0  ;;  %v2655_v52 = vmax.f32 %v2397_v12, 0.0  ;;  %v2654_v51 = vmax.f32 %v2206_v28, 0.0  ;;  %v2656_v44 = vmax.f32 %v2399_v37, 0.0  ;;  %5240 = vmatpush1.bf16.msra.mxu1 %v7233_v10  ;;  %5077 = vmatprep.subr.bf16.mxu0 %v7238_v61  ;;  %v7254_v5 = vld [vmem:[#allocation11 + $0x5e0] ss:$16 sps:$4 sm:$0xff]  }
 0x4f7   : > { %v3350_v7 = vsel %vm3311_vm5, %v9536_v55, %v3349_v17  ;;  %v9346_v11 = vsel %vm3315_vm7, %v3141_v56, %v3344_v8  ;;  %v3364_v34 = vsel %vm3311_vm5, %v9537_v54, %v3363_v9  ;;  %5241 = vmatprep.subr.bf16.mxu1 %v7241_v24  ;;  %v3359_v19 = vsel %vm3315_vm7, %v3159_v33, %v3358_v31  ;;  %v7251_v56 = vld [vmem:[#allocation11 + $0x5c8] ss:$16 sps:$4 sm:$0xff]   ;;  %v7256_v33 = vld [vmem:[#allocation11 + $0x5e4] ss:$16 sps:$4 sm:$0xff]   ;;  %v7265_v18 = vld [vmem:[#allocation11 + $0x60c] ss:$16 sps:$4 sm:$0xff]  }
 0x4f8   : > { %v3207_v46 = vmax.f32 %v3206_v59, %v2653_v42  ;;  %v3225_v49 = vmax.f32 %v3224_v1, %v2655_v52  ;;  %v3216_v43 = vmax.f32 %v3215_v58, %v2654_v51  ;;  %v3234_v45 = vmax.f32 %v3233_v23, %v2656_v44  ;;  %v7257_v12 = vld [vmem:[#allocation11 + $0x5e8] ss:$16 sps:$4 sm:$0xff]   ;;  %v7262_v28 = vld [vmem:[#allocation11 + $0x604] ss:$16 sps:$4 sm:$0xff]   ;;  %v7260_v31 = vld [vmem:[#allocation11 + $0x600] ss:$16 sps:$4 sm:$0xff]  }
 0x4f9   : > { %v3351_v3 = vsel %vm3313_vm6, %v9287_v2, %v3350_v7  ;;  %v3365_v40 = vsel %vm3313_vm6, %v9289_v36, %v3364_v34  ;;  %5078 = vmatpush1.bf16.msra.mxu0 %v7236_v25  ;;  %v7263_v42 = vld [vmem:[#allocation11 + $0x608] ss:$16 sps:$4 sm:$0xff]   ;;  %v7268_v51 = vld [vmem:[#allocation11 + $0x624] ss:$16 sps:$4 sm:$0xff]   ;;  %v7271_v44 = vld [vmem:[#allocation11 + $0x62c] ss:$16 sps:$4 sm:$0xff]  }
 0x4fa   : > { %v3208_v41 = vrot.slane %v3207_v46, 4  ;;  %v3226_v13 = vrot.slane %v3225_v49, 4  ;;  %v3217_v60 = vrot.slane %v3216_v43, 4  ;;  %v3235_v29 = vrot.slane %v3234_v45, 4  ;;  %5242 = vmatpush1.bf16.msra.mxu1 %v7239_v14  ;;  %5079 = vmatprep.subr.bf16.mxu0 %v7244_v15  ;;  %v7266_v14 = vld [vmem:[#allocation11 + $0x620] ss:$16 sps:$4 sm:$0xff]  }
 0x4fb   : > { %v3352_v53 = vsel %vm3315_vm7, %v3150_v35, %v3351_v3  ;;  %v3366_v57 = vsel %vm3315_vm7, %v3168_v47, %v3365_v40  ;;  %5243 = vmatprep.subr.bf16.mxu1 %v7247_v62  ;;  %v7259_v47 = vld [vmem:[#allocation11 + $0x5ec] ss:$16 sps:$4 sm:$0xff]   ;;  %v7269_v15 = vld [vmem:[#allocation11 + $0x628] ss:$16 sps:$4 sm:$0xff]   ;;  %v7274_v55 = vld [vmem:[#allocation11 + $0x644] ss:$16 sps:$4 sm:$0xff]  }
 0x4fc   : > { %v3209_v2 = vmax.f32 %v3207_v46, %v3208_v41  ;;  %v3227_v39 = vmax.f32 %v3225_v49, %v3226_v13  ;;  %v3218_v6 = vmax.f32 %v3216_v43, %v3217_v60  ;;  %v3236_v36 = vmax.f32 %v3234_v45, %v3235_v29  ;;  %v7277_v7 = vld [vmem:[#allocation11 + $0x64c] ss:$16 sps:$4 sm:$0xff]   ;;  %v7275_v54 = vld [vmem:[#allocation11 + $0x648] ss:$16 sps:$4 sm:$0xff]   ;;  %v7280_v34 = vld [vmem:[#allocation11 + $0x664] ss:$16 sps:$4 sm:$0xff]  }
 0x4fd   : > { %5080 = vmatpush1.bf16.msra.mxu0 %v7242_v32  ;;  %v7283_v46 = vld [vmem:[#allocation11 + $0x66c] ss:$16 sps:$4 sm:$0xff]   ;;  %v7278_v49 = vld [vmem:[#allocation11 + $0x660] ss:$16 sps:$4 sm:$0xff]   ;;  %v7281_v43 = vld [vmem:[#allocation11 + $0x668] ss:$16 sps:$4 sm:$0xff]  }
 0x4fe   : > { %v3210_v0 = vrot.slane %v3209_v2, 2  ;;  %v3228_v21 = vrot.slane %v3227_v39, 2  ;;  %v3219_v30 = vrot.slane %v3218_v6, 2  ;;  %v3237_v50 = vrot.slane %v3236_v36, 2  ;;  %5244 = vmatpush1.bf16.msra.mxu1 %v7245_v16  ;;  %5081 = vmatprep.subr.bf16.mxu0 %v7250_v26  ;;  %v7286_v45 = vld [vmem:[#allocation11 + $0x684] ss:$16 sps:$4 sm:$0xff]  }
 0x4ff   : > { %5245 = vmatprep.subr.bf16.mxu1 %v7253_v63  ;;  %v7289_v62 = vld [vmem:[#allocation11 + $0x68c] ss:$16 sps:$4 sm:$0xff]   ;;  %v7284_v3 = vld [vmem:[#allocation11 + $0x680] ss:$16 sps:$4 sm:$0xff]   ;;  %v7287_v40 = vld [vmem:[#allocation11 + $0x688] ss:$16 sps:$4 sm:$0xff]  }
 0x500   : > { %v3211_v59 = vmax.f32 %v3209_v2, %v3210_v0  ;;  %v3229_v1 = vmax.f32 %v3227_v39, %v3228_v21  ;;  %v3220_v27 = vmax.f32 %v3218_v6, %v3219_v30  ;;  %v3238_v35 = vmax.f32 %v3236_v36, %v3237_v50  ;;  %v7295_v41 = vld [vmem:[#allocation11 + $0x6ac] ss:$16 sps:$4 sm:$0xff]   ;;  %v7290_v13 = vld [vmem:[#allocation11 + $0x6a0] ss:$16 sps:$4 sm:$0xff]   ;;  %v7293_v60 = vld [vmem:[#allocation11 + $0x6a8] ss:$16 sps:$4 sm:$0xff]  }
 0x501   : > { %5082 = vmatpush1.bf16.msra.mxu0 %v7248_v48  ;;  %v7298_v29 = vld [vmem:[#allocation11 + $0x6c4] ss:$16 sps:$4 sm:$0xff]   ;;  %v7301_v32 = vld [vmem:[#allocation11 + $0x6cc] ss:$16 sps:$4 sm:$0xff]   ;;  %v7296_v16 = vld [vmem:[#allocation11 + $0x6c0] ss:$16 sps:$4 sm:$0xff]  }
 0x502   : > { %v3212_v58 = vrot.slane %v3211_v59, 1  ;;  %v3230_v23 = vrot.slane %v3229_v1, 1  ;;  %v3221_v10 = vrot.slane %v3220_v27, 1  ;;  %v3239_v61 = vrot.slane %v3238_v35, 1  ;;  %5246 = vmatpush1.bf16.msra.mxu1 %v7251_v56  ;;  %5083 = vmatprep.subr.bf16.mxu0 %v7256_v33  ;;  %v7299_v26 = vld [vmem:[#allocation11 + $0x6c8] ss:$16 sps:$4 sm:$0xff]  }
 0x503   : > { %5247 = vmatprep.subr.bf16.mxu1 %v7259_v47  ;;  %v7302_v2 = vld [vmem:[#allocation11 + $0x6e0] ss:$16 sps:$4 sm:$0xff]   ;;  %v7305_v39 = vld [vmem:[#allocation11 + $0x6e8] ss:$16 sps:$4 sm:$0xff]   ;;  %v7310_v6 = vld [vmem:[#allocation11 + $0x704] ss:$16 sps:$4 sm:$0xff]  }
 0x504   : > { %v3213_v37 = vmax.f32 %v3211_v59, %v3212_v58  ;;  %v3231_v24 = vmax.f32 %v3229_v1, %v3230_v23  ;;  %v3222_v22 = vmax.f32 %v3220_v27, %v3221_v10  ;;  %v3240_v17 = vmax.f32 %v3238_v35, %v3239_v61  ;;  %v7313_v36 = vld [vmem:[#allocation11 + $0x70c] ss:$16 sps:$4 sm:$0xff]   ;;  %v7308_v63 = vld [vmem:[#allocation11 + $0x700] ss:$16 sps:$4 sm:$0xff]   ;;  %v7311_v0 = vld [vmem:[#allocation11 + $0x708] ss:$16 sps:$4 sm:$0xff]  }
 0x505   : > { %5084 = vmatpush1.bf16.msra.mxu0 %v7254_v5  ;;  %v7316_v21 = vld [vmem:[#allocation11 + $0x724] ss:$16 sps:$4 sm:$0xff]   ;;  %v7319_v30 = vld [vmem:[#allocation11 + $0x72c] ss:$16 sps:$4 sm:$0xff]   ;;  %v7314_v50 = vld [vmem:[#allocation11 + $0x720] ss:$16 sps:$4 sm:$0xff]  }
 0x506   : > { %v3353_v8 = vsel %vm3317_vm8, %v3222_v22, %v3352_v53  ;;  %v3346_v20 = vsel %vm3317_vm8, %v3213_v37, %v9346_v11  ;;  %v3367_v4 = vsel %vm3317_vm8, %v3240_v17, %v3366_v57  ;;  %v9362_v9 = vsel %vm3317_vm8, %v3231_v24, %v3359_v19  ;;  %5248 = vmatpush1.bf16.msra.mxu1 %v7257_v12  ;;  %v7272_v11 = vld [vmem:[#allocation11 + $0x640] ss:$16 sps:$4 sm:$0xff]   ;;  %v7292_v19 = vld [vmem:[#allocation11 + $0x6a4] ss:$16 sps:$4 sm:$0xff]   ;;  %v7307_v57 = vld [vmem:[#allocation11 + $0x6ec] ss:$16 sps:$4 sm:$0xff]  }
 0x507   : > { %v3411_v38 = vpack.c.bf16 %v3353_v8, %v3353_v8  ;;  %5094 = vmatprep.subr.bf16.mxu0 %v7262_v28  ;;  %5258 = vmatprep.subr.bf16.mxu1 %v7265_v18  ;;  %v3410_v52 = vpack.c.bf16 %v3346_v20, %v3346_v20  ;;  %v3413_v25 = vpack.c.bf16 %v3367_v4, %v3367_v4  ;;  %v7304_v53 = vld [vmem:[#allocation11 + $0x6e4] ss:$16 sps:$4 sm:$0xff]   ;;  %v7317_v48 = vld [vmem:[#allocation11 + $0x728] ss:$16 sps:$4 sm:$0xff]   ;;  %v7325_v33 = vld [vmem:[#allocation11 + $0x74c] ss:$16 sps:$4 sm:$0xff]  }
 0x508   : > { %v7322_v56 = vld [vmem:[#allocation11 + $0x744] ss:$16 sps:$4 sm:$0xff]   ;;  %v7320_v59 = vld [vmem:[#allocation11 + $0x740] ss:$16 sps:$4 sm:$0xff]   ;;  %v7323_v1 = vld [vmem:[#allocation11 + $0x748] ss:$16 sps:$4 sm:$0xff]  }
 0x509   : > { %5085 = vmatprep.mubr.bf16.mxu0 %v3411_v38  ;;  %5249 = vmatprep.mubr.bf16.mxu1 %v3411_v38  ;;  %v7328_v27 = vld [vmem:[#allocation11 + $0x764] ss:$16 sps:$4 sm:$0xff]   ;;  %v7331_v35 = vld [vmem:[#allocation11 + $0x76c] ss:$16 sps:$4 sm:$0xff]   ;;  %v7326_v47 = vld [vmem:[#allocation11 + $0x760] ss:$16 sps:$4 sm:$0xff]  }
 0x50a   : > { %5086 = vmatmul.mubr.bf16.vlgmr.msra.gmra.mrb[144].mxu0 %v3410_v52  ;;  %5250 = vmatmul.mubr.bf16.vlgmr.msra.gmra.mrb[176].mxu1 %v3410_v52  ;;  %v7329_v58 = vld [vmem:[#allocation11 + $0x768] ss:$16 sps:$4 sm:$0xff]   ;;  %v7334_v23 = vld [vmem:[#allocation11 + $0x784] ss:$16 sps:$4 sm:$0xff]   ;;  %v7337_v10 = vld [vmem:[#allocation11 + $0x78c] ss:$16 sps:$4 sm:$0xff]  }
 0x50b   : > { %5095 = vmatpush1.bf16.msra.mxu0 %v7260_v31  ;;  %5259 = vmatpush1.bf16.msra.mxu1 %v7263_v42  ;;  %v7332_v61 = vld [vmem:[#allocation11 + $0x780] ss:$16 sps:$4 sm:$0xff]   ;;  %v7335_v5 = vld [vmem:[#allocation11 + $0x788] ss:$16 sps:$4 sm:$0xff]   ;;  %v7340_v12 = vld [vmem:[#allocation11 + $0x7a4] ss:$16 sps:$4 sm:$0xff]  }
 0x50c   : > { %5126 = vmatprep.mubr.bf16.mxu0 %v3413_v25  ;;  %5290 = vmatprep.mubr.bf16.mxu1 %v3413_v25  ;;  %v7343_v28 = vld [vmem:[#allocation11 + $0x7ac] ss:$16 sps:$4 sm:$0xff]   ;;  %v7338_v37 = vld [vmem:[#allocation11 + $0x7a0] ss:$16 sps:$4 sm:$0xff]   ;;  %v7341_v24 = vld [vmem:[#allocation11 + $0x7a8] ss:$16 sps:$4 sm:$0xff]  }
 0x50d   : > { %5096 = vmatprep.subr.bf16.mxu0 %v7268_v51  ;;  %5260 = vmatprep.subr.bf16.mxu1 %v7271_v44  ;;  %v7346_v22 = vld [vmem:[#allocation11 + $0x7c4] ss:$16 sps:$4 sm:$0xff]   ;;  %v7349_v18 = vld [vmem:[#allocation11 + $0x7cc] ss:$16 sps:$4 sm:$0xff]   ;;  %v7344_v17 = vld [vmem:[#allocation11 + $0x7c0] ss:$16 sps:$4 sm:$0xff]   ;;  %v3412_v51 = vpack.c.bf16 %v9362_v9, %v9362_v9 }
 0x50e   : > { %v7347_v8 = vld [vmem:[#allocation11 + $0x7c8] ss:$16 sps:$4 sm:$0xff]   ;;  %v7352_v20 = vld [vmem:[#allocation11 + $0x7e4] ss:$16 sps:$4 sm:$0xff]   ;;  %v7355_v4 = vld [vmem:[#allocation11 + $0x7ec] ss:$16 sps:$4 sm:$0xff]  }
 0x50f   : > { %5097 = vmatpush1.bf16.msra.mxu0 %v7266_v14  ;;  %5261 = vmatpush1.bf16.msra.mxu1 %v7269_v15  ;;  %v7350_v38 = vld [vmem:[#allocation11 + $0x7e0] ss:$16 sps:$4 sm:$0xff]   ;;  %v7353_v31 = vld [vmem:[#allocation11 + $0x7e8] ss:$16 sps:$4 sm:$0xff]   ;;  %v7358_v42 = vld [vmem:[#allocation12 + $0x4] ss:$8 sps:$4 sm:$0xff]  }
 0x510   : > { %5098 = vmatprep.subr.bf16.mxu0 %v7274_v55  ;;  %5262 = vmatprep.subr.bf16.mxu1 %v7277_v7  ;;  %v7356_v52 = vld [vmem:[#allocation12] ss:$8 sps:$4 sm:$0xff]   ;;  %v7361_v44 = vld [vmem:[#allocation12 + $0x14] ss:$8 sps:$4 sm:$0xff]   ;;  %v7359_v25 = vld [vmem:[#allocation12 + $0x10] ss:$8 sps:$4 sm:$0xff]  }
 0x511   : > { %v7364_v14 = vld [vmem:[#allocation12 + $0x24] ss:$8 sps:$4 sm:$0xff]   ;;  %v7362_v15 = vld [vmem:[#allocation12 + $0x20] ss:$8 sps:$4 sm:$0xff]   ;;  %v7367_v55 = vld [vmem:[#allocation12 + $0x34] ss:$8 sps:$4 sm:$0xff]  }
 0x512   : > { %v7365_v7 = vld [vmem:[#allocation12 + $0x30] ss:$8 sps:$4 sm:$0xff]   ;;  %v7373_v9 = vld [vmem:[#allocation12 + $0x54] ss:$8 sps:$4 sm:$0xff]  }
 0x513   : > { %5099 = vmatpush1.bf16.msra.mxu0 %v7272_v11  ;;  %5263 = vmatpush1.bf16.msra.mxu1 %v7275_v54  ;;  %v7370_v11 = vld [vmem:[#allocation12 + $0x44] ss:$8 sps:$4 sm:$0xff]   ;;  %v7368_v54 = vld [vmem:[#allocation12 + $0x40] ss:$8 sps:$4 sm:$0xff]  }
 0x514   : > { %5100 = vmatprep.subr.bf16.mxu0 %v7280_v34  ;;  %5264 = vmatprep.subr.bf16.mxu1 %v7283_v46  ;;  %v7371_v34 = vld [vmem:[#allocation12 + $0x50] ss:$8 sps:$4 sm:$0xff]   ;;  %v7376_v46 = vld [vmem:[#allocation12 + $0x64] ss:$8 sps:$4 sm:$0xff]  }
 0x517   : > { %5101 = vmatpush1.bf16.msra.mxu0 %v7278_v49  ;;  %5265 = vmatpush1.bf16.msra.mxu1 %v7281_v43  ;;  %v7374_v49 = vld [vmem:[#allocation12 + $0x60] ss:$8 sps:$4 sm:$0xff]   ;;  %v7379_v43 = vld [vmem:[#allocation12 + $0x74] ss:$8 sps:$4 sm:$0xff]  }
 0x518   : > { %5102 = vmatprep.subr.bf16.mxu0 %v7286_v45  ;;  %5266 = vmatprep.subr.bf16.mxu1 %v7289_v62  ;;  %v7377_v45 = vld [vmem:[#allocation12 + $0x70] ss:$8 sps:$4 sm:$0xff]   ;;  %v7382_v62 = vld [vmem:[#allocation12 + $0x84] ss:$8 sps:$4 sm:$0xff]  }
 0x51b   : > { %5103 = vmatpush1.bf16.msra.mxu0 %v7284_v3  ;;  %5267 = vmatpush1.bf16.msra.mxu1 %v7287_v40  ;;  %v7380_v3 = vld [vmem:[#allocation12 + $0x80] ss:$8 sps:$4 sm:$0xff]   ;;  %v7385_v40 = vld [vmem:[#allocation12 + $0x94] ss:$8 sps:$4 sm:$0xff]  }
 0x51c   : > { %5104 = vmatprep.subr.bf16.mxu0 %v7292_v19  ;;  %5268 = vmatprep.subr.bf16.mxu1 %v7295_v41  ;;  %v7383_v19 = vld [vmem:[#allocation12 + $0x90] ss:$8 sps:$4 sm:$0xff]   ;;  %v7388_v41 = vld [vmem:[#allocation12 + $0xa4] ss:$8 sps:$4 sm:$0xff]  }
 0x51f   : > { %5105 = vmatpush1.bf16.msra.mxu0 %v7290_v13  ;;  %5269 = vmatpush1.bf16.msra.mxu1 %v7293_v60  ;;  %v7386_v13 = vld [vmem:[#allocation12 + $0xa0] ss:$8 sps:$4 sm:$0xff]   ;;  %v7391_v60 = vld [vmem:[#allocation12 + $0xb4] ss:$8 sps:$4 sm:$0xff]  }
 0x520   : > { %5106 = vmatprep.subr.bf16.mxu0 %v7298_v29  ;;  %5270 = vmatprep.subr.bf16.mxu1 %v7301_v32  ;;  %v7389_v29 = vld [vmem:[#allocation12 + $0xb0] ss:$8 sps:$4 sm:$0xff]   ;;  %v7394_v32 = vld [vmem:[#allocation12 + $0xc4] ss:$8 sps:$4 sm:$0xff]  }
 0x523   : > { %5107 = vmatpush1.bf16.msra.mxu0 %v7296_v16  ;;  %5271 = vmatpush1.bf16.msra.mxu1 %v7299_v26  ;;  %v7392_v16 = vld [vmem:[#allocation12 + $0xc0] ss:$8 sps:$4 sm:$0xff]   ;;  %v7397_v26 = vld [vmem:[#allocation12 + $0xd4] ss:$8 sps:$4 sm:$0xff]  }
 0x524   : > { %5108 = vmatprep.subr.bf16.mxu0 %v7304_v53  ;;  %5272 = vmatprep.subr.bf16.mxu1 %v7307_v57  ;;  %v7395_v53 = vld [vmem:[#allocation12 + $0xd0] ss:$8 sps:$4 sm:$0xff]   ;;  %v7398_v57 = vld [vmem:[#allocation12 + $0xe0] ss:$8 sps:$4 sm:$0xff]  }
 0x527   : > { %5109 = vmatpush1.bf16.msra.mxu0 %v7302_v2  ;;  %5273 = vmatpush1.bf16.msra.mxu1 %v7305_v39  ;;  %v7400_v2 = vld [vmem:[#allocation12 + $0xe4] ss:$8 sps:$4 sm:$0xff]   ;;  %v7403_v39 = vld [vmem:[#allocation12 + $0xf4] ss:$8 sps:$4 sm:$0xff]  }
 0x528   : > { %5110 = vmatprep.subr.bf16.mxu0 %v7310_v6  ;;  %5274 = vmatprep.subr.bf16.mxu1 %v7313_v36  ;;  %v7401_v6 = vld [vmem:[#allocation12 + $0xf0] ss:$8 sps:$4 sm:$0xff]   ;;  %v7406_v36 = vld [vmem:[#allocation12 + $0x104] ss:$8 sps:$4 sm:$0xff]  }
 0x52b   : > { %5111 = vmatpush1.bf16.msra.mxu0 %v7308_v63  ;;  %5275 = vmatpush1.bf16.msra.mxu1 %v7311_v0  ;;  %v7452_v63 = vld [vmem:[#allocation14] ss:$8 sps:$4 sm:$0xff]   ;;  %v7454_v0 = vld [vmem:[#allocation14 + $0x4] ss:$8 sps:$4 sm:$0xff]  }
 0x52c   : > { %5112 = vmatprep.subr.bf16.mxu0 %v7316_v21  ;;  %5276 = vmatprep.subr.bf16.mxu1 %v7319_v30  ;;  %v7457_v21 = vld [vmem:[#allocation14 + $0x14] ss:$8 sps:$4 sm:$0xff]   ;;  %v7455_v30 = vld [vmem:[#allocation14 + $0x10] ss:$8 sps:$4 sm:$0xff]  }
 0x52f   : > { %5113 = vmatpush1.bf16.msra.mxu0 %v7314_v50  ;;  %5277 = vmatpush1.bf16.msra.mxu1 %v7317_v48  ;;  %v7460_v50 = vld [vmem:[#allocation14 + $0x24] ss:$8 sps:$4 sm:$0xff]   ;;  %v7458_v48 = vld [vmem:[#allocation14 + $0x20] ss:$8 sps:$4 sm:$0xff]  }
 0x530   : > { %5114 = vmatprep.subr.bf16.mxu0 %v7322_v56  ;;  %5278 = vmatprep.subr.bf16.mxu1 %v7325_v33  ;;  %v7463_v56 = vld [vmem:[#allocation14 + $0x34] ss:$8 sps:$4 sm:$0xff]   ;;  %v7461_v33 = vld [vmem:[#allocation14 + $0x30] ss:$8 sps:$4 sm:$0xff]  }
 0x533   : > { %5115 = vmatpush1.bf16.msra.mxu0 %v7320_v59  ;;  %5279 = vmatpush1.bf16.msra.mxu1 %v7323_v1  ;;  %v7466_v59 = vld [vmem:[#allocation14 + $0x44] ss:$8 sps:$4 sm:$0xff]   ;;  %v7464_v1 = vld [vmem:[#allocation14 + $0x40] ss:$8 sps:$4 sm:$0xff]  }
 0x534   : > { %5116 = vmatprep.subr.bf16.mxu0 %v7328_v27  ;;  %5280 = vmatprep.subr.bf16.mxu1 %v7331_v35  ;;  %v7469_v27 = vld [vmem:[#allocation14 + $0x54] ss:$8 sps:$4 sm:$0xff]   ;;  %v7467_v35 = vld [vmem:[#allocation14 + $0x50] ss:$8 sps:$4 sm:$0xff]  }
 0x537   : > { %5117 = vmatpush1.bf16.msra.mxu0 %v7326_v47  ;;  %5281 = vmatpush1.bf16.msra.mxu1 %v7329_v58  ;;  %v7472_v47 = vld [vmem:[#allocation14 + $0x64] ss:$8 sps:$4 sm:$0xff]   ;;  %v7470_v58 = vld [vmem:[#allocation14 + $0x60] ss:$8 sps:$4 sm:$0xff]  }
 0x538   : > { %5118 = vmatprep.subr.bf16.mxu0 %v7334_v23  ;;  %5282 = vmatprep.subr.bf16.mxu1 %v7337_v10  ;;  %v7475_v23 = vld [vmem:[#allocation14 + $0x74] ss:$8 sps:$4 sm:$0xff]   ;;  %v7473_v10 = vld [vmem:[#allocation14 + $0x70] ss:$8 sps:$4 sm:$0xff]  }
 0x53b   : > { %5119 = vmatpush1.bf16.msra.mxu0 %v7332_v61  ;;  %5283 = vmatpush1.bf16.msra.mxu1 %v7335_v5  ;;  %v7478_v61 = vld [vmem:[#allocation14 + $0x84] ss:$8 sps:$4 sm:$0xff]   ;;  %v7476_v5 = vld [vmem:[#allocation14 + $0x80] ss:$8 sps:$4 sm:$0xff]  }
 0x53c   : > { %5120 = vmatprep.subr.bf16.mxu0 %v7340_v12  ;;  %5284 = vmatprep.subr.bf16.mxu1 %v7343_v28  ;;  %v7481_v12 = vld [vmem:[#allocation14 + $0x94] ss:$8 sps:$4 sm:$0xff]   ;;  %v7479_v28 = vld [vmem:[#allocation14 + $0x90] ss:$8 sps:$4 sm:$0xff]  }
 0x53f   : > { %5121 = vmatpush1.bf16.msra.mxu0 %v7338_v37  ;;  %5285 = vmatpush1.bf16.msra.mxu1 %v7341_v24  ;;  %v7484_v37 = vld [vmem:[#allocation14 + $0xa4] ss:$8 sps:$4 sm:$0xff]   ;;  %v7482_v24 = vld [vmem:[#allocation14 + $0xa0] ss:$8 sps:$4 sm:$0xff]  }
 0x540   : > { %5122 = vmatprep.subr.bf16.mxu0 %v7346_v22  ;;  %5286 = vmatprep.subr.bf16.mxu1 %v7349_v18  ;;  %v7487_v22 = vld [vmem:[#allocation14 + $0xb4] ss:$8 sps:$4 sm:$0xff]   ;;  %v7485_v18 = vld [vmem:[#allocation14 + $0xb0] ss:$8 sps:$4 sm:$0xff]  }
 0x543   : > { %5123 = vmatpush1.bf16.msra.mxu0 %v7344_v17  ;;  %5287 = vmatpush1.bf16.msra.mxu1 %v7347_v8  ;;  %v7490_v17 = vld [vmem:[#allocation14 + $0xc4] ss:$8 sps:$4 sm:$0xff]   ;;  %v7488_v8 = vld [vmem:[#allocation14 + $0xc0] ss:$8 sps:$4 sm:$0xff]  }
 0x544   : > { %5124 = vmatprep.subr.bf16.mxu0 %v7352_v20  ;;  %5288 = vmatprep.subr.bf16.mxu1 %v7355_v4  ;;  %v7493_v20 = vld [vmem:[#allocation14 + $0xd4] ss:$8 sps:$4 sm:$0xff]   ;;  %v9369_v4 = vld [vmem:[%s9455_s7 + $0xa] sm:$0xf] }
 0x547   : > { %5125 = vmatpush1.bf16.msra.mxu0 %v7350_v38  ;;  %5289 = vmatpush1.bf16.msra.mxu1 %v7353_v31  ;;  %v7491_v38 = vld [vmem:[#allocation14 + $0xd0] ss:$8 sps:$4 sm:$0xff]   ;;  %v9538_v31 = vld [vmem:[#allocation23_spill] sm:$0xff] }
 0x548   : > { %5702 = vmatprep.subr.bf16.mxu0 %v7358_v42  ;;  %5991 = vmatprep.subr.bf16.mxu1 %v7454_v0  ;;  %v3674_v42 = vrot.slane %v9369_v4, %v9538_v31  ;;  %v7422_v0 = vld [vmem:[#allocation12 + $0x160] ss:$8 sps:$4 sm:$0xff]  }
 0x54a   : > { %5127 = vmatmul.mubr.bf16.vlgmr.msra.gmra.mrb[144].mxu0 %v3412_v51  ;;  %5291 = vmatmul.mubr.bf16.vlgmr.msra.gmra.mrb[176].mxu1 %v3412_v51 }
 0x54b   : > { %5703 = vmatpush1.bf16.msra.mxu0 %v7356_v52  ;;  %5992 = vmatpush1.bf16.msra.mxu1 %v7452_v63  ;;  %v9539_v52 = vld [vmem:[#allocation24_spill] sm:$0xff]  ;;  %v7424_v63 = vld [vmem:[#allocation12 + $0x164] ss:$8 sps:$4 sm:$0xff]  }
 0x54c   : > { %5704 = vmatprep.subr.bf16.mxu0 %v7361_v44  ;;  %5993 = vmatprep.subr.bf16.mxu1 %v7457_v21  ;;  %v3678_v51 = vrot.slane %v9369_v4, %v9539_v52  ;;  %v9540_v44 = vld [vmem:[#allocation22_spill] sm:$0xff]  ;;  %v7427_v21 = vld [vmem:[#allocation12 + $0x174] ss:$8 sps:$4 sm:$0xff]  }
 0x54f   : > { %5705 = vmatpush1.bf16.msra.mxu0 %v7359_v25  ;;  %5994 = vmatpush1.bf16.msra.mxu1 %v7455_v30  ;;  %v9541_v25 = vsub.s32 3, %v9540_v44  ;;  %v7425_v30 = vld [vmem:[#allocation12 + $0x170] ss:$8 sps:$4 sm:$0xff]  }
 0x550   : > { %5706 = vmatprep.subr.bf16.mxu0 %v7364_v14  ;;  %5995 = vmatprep.subr.bf16.mxu1 %v7460_v50  ;;  %v7430_v50 = vld [vmem:[#allocation12 + $0x184] ss:$8 sps:$4 sm:$0xff]  }
 0x551   : > { %v3686_v14 = vrot.slane %v9369_v4, %v9541_v25 }
 0x553   : > { %5707 = vmatpush1.bf16.msra.mxu0 %v7362_v15  ;;  %5996 = vmatpush1.bf16.msra.mxu1 %v7458_v48  ;;  %v7428_v48 = vld [vmem:[#allocation12 + $0x180] ss:$8 sps:$4 sm:$0xff]  }
 0x554   : > { %5708 = vmatprep.subr.bf16.mxu0 %v7367_v55  ;;  %5997 = vmatprep.subr.bf16.mxu1 %v7463_v56  ;;  %v7433_v56 = vld [vmem:[#allocation12 + $0x194] ss:$8 sps:$4 sm:$0xff]  }
 0x557   : > { %5709 = vmatpush1.bf16.msra.mxu0 %v7365_v7  ;;  %5998 = vmatpush1.bf16.msra.mxu1 %v7461_v33  ;;  %v7431_v33 = vld [vmem:[#allocation12 + $0x190] ss:$8 sps:$4 sm:$0xff]  }
 0x558   : > { %5710 = vmatprep.subr.bf16.mxu0 %v7370_v11  ;;  %5999 = vmatprep.subr.bf16.mxu1 %v7466_v59  ;;  %v7436_v59 = vld [vmem:[#allocation12 + $0x1a4] ss:$8 sps:$4 sm:$0xff]  }
 0x55b   : > { %5711 = vmatpush1.bf16.msra.mxu0 %v7368_v54  ;;  %6000 = vmatpush1.bf16.msra.mxu1 %v7464_v1  ;;  %v7434_v1 = vld [vmem:[#allocation12 + $0x1a0] ss:$8 sps:$4 sm:$0xff]  }
 0x55c   : > { %5712 = vmatprep.subr.bf16.mxu0 %v7373_v9  ;;  %6001 = vmatprep.subr.bf16.mxu1 %v7469_v27  ;;  %v7439_v27 = vld [vmem:[#allocation12 + $0x1b4] ss:$8 sps:$4 sm:$0xff]  }
 0x55f   : > { %5713 = vmatpush1.bf16.msra.mxu0 %v7371_v34  ;;  %6002 = vmatpush1.bf16.msra.mxu1 %v7467_v35  ;;  %v7437_v35 = vld [vmem:[#allocation12 + $0x1b0] ss:$8 sps:$4 sm:$0xff]  }
 0x560   : > { %5714 = vmatprep.subr.bf16.mxu0 %v7376_v46  ;;  %6003 = vmatprep.subr.bf16.mxu1 %v7472_v47  ;;  %v7442_v47 = vld [vmem:[#allocation12 + $0x1c4] ss:$8 sps:$4 sm:$0xff]  }
 0x563   : > { %5715 = vmatpush1.bf16.msra.mxu0 %v7374_v49  ;;  %6004 = vmatpush1.bf16.msra.mxu1 %v7470_v58  ;;  %v7440_v58 = vld [vmem:[#allocation12 + $0x1c0] ss:$8 sps:$4 sm:$0xff]  }
 0x564   : > { %5716 = vmatprep.subr.bf16.mxu0 %v7379_v43  ;;  %6005 = vmatprep.subr.bf16.mxu1 %v7475_v23  ;;  %v7445_v23 = vld [vmem:[#allocation12 + $0x1d4] ss:$8 sps:$4 sm:$0xff]  }
 0x567   : > { %5717 = vmatpush1.bf16.msra.mxu0 %v7377_v45  ;;  %6006 = vmatpush1.bf16.msra.mxu1 %v7473_v10  ;;  %v7443_v10 = vld [vmem:[#allocation12 + $0x1d0] ss:$8 sps:$4 sm:$0xff]  }
 0x568   : > { %5718 = vmatprep.subr.bf16.mxu0 %v7382_v62  ;;  %6007 = vmatprep.subr.bf16.mxu1 %v7478_v61  ;;  %v9542_v61 = vsub.s32 2, %v9540_v44 }
 0x56b   : > { %5719 = vmatpush1.bf16.msra.mxu0 %v7380_v3  ;;  %6008 = vmatpush1.bf16.msra.mxu1 %v7476_v5  ;;  %v3682_v5 = vrot.slane %v9369_v4, %v9542_v61  ;;  %v7497_v4 = vld [vmem:[#allocation14 + $0xf0] ss:$8 sps:$4 sm:$0xff]  }
 0x56c   : > { %5720 = vmatprep.subr.bf16.mxu0 %v7385_v40  ;;  %6009 = vmatprep.subr.bf16.mxu1 %v7481_v12  ;;  %v7448_v12 = vld [vmem:[#allocation12 + $0x1e4] ss:$8 sps:$4 sm:$0xff]  }
 0x56f   : > { %5721 = vmatpush1.bf16.msra.mxu0 %v7383_v19  ;;  %6010 = vmatpush1.bf16.msra.mxu1 %v7479_v28  ;;  %v7446_v28 = vld [vmem:[#allocation12 + $0x1e0] ss:$8 sps:$4 sm:$0xff]  }
 0x570   : > { %5722 = vmatprep.subr.bf16.mxu0 %v7388_v41  ;;  %6011 = vmatprep.subr.bf16.mxu1 %v7484_v37  ;;  %v7404_v41 = vld [vmem:[#allocation12 + $0x100] ss:$8 sps:$4 sm:$0xff]  }
 0x573   : > { %5723 = vmatpush1.bf16.msra.mxu0 %v7386_v13  ;;  %6012 = vmatpush1.bf16.msra.mxu1 %v7482_v24  ;;  %v7451_v24 = vld [vmem:[#allocation12 + $0x1f4] ss:$8 sps:$4 sm:$0xff]  }
 0x574   : > { %5724 = vmatprep.subr.bf16.mxu0 %v7391_v60  ;;  %6013 = vmatprep.subr.bf16.mxu1 %v7487_v22  ;;  %v7409_v60 = vld [vmem:[#allocation12 + $0x114] ss:$8 sps:$4 sm:$0xff]   ;;  %v7449_v22 = vld [vmem:[#allocation12 + $0x1f0] ss:$8 sps:$4 sm:$0xff]  }
 0x577   : > { %5725 = vmatpush1.bf16.msra.mxu0 %v7389_v29  ;;  %6014 = vmatpush1.bf16.msra.mxu1 %v7485_v18 }
 0x578   : > { %5726 = vmatprep.subr.bf16.mxu0 %v7394_v32  ;;  %6015 = vmatprep.subr.bf16.mxu1 %v7490_v17  ;;  %v7407_v32 = vld [vmem:[#allocation12 + $0x110] ss:$8 sps:$4 sm:$0xff]  }
 0x57b   : > { %5727 = vmatpush1.bf16.msra.mxu0 %v7392_v16  ;;  %6016 = vmatpush1.bf16.msra.mxu1 %v7488_v8  ;;  %v7412_v16 = vld [vmem:[#allocation12 + $0x124] ss:$8 sps:$4 sm:$0xff]   ;;  %v7494_v8 = vld [vmem:[#allocation14 + $0xe0] ss:$8 sps:$4 sm:$0xff]  }
 0x57c   : > { %5728 = vmatprep.subr.bf16.mxu0 %v7397_v26  ;;  %6017 = vmatprep.subr.bf16.mxu1 %v7493_v20  ;;  %v7410_v26 = vld [vmem:[#allocation12 + $0x120] ss:$8 sps:$4 sm:$0xff]   ;;  %v7496_v20 = vld [vmem:[#allocation14 + $0xe4] ss:$8 sps:$4 sm:$0xff]  }
 0x57f   : > { %5729 = vmatpush1.bf16.msra.mxu0 %v7395_v53  ;;  %6018 = vmatpush1.bf16.msra.mxu1 %v7491_v38  ;;  %v7415_v53 = vld [vmem:[#allocation12 + $0x134] ss:$8 sps:$4 sm:$0xff]  }
 0x580   : > { %5730 = vmatprep.subr.bf16.mxu0 %v7400_v2  ;;  %v7418_v2 = vld [vmem:[#allocation12 + $0x144] ss:$8 sps:$4 sm:$0xff]   ;;  %v7499_v38 = vld [vmem:[#allocation14 + $0xf4] ss:$8 sps:$4 sm:$0xff]   ;;  %6019 = vmatprep.subr.bf16.mxu1 %v7496_v20 }
 0x583   : > { %5731 = vmatpush1.bf16.msra.mxu0 %v7398_v57  ;;  %v7413_v57 = vld [vmem:[#allocation12 + $0x130] ss:$8 sps:$4 sm:$0xff]   ;;  %6020 = vmatpush1.bf16.msra.mxu1 %v7494_v8 }
 0x584   : > { %5732 = vmatprep.subr.bf16.mxu0 %v7403_v39  ;;  %v7416_v39 = vld [vmem:[#allocation12 + $0x140] ss:$8 sps:$4 sm:$0xff]   ;;  %6021 = vmatprep.subr.bf16.mxu1 %v7499_v38 }
 0x587   : > { %5733 = vmatpush1.bf16.msra.mxu0 %v7401_v6  ;;  %v7421_v6 = vld [vmem:[#allocation12 + $0x154] ss:$8 sps:$4 sm:$0xff]   ;;  %6022 = vmatpush1.bf16.msra.mxu1 %v7497_v4 }
 0x588   : > { %5743 = vmatprep.subr.bf16.mxu0 %v7406_v36  ;;  %v7419_v36 = vld [vmem:[#allocation12 + $0x150] ss:$8 sps:$4 sm:$0xff]  }
 0x61d   : > { %v5128_v15 = vpop.f32.mrb[144].mxu0  ;;  %v9378_v55 = vpop.f32.mrb[176].mxu1 }
 0x61e   : > { %v6793_v7 = vadd.f32 %v5128_v15, %v3674_v42  ;;  %v5130_v11 = vpop.f32.mrb[145].mxu0  ;;  %v5294_v54 = vpop.f32.mrb[177].mxu1  ;;  %v6795_v37 = vadd.f32 %v9378_v55, %v3682_v5  ;;  %v3396_v42 = vld [vmem:[%s9455_s7 + $0xe] sm:$0x3] }
 0x61f   : > { %v6794_v9 = vadd.f32 %v5130_v11, %v3678_v51  ;;  %v6796_v34 = vadd.f32 %v5294_v54, %v3686_v14  ;;  %v5132_v46 = vpop.f32.mrb[146].mxu0  ;;  %v5296_v49 = vpop.f32.mrb[178].mxu1  ;;  %v5375_v51 = vrot.slane %v3396_v42, %v9538_v31  ;;  %v5379_v44 = vrot.slane %v3396_v42, %v9539_v52 }
 0x620   : > { %v5299_v43 = vmax.f32 %v6793_v7, 0.0  ;;  %v5133_v45 = vpop.f32.mrb[147].mxu0  ;;  %v5297_v62 = vpop.f32.mrb[179].mxu1  ;;  %v5301_v18 = vmax.f32 %v6795_v37, 0.0  ;;  %v3397_v49 = vld [vmem:[%s9455_s7 + $0x10] sm:$0x3] }
 0x621   : > { %v5300_v3 = vmax.f32 %v6794_v9, 0.0  ;;  %v5302_v40 = vmax.f32 %v6796_v34, 0.0  ;;  %v5828_v45 = vrot.slane %v3397_v49, %v9539_v52 }
 0x622   : > { %v5303_v13 = vpack.c.bf16 %v5299_v43, %v5299_v43  ;;  %v5305_v17 = vpack.c.bf16 %v5301_v18, %v5301_v18  ;;  %v5824_v43 = vrot.slane %v3397_v49, %v9538_v31 }
 0x623   : > { %v5304_v19 = vpack.c.bf16 %v5300_v3, %v5300_v3  ;;  %v5306_v29 = vpack.c.bf16 %v5302_v40, %v5302_v40 }
 0x625   : > { %5734 = vmatprep.mubr.bf16.mxu0 %v5304_v19 }
 0x626   : > { %5735 = vmatmul.mubr.bf16.vlgmr.msra.gmra.mrb[148].mxu0 %v5303_v13 }
 0x627   : > { %5744 = vmatpush1.bf16.msra.mxu0 %v7404_v41  ;;  %5775 = vmatprep.mubr.bf16.mxu0 %v5306_v29 }
 0x628   : > { %5745 = vmatprep.subr.bf16.mxu0 %v7409_v60 }
 0x62b   : > { %5746 = vmatpush1.bf16.msra.mxu0 %v7407_v32 }
 0x62c   : > { %5747 = vmatprep.subr.bf16.mxu0 %v7412_v16 }
 0x62f   : > { %5748 = vmatpush1.bf16.msra.mxu0 %v7410_v26 }
 0x630   : > { %5749 = vmatprep.subr.bf16.mxu0 %v7415_v53 }
 0x633   : > { %5750 = vmatpush1.bf16.msra.mxu0 %v7413_v57 }
 0x634   : > { %5751 = vmatprep.subr.bf16.mxu0 %v7418_v2 }
 0x637   : > { %5752 = vmatpush1.bf16.msra.mxu0 %v7416_v39 }
 0x638   : > { %5753 = vmatprep.subr.bf16.mxu0 %v7421_v6 }
 0x63b   : > { %5754 = vmatpush1.bf16.msra.mxu0 %v7419_v36 }
 0x63c   : > { %5755 = vmatprep.subr.bf16.mxu0 %v7424_v63 }
 0x63f   : > { %5756 = vmatpush1.bf16.msra.mxu0 %v7422_v0 }
 0x640   : > { %5757 = vmatprep.subr.bf16.mxu0 %v7427_v21 }
 0x643   : > { %5758 = vmatpush1.bf16.msra.mxu0 %v7425_v30 }
 0x644   : > { %5759 = vmatprep.subr.bf16.mxu0 %v7430_v50 }
 0x647   : > { %5760 = vmatpush1.bf16.msra.mxu0 %v7428_v48 }
 0x648   : > { %5761 = vmatprep.subr.bf16.mxu0 %v7433_v56 }
 0x64b   : > { %5762 = vmatpush1.bf16.msra.mxu0 %v7431_v33 }
 0x64c   : > { %5763 = vmatprep.subr.bf16.mxu0 %v7436_v59 }
 0x64f   : > { %5764 = vmatpush1.bf16.msra.mxu0 %v7434_v1 }
 0x650   : > { %5765 = vmatprep.subr.bf16.mxu0 %v7439_v27 }
 0x653   : > { %5766 = vmatpush1.bf16.msra.mxu0 %v7437_v35 }
 0x654   : > { %5767 = vmatprep.subr.bf16.mxu0 %v7442_v47 }
 0x657   : > { %5768 = vmatpush1.bf16.msra.mxu0 %v7440_v58 }
 0x658   : > { %5769 = vmatprep.subr.bf16.mxu0 %v7445_v23 }
 0x65b   : > { %5770 = vmatpush1.bf16.msra.mxu0 %v7443_v10 }
 0x65c   : > { %5771 = vmatprep.subr.bf16.mxu0 %v7448_v12 }
 0x65f   : > { %5772 = vmatpush1.bf16.msra.mxu0 %v7446_v28 }
 0x660   : > { %5773 = vmatprep.subr.bf16.mxu0 %v7451_v24 }
 0x663   : > { %5774 = vmatpush1.bf16.msra.mxu0 %v7449_v22 }
 0x666   : > { %5776 = vmatmul.mubr.bf16.vlgmr.msra.gmra.mrb[148].mxu0 %v5305_v17 }
 0x739   : > { %v5777_v25 = vpop.f32.mrb[148].mxu0 }
 0x73a   : > { %v6797_v14 = vadd.f32 %v5777_v25, %v5375_v51  ;;  %v5779_v15 = vpop.f32.mrb[149].mxu0 }
 0x73b   : > { %v6798_v55 = vadd.f32 %v5779_v15, %v5379_v44  ;;  %v5781_v7 = vpop.f32.mrb[150].mxu0 }
 0x73c   : > { %v5784_v11 = vmax.f32 %v6797_v14, 0.0  ;;  %v5782_v54 = vpop.f32.mrb[151].mxu0 }
 0x73d   : > { %v5785_v9 = vmax.f32 %v6798_v55, 0.0 }
 0x73e   : > { %v5786_v46 = vpack.c.bf16 %v5784_v11, %v5784_v11 }
 0x73f   : > { %v5787_v34 = vpack.c.bf16 %v5785_v9, %v5785_v9 }
 0x741   : > { %6023 = vmatprep.mubr.bf16.mxu1 %v5787_v34 }
 0x742   : > { %6024 = vmatmul.mubr.bf16.vlgmr.msra.gmra.mrb[180].mxu1 %v5786_v46 }
 0x815   : > { %v6025_v62 = vpop.f32.mrb[180].mxu1 }
 0x816   : > { %v6026_v3 = vadd.f32 %v6025_v62, %v5824_v43  ;;  %v6027_v40 = vpop.f32.mrb[181].mxu1 }
 0x817   : > { %v6028_v19 = vadd.f32 %v6027_v40, %v5828_v45  ;;  %v6029_v41 = vpop.f32.mrb[182].mxu1 }
 0x818   : > { %6032 = vst [vmem:[%s426_s1] sm:$0xff] %v6026_v3  ;;  %v6030_v31 = vpop.f32.mrb[183].mxu1 }
 0x819   : > { %6033 = vst [vmem:[%s426_s1 + $0x8] sm:$0xff] %v6028_v19 }
 0x81a   : > { %7712 = shalt.err (!%p7709_p8)
}
 0x81b   : > { %s7713_s3 = scalar_lea.hbm %s9399_s25, 256  ;;  %s7717_s13 = scalar_lea.hbm %s9545_s21, 512 }
 0x81c   : > { %p7714_p3 = scmp.ne.s32.totalorder %s9399_s25, %s7713_s3  ;;  %p7718_p13 = scmp.lt.u32.totalorder %s9399_s25, %s9545_s21 }
 0x81d   : > { %p7719_p1 = scmp.lt.u32.totalorder %s7717_s13, %s7713_s3  ;;  %p7721_p2 = scmp.lt.u32.totalorder %s7713_s3, %s9399_s25 }
 0x81e   : > { %p7715_p11 = pnand %p7714_p3, %p9546_p9 }
 0x81f   : > { %p7720_p4 = por %p7719_p1, %p7718_p13 }
 0x820   : > { %p7716_p6 = pneg %p7715_p11 }
 0x821   : > { %p7722_p10 = por %p7721_p2, %p7720_p4 }
 0x823   : > { %p7723_p12 = pnand %p7722_p10, %p7716_p6 }
 0x825   : > { %7726 = shalt.err (!%p7723_p12)
}
 0x826   : > { %6853 = dma.vmem_to_hbm [thread:$0]  (%p9546_p9), %s9401_s19, 256, %s9399_s25, %s6035_s22  }
 0x827 PF: > { %s6061_s20 = sand.u32 1, %s7773_s27   ;;  %p9547_p0 = scmp.ne.s32.totalorder %s9496_s18, 0 }
 0x828   : > { %p9548_p7 = scmp.ge.s32.totalorder %s7793_s10, 2  ;;  %s6062_s30 = scalar_lea.sflag [#allocation5], %s6061_s20 }
 0x82a   : > { %p6879_p5 = pnand %p9548_p7, %p9547_p0 }
 0x82c   : > { %7768 = dma.done.wait (!%p6879_p5), %s6062_s30, 256  }
 0x82d   : > { %7770 = vsyncadd (!%p6879_p5), %s6062_s30, 4294967040  ;;  %s27_s10 = sadd.s32 1, %s7793_s10   ;;  %s9549_s27 = smov %s7777_s28 }
 0x82e   : > { %p24_p8 = scmp.ge.s32.totalorder %s27_s10, 4   ;;  %s9550_s28 = smov %s7781_s29 }
 0x82f   : > { %s9551_s29 = smov %s8078_s15  ;;  %s9552_s30 = smov %s7789_s9 }
 0x830   : > { %s9553_s9 = smov %s9555_s24  ;;  %26 = sbr.rel (!%p24_p8) target bundleno = 13 (0xd), region = 129 }
 0x837   :  { %6067 = vsyncpa [#allocation4], 1 }
 0x838   :  { %6069 = vsyncpa [#allocation4 + $0x1], 1 }
 0x839   :  { %6070 = vsyncpa [#allocation7], 1 }
 0x83a   :  { %6071 = vsyncpa [#allocation10], 1 }
 0x83b   :  { %6072 = vsyncpa [#allocation13], 1 }
 0x83c   :  { %6073 = vsyncpa [#allocation5], 1 }
 0x83d   :  { %6075 = vsyncpa [#allocation5 + $0x1], 1 }

</bundles_post_ra>
